<compile_context>
chip_gen: v7x
topology: tpu7x:2x2x1
jax: 0.10.0
libtpu: 0.0.40
codegen_flags: <defaults>
</compile_context>

<pallas_src>
import numpy as np
import jax
import jax.numpy as jnp
from jax.experimental import pallas as pl
from jax.experimental.pallas import tpu as pltpu

# Deterministic stand-in for `torch.rand((3, 3)).abs()` Hessian jitter.
# TODO(synk): torch.rand has no bit-exact JAX equivalent; a fixed deterministic
# uniform(0,1) 3x3 matrix is used instead (same semantics: tiny positive
# regularization of the Hessian, scaled by eps).
_JITTER = np.random.RandomState(1234).rand(3, 3).astype(np.float32)


def _jitter_matrix(eps):
    m = np.abs(_JITTER) * np.float32(eps)
    return tuple(tuple(float(v) for v in row) for row in m)


def _solve_and_update(c, gx, gy, gs, dxx, dyy, dss, dxy, dys, dxs,
                      nms_mask, jitter, strict_maxima_bonus):
    """Per-voxel Hessian solve (Cramer's rule) + quadratic update.

    Shared verbatim by the Pallas kernel and the pure-JAX reference, so the
    solve math is identical in both; the stencil / NMS / layout machinery is
    implemented independently in each and cross-checked in __main__."""
    one = jnp.float32(1.0)
    a00 = dxx + jitter[0][0]; a01 = dxy + jitter[0][1]; a02 = dxs + jitter[0][2]
    a10 = dxy + jitter[1][0]; a11 = dyy + jitter[1][1]; a12 = dys + jitter[1][2]
    a20 = dxs + jitter[2][0]; a21 = dys + jitter[2][1]; a22 = dss + jitter[2][2]
    b0, b1, b2 = gx, gy, gs

    # torch.solve(b, Hes) per voxel -> closed-form 3x3 Cramer's rule.
    m00 = a11 * a22 - a12 * a21
    m01 = a10 * a22 - a12 * a20
    m02 = a10 * a21 - a11 * a20
    det = a00 * m00 - a01 * m01 + a02 * m02
    # NOTE: exact divide kept on purpose -- det can be ~eps-scale for
    # near-singular Hessians, so pl.reciprocal(approx=True) could break the
    # tolerance.  det == 0 is guarded (torch.solve would error there); the
    # resulting offsets then rely on the 0.7 clamp below.
    inv_det = one / jnp.where(det == 0.0, one, det)

    x0 = (b0 * m00 - a01 * (b1 * a22 - a12 * b2) + a02 * (b1 * a21 - a11 * b2)) * inv_det
    x1 = (a00 * (b1 * a22 - a12 * b2) - b0 * m01 + a02 * (a10 * b2 - b1 * a20)) * inv_det
    x2 = (a00 * (a11 * b2 - b1 * a21) - a01 * (a10 * b2 - b1 * a20) + b0 * m02) * inv_det

    zero = jnp.zeros_like(c)
    # masked_scatter_: keep the solution only at strict-maxima voxels.
    x0 = jnp.where(nms_mask, x0, zero)
    x1 = jnp.where(nms_mask, x1, zero)
    x2 = jnp.where(nms_mask, x2, zero)

    dx0, dx1, dx2 = -x0, -x1, -x2
    too_far = jnp.maximum(jnp.maximum(jnp.abs(dx0), jnp.abs(dx1)), jnp.abs(dx2)) > 0.7
    dx0 = jnp.where(too_far, zero, dx0)
    dx1 = jnp.where(too_far, zero, dx1)
    dx2 = jnp.where(too_far, zero, dx2)

    dy = 0.5 * (b0 * dx0 + b1 * dx1 + b2 * dx2)
    y = c + dy
    if strict_maxima_bonus > 0:
        y = y + jnp.float32(strict_maxima_bonus) * nms_mask.astype(c.dtype)
    return y, dx0, dx1, dx2


def _build_kernel(G, D, H, W, strict_maxima_bonus, jitter):
    HW = H * W
    DHW = D * HW

    def kernel(aux_ref, x_ref, y_ref, coords_ref):
        # Constant lane-structure table (same block every grid step):
        #   row 0: w coord   row 1: h coord
        #   row 2: w == 0    row 3: w == W-1   row 4: h == 0   row 5: h == H-1
        w_f = jnp.broadcast_to(aux_ref[0:1, :], (G, HW))
        h_f = jnp.broadcast_to(aux_ref[1:2, :], (G, HW))
        m_w0 = jnp.broadcast_to(aux_ref[2:3, :], (G, HW)) > 0.5
        m_wL = jnp.broadcast_to(aux_ref[3:4, :], (G, HW)) > 0.5
        m_h0 = jnp.broadcast_to(aux_ref[4:5, :], (G, HW)) > 0.5
        m_hL = jnp.broadcast_to(aux_ref[5:6, :], (G, HW)) > 0.5

        # Shifted views of a (G, H*W) plane along the flattened (h, w) lane
        # axis.  The lane rotation wraps across row/slab boundaries, but those
        # are exactly the boundary lanes that get overwritten with `fill`
        # (replicate value or 0), so the result is the correctly padded shift.
        def w_plus(q, fill):   # value at (h, w+1)
            s = jnp.concatenate([q[:, 1:], q[:, :1]], axis=1)
            return jnp.where(m_wL, fill, s)

        def w_minus(q, fill):  # value at (h, w-1)
            s = jnp.concatenate([q[:, -1:], q[:, :-1]], axis=1)
            return jnp.where(m_w0, fill, s)

        def h_plus(q, fill):   # value at (h+1, w)
            s = jnp.concatenate([q[:, W:], q[:, :W]], axis=1)
            return jnp.where(m_hL, fill, s)

        def h_minus(q, fill):  # value at (h-1, w)
            s = jnp.concatenate([q[:, -W:], q[:, :-W]], axis=1)
            return jnp.where(m_h0, fill, s)

        def plane_stats(d):
            """Load plane d and its separable NMS reductions (zero padding).

            full : 3x3 in-plane max incl. centre  -> used when this plane is a
                   d+-1 neighbour of the centre plane.
            cen8 : max of the 8 in-plane neighbours (excl. centre) -> used when
                   this plane is the centre plane.
            """
            q = x_ref[:, d * HW:(d + 1) * HW]       # aligned lane slice
            wp = w_plus(q, 0.0)
            wm = w_minus(q, 0.0)
            a = jnp.maximum(q, jnp.maximum(wp, wm))
            hpa = h_plus(a, 0.0)
            hma = h_minus(a, 0.0)
            full = jnp.maximum(a, jnp.maximum(hpa, hma))
            cen8 = jnp.maximum(jnp.maximum(hpa, hma), jnp.maximum(wp, wm))
            return q, full, cen8

        # Rolling prev/cur/next window over D-planes keeps temporaries small.
        cur = plane_stats(0)
        nxt = plane_stats(1) if D > 1 else None
        prv = None

        for d in range(D):
            c, _c_full, c_cen8 = cur
            m = prv[0] if prv is not None else c   # replicate pad along D (derivatives)
            p = nxt[0] if nxt is not None else c

            # nms3d(input, (3,3,3), True): strict max over the 26 neighbours
            # with zero padding at the borders; kornia zeroes the centre
            # channel, so 0 is always part of the max (missing d+-1 planes at
            # the D borders therefore contribute nothing extra).
            neigh = jnp.maximum(c_cen8, 0.0)
            if prv is not None:
                neigh = jnp.maximum(neigh, prv[1])
            if nxt is not None:
                neigh = jnp.maximum(neigh, nxt[1])
            nms_mask = c > neigh

            # spatial_gradient3d(order=1/2, mode='diff'), replicate padding.
            cwp = w_plus(c, c)
            cwm = w_minus(c, c)
            chp = h_plus(c, c)
            chm = h_minus(c, c)

            gx = 0.5 * (cwp - cwm)
            gy = 0.5 * (chp - chm)
            gs = 0.5 * (p - m)
            dxx = cwp - 2.0 * c + cwm
            dyy = chp - 2.0 * c + chm
            dss = p - 2.0 * c + m
            dxy = 0.25 * (h_plus(cwp, cwp) - h_plus(cwm, cwm)
                          - h_minus(cwp, cwp) + h_minus(cwm, cwm))
            dys = 0.25 * (h_plus(p, p) - h_minus(p, p)
                          - h_plus(m, m) + h_minus(m, m))
            dxs = 0.25 * (w_plus(p, p) - w_minus(p, p)
                          - w_plus(m, m) + w_minus(m, m))

            y, dx_w, dx_h, dx_s = _solve_and_update(
                c, gx, gy, gs, dxx, dyy, dss, dxy, dys, dxs,
                nms_mask, jitter, strict_maxima_bonus)

            # Lane-dense, aligned stores (offsets are multiples of H*W).
            lo = d * HW
            y_ref[:, lo:lo + HW] = y
            # coords_max channels reproduce
            #   create_meshgrid3d(D,H,W,False).permute(0,4,1,2,3) + dx.flip(1):
            #   grid channels carry (d, w, h); flipped offsets carry (ds, dy, dx).
            coords_ref[:, lo:lo + HW] = dx_s + jnp.float32(d)
            coords_ref[:, DHW + lo:DHW + lo + HW] = w_f + dx_h
            coords_ref[:, 2 * DHW + lo:2 * DHW + lo + HW] = h_f + dx_w

            prv = cur
            cur = nxt
            nxt = plane_stats(d + 2) if (d + 2) < D else None

    return kernel


def _pick_group(S):
    # 8 slabs fill the 8 vreg sublanes; otherwise fall back to one full-extent
    # block over the slab axis (a full-dim block is always a legal block shape).
    if S % 8 == 0:
        return 8
    return S


def conv_quad_interp3d(x, strict_maxima_bonus=10.0, eps=1e-7):
    if x.ndim != 5:
        raise ValueError("Invalid input shape, we expect BxCxDxHxW. Got: {}".format(x.shape))
    B, C, D, H, W = x.shape
    S = B * C
    HW = H * W
    DHW = D * HW
    G = _pick_group(S)

    # Free reshape: slab (b, c) -> sublane row, flattened (d, h, w) -> lanes.
    xf = x.astype(jnp.float32).reshape(S, DHW)

    # Tiny constant table with the per-lane (w, h) coordinates and the four
    # boundary masks (padded to 8 rows for tile alignment).
    wv = np.tile(np.arange(W, dtype=np.float32), H)
    hv = np.repeat(np.arange(H, dtype=np.float32), W)
    aux = np.zeros((8, HW), np.float32)
    aux[0] = wv
    aux[1] = hv
    aux[2] = (wv == 0).astype(np.float32)
    aux[3] = (wv == W - 1).astype(np.float32)
    aux[4] = (hv == 0).astype(np.float32)
    aux[5] = (hv == H - 1).astype(np.float32)
    aux = jnp.asarray(aux)

    jitter = _jitter_matrix(eps)
    kernel = _build_kernel(G, D, H, W, float(strict_maxima_bonus), jitter)

    y2, coords2 = pl.pallas_call(
        kernel,
        out_shape=(jax.ShapeDtypeStruct((S, DHW), jnp.float32),
                   jax.ShapeDtypeStruct((S, 3 * DHW), jnp.float32)),
        grid=(S // G,),
        in_specs=[pl.BlockSpec((8, HW), lambda i: (0, 0)),      # constant aux table
                  pl.BlockSpec((G, DHW), lambda i: (i, 0))],
        out_specs=(pl.BlockSpec((G, DHW), lambda i: (i, 0)),
                   pl.BlockSpec((G, 3 * DHW), lambda i: (i, 0))),
        compiler_params=pltpu.CompilerParams(dimension_semantics=("parallel",)),
    )(aux, xf)

    # Channel-major coords output => both reshapes are free (no stack/transpose).
    coords_max = coords2.reshape(B, C, 3, D, H, W)
    y_max = y2.reshape(B, C, D, H, W)
    return coords_max, y_max


class ConvQuadInterp3d:
    """JAX/Pallas port of cirtorch's ConvQuadInterp3d module (forward only)."""

    def __init__(self, strict_maxima_bonus=10.0, eps=1e-7):
        self.strict_maxima_bonus = strict_maxima_bonus
        self.eps = eps

    def __call__(self, x):
        return conv_quad_interp3d(x, self.strict_maxima_bonus, self.eps)


def _reference(x, strict_maxima_bonus=10.0, eps=1e-7):
    """Pure-JAX (no Pallas) reference built from pad + shifted slices; only the
    per-voxel solve helper is shared with the kernel."""
    B, C, D, H, W = x.shape
    xf = x.astype(jnp.float32).reshape(B * C, D, H, W)
    xe = jnp.pad(xf, ((0, 0), (1, 1), (1, 1), (1, 1)), mode="edge")      # derivatives
    xz = jnp.pad(xf, ((0, 0), (1, 1), (1, 1), (1, 1)), mode="constant")  # nms3d (zero pad)

    def she(dd, dh, dw):
        return xe[:, 1 + dd:1 + dd + D, 1 + dh:1 + dh + H, 1 + dw:1 + dw + W]

    def shz(dd, dh, dw):
        return xz[:, 1 + dd:1 + dd + D, 1 + dh:1 + dh + H, 1 + dw:1 + dw + W]

    c = xf
    gx = 0.5 * (she(0, 0, 1) - she(0, 0, -1))
    gy = 0.5 * (she(0, 1, 0) - she(0, -1, 0))
    gs = 0.5 * (she(1, 0, 0) - she(-1, 0, 0))
    dxx = she(0, 0, 1) - 2.0 * c + she(0, 0, -1)
    dyy = she(0, 1, 0) - 2.0 * c + she(0, -1, 0)
    dss = she(1, 0, 0) - 2.0 * c + she(-1, 0, 0)
    dxy = 0.25 * (she(0, 1, 1) - she(0, 1, -1) - she(0, -1, 1) + she(0, -1, -1))
    dys = 0.25 * (she(1, 1, 0) - she(1, -1, 0) - she(-1, 1, 0) + she(-1, -1, 0))
    dxs = 0.25 * (she(1, 0, 1) - she(1, 0, -1) - she(-1, 0, 1) + she(-1, 0, -1))

    neigh = jnp.zeros_like(c)   # kornia zeroes the centre channel -> 0 is in the max
    for dd in (-1, 0, 1):
        for dh in (-1, 0, 1):
            for dw in (-1, 0, 1):
                if dd == 0 and dh == 0 and dw == 0:
                    continue
                neigh = jnp.maximum(neigh, shz(dd, dh, dw))
    nms_mask = c > neigh

    y, dx0, dx1, dx2 = _solve_and_update(c, gx, gy, gs, dxx, dyy, dss, dxy, dys, dxs,
                                         nms_mask, _jitter_matrix(eps),
                                         float(strict_maxima_bonus))

    d_idx = jnp.arange(D, dtype=jnp.float32)[None, :, None, None]
    h_idx = jnp.arange(H, dtype=jnp.float32)[None, None, :, None]
    w_idx = jnp.arange(W, dtype=jnp.float32)[None, None, None, :]
    coords = jnp.stack([d_idx + dx2, w_idx + dx1, h_idx + dx0], axis=1)
    return coords.reshape(B, C, 3, D, H, W), y.reshape(B, C, D, H, W)


if __name__ == "__main__":
    key = jax.random.PRNGKey(0)
    x = jax.random.normal(key, (2, 4, 4, 16, 16), dtype=jnp.float32)  # B, C, D, H, W

    module = ConvQuadInterp3d(strict_maxima_bonus=10.0, eps=1e-7)
    coords_max, y_max = module(x)
    jax.block_until_ready((coords_max, y_max))

    assert coords_max.shape == (2, 4, 3, 4, 16, 16) and coords_max.dtype == jnp.float32
    assert y_max.shape == (2, 4, 4, 16, 16) and y_max.dtype == jnp.float32

    # sanity-check the Pallas kernel against the pure-JAX pad+slice reference
    coords_ref, y_ref = _reference(x, 10.0, 1e-7)
    np.testing.assert_allclose(np.asarray(y_max), np.asarray(y_ref), rtol=1e-4, atol=1e-4)
    np.testing.assert_allclose(np.asarray(coords_max), np.asarray(coords_ref), rtol=1e-4, atol=1e-4)

    print("KERNEL_OK")
</pallas_src>

<mosaic_0001>
module attributes {stable_mosaic.version = 11 : i64} {
  func.func @kernel(%arg0: i32, %arg1: memref<8x256xf32, #tpu.memory_space<vmem>>, %arg2: memref<8x1024xf32, #tpu.memory_space<vmem>>, %arg3: memref<8x1024xf32, #tpu.memory_space<vmem>>, %arg4: memref<8x3072xf32, #tpu.memory_space<vmem>>) attributes {dimension_semantics = [#tpu.dimension_semantics<parallel>], iteration_bounds = array<i64: 1>, scalar_prefetch = 0 : i64, scratch_operands = 0 : i64, tpu.core_type = #tpu.core_type<tc>, window_params = [{pipeline_mode = #tpu.pipeline_mode<synchronous>, transform_indices = @transform_0, window_bounds = array<i64: 8, 256>}, {transform_indices = @transform_1, window_bounds = array<i64: 8, 1024>}, {transform_indices = @transform_2, window_bounds = array<i64: 8, 1024>}, {transform_indices = @transform_3, window_bounds = array<i64: 8, 3072>}]} {
    %c0 = arith.constant 0 : index
    %c0_0 = arith.constant 0 : index
    %0 = vector.load %arg1[%c0, %c0_0] : memref<8x256xf32, #tpu.memory_space<vmem>>, vector<1x256xf32>
    %1 = vector.shape_cast %0 : vector<1x256xf32> to vector<1x256xf32>
    %2 = vector.broadcast %1 : vector<1x256xf32> to vector<8x256xf32>
    %c1 = arith.constant 1 : index
    %c0_1 = arith.constant 0 : index
    %3 = vector.load %arg1[%c1, %c0_1] : memref<8x256xf32, #tpu.memory_space<vmem>>, vector<1x256xf32>
    %4 = vector.shape_cast %3 : vector<1x256xf32> to vector<1x256xf32>
    %5 = vector.broadcast %4 : vector<1x256xf32> to vector<8x256xf32>
    %c2 = arith.constant 2 : index
    %c0_2 = arith.constant 0 : index
    %6 = vector.load %arg1[%c2, %c0_2] : memref<8x256xf32, #tpu.memory_space<vmem>>, vector<1x256xf32>
    %7 = vector.shape_cast %6 : vector<1x256xf32> to vector<1x256xf32>
    %8 = vector.broadcast %7 : vector<1x256xf32> to vector<8x256xf32>
    %cst = arith.constant 5.000000e-01 : f32
    %9 = vector.broadcast %cst : f32 to vector<8x256xf32>
    %10 = arith.cmpf ogt, %8, %9 : vector<8x256xf32>
    %c3 = arith.constant 3 : index
    %c0_3 = arith.constant 0 : index
    %11 = vector.load %arg1[%c3, %c0_3] : memref<8x256xf32, #tpu.memory_space<vmem>>, vector<1x256xf32>
    %12 = vector.shape_cast %11 : vector<1x256xf32> to vector<1x256xf32>
    %13 = vector.broadcast %12 : vector<1x256xf32> to vector<8x256xf32>
    %cst_4 = arith.constant 5.000000e-01 : f32
    %14 = vector.broadcast %cst_4 : f32 to vector<8x256xf32>
    %15 = arith.cmpf ogt, %13, %14 : vector<8x256xf32>
    %c4 = arith.constant 4 : index
    %c0_5 = arith.constant 0 : index
    %16 = vector.load %arg1[%c4, %c0_5] : memref<8x256xf32, #tpu.memory_space<vmem>>, vector<1x256xf32>
    %17 = vector.shape_cast %16 : vector<1x256xf32> to vector<1x256xf32>
    %18 = vector.broadcast %17 : vector<1x256xf32> to vector<8x256xf32>
    %cst_6 = arith.constant 5.000000e-01 : f32
    %19 = vector.broadcast %cst_6 : f32 to vector<8x256xf32>
    %20 = arith.cmpf ogt, %18, %19 : vector<8x256xf32>
    %c5 = arith.constant 5 : index
    %c0_7 = arith.constant 0 : index
    %21 = vector.load %arg1[%c5, %c0_7] : memref<8x256xf32, #tpu.memory_space<vmem>>, vector<1x256xf32>
    %22 = vector.shape_cast %21 : vector<1x256xf32> to vector<1x256xf32>
    %23 = vector.broadcast %22 : vector<1x256xf32> to vector<8x256xf32>
    %cst_8 = arith.constant 5.000000e-01 : f32
    %24 = vector.broadcast %cst_8 : f32 to vector<8x256xf32>
    %25 = arith.cmpf ogt, %23, %24 : vector<8x256xf32>
    %c0_9 = arith.constant 0 : index
    %c0_10 = arith.constant 0 : index
    %26 = vector.load %arg2[%c0_9, %c0_10] : memref<8x1024xf32, #tpu.memory_space<vmem>>, vector<8x256xf32>
    %27 = vector.extract_strided_slice %26 {offsets = [0, 1], sizes = [8, 255], strides = [1, 1]} : vector<8x256xf32> to vector<8x255xf32>
    %28 = vector.extract_strided_slice %26 {offsets = [0, 0], sizes = [8, 1], strides = [1, 1]} : vector<8x256xf32> to vector<8x1xf32>
    %29 = tpu.concatenate %27, %28 in 1 : vector<8x255xf32>, vector<8x1xf32> -> vector<8x256xf32>
    %cst_11 = arith.constant 0.000000e+00 : f32
    %30 = vector.broadcast %cst_11 : f32 to vector<8x256xf32>
    %31 = arith.select %15, %30, %29 : vector<8x256xi1>, vector<8x256xf32>
    %32 = vector.extract_strided_slice %26 {offsets = [0, 255], sizes = [8, 1], strides = [1, 1]} : vector<8x256xf32> to vector<8x1xf32>
    %33 = vector.extract_strided_slice %26 {offsets = [0, 0], sizes = [8, 255], strides = [1, 1]} : vector<8x256xf32> to vector<8x255xf32>
    %34 = tpu.concatenate %32, %33 in 1 : vector<8x1xf32>, vector<8x255xf32> -> vector<8x256xf32>
    %cst_12 = arith.constant 0.000000e+00 : f32
    %35 = vector.broadcast %cst_12 : f32 to vector<8x256xf32>
    %36 = arith.select %10, %35, %34 : vector<8x256xi1>, vector<8x256xf32>
    %37 = arith.maximumf %31, %36 : vector<8x256xf32>
    %38 = arith.maximumf %26, %37 : vector<8x256xf32>
    %39 = vector.extract_strided_slice %38 {offsets = [0, 16], sizes = [8, 240], strides = [1, 1]} : vector<8x256xf32> to vector<8x240xf32>
    %40 = vector.extract_strided_slice %38 {offsets = [0, 0], sizes = [8, 16], strides = [1, 1]} : vector<8x256xf32> to vector<8x16xf32>
    %41 = tpu.concatenate %39, %40 in 1 : vector<8x240xf32>, vector<8x16xf32> -> vector<8x256xf32>
    %cst_13 = arith.constant 0.000000e+00 : f32
    %42 = vector.broadcast %cst_13 : f32 to vector<8x256xf32>
    %43 = arith.select %25, %42, %41 : vector<8x256xi1>, vector<8x256xf32>
    %44 = vector.extract_strided_slice %38 {offsets = [0, 240], sizes = [8, 16], strides = [1, 1]} : vector<8x256xf32> to vector<8x16xf32>
    %45 = vector.extract_strided_slice %38 {offsets = [0, 0], sizes = [8, 240], strides = [1, 1]} : vector<8x256xf32> to vector<8x240xf32>
    %46 = tpu.concatenate %44, %45 in 1 : vector<8x16xf32>, vector<8x240xf32> -> vector<8x256xf32>
    %cst_14 = arith.constant 0.000000e+00 : f32
    %47 = vector.broadcast %cst_14 : f32 to vector<8x256xf32>
    %48 = arith.select %20, %47, %46 : vector<8x256xi1>, vector<8x256xf32>
    %49 = arith.maximumf %43, %48 : vector<8x256xf32>
    %50 = arith.maximumf %38, %49 : vector<8x256xf32>
    %51 = arith.maximumf %43, %48 : vector<8x256xf32>
    %52 = arith.maximumf %31, %36 : vector<8x256xf32>
    %53 = arith.maximumf %51, %52 : vector<8x256xf32>
    %c0_15 = arith.constant 0 : index
    %c256 = arith.constant 256 : index
    %54 = vector.load %arg2[%c0_15, %c256] : memref<8x1024xf32, #tpu.memory_space<vmem>>, vector<8x256xf32>
    %55 = vector.extract_strided_slice %54 {offsets = [0, 1], sizes = [8, 255], strides = [1, 1]} : vector<8x256xf32> to vector<8x255xf32>
    %56 = vector.extract_strided_slice %54 {offsets = [0, 0], sizes = [8, 1], strides = [1, 1]} : vector<8x256xf32> to vector<8x1xf32>
    %57 = tpu.concatenate %55, %56 in 1 : vector<8x255xf32>, vector<8x1xf32> -> vector<8x256xf32>
    %cst_16 = arith.constant 0.000000e+00 : f32
    %58 = vector.broadcast %cst_16 : f32 to vector<8x256xf32>
    %59 = arith.select %15, %58, %57 : vector<8x256xi1>, vector<8x256xf32>
    %60 = vector.extract_strided_slice %54 {offsets = [0, 255], sizes = [8, 1], strides = [1, 1]} : vector<8x256xf32> to vector<8x1xf32>
    %61 = vector.extract_strided_slice %54 {offsets = [0, 0], sizes = [8, 255], strides = [1, 1]} : vector<8x256xf32> to vector<8x255xf32>
    %62 = tpu.concatenate %60, %61 in 1 : vector<8x1xf32>, vector<8x255xf32> -> vector<8x256xf32>
    %cst_17 = arith.constant 0.000000e+00 : f32
    %63 = vector.broadcast %cst_17 : f32 to vector<8x256xf32>
    %64 = arith.select %10, %63, %62 : vector<8x256xi1>, vector<8x256xf32>
    %65 = arith.maximumf %59, %64 : vector<8x256xf32>
    %66 = arith.maximumf %54, %65 : vector<8x256xf32>
    %67 = vector.extract_strided_slice %66 {offsets = [0, 16], sizes = [8, 240], strides = [1, 1]} : vector<8x256xf32> to vector<8x240xf32>
    %68 = vector.extract_strided_slice %66 {offsets = [0, 0], sizes = [8, 16], strides = [1, 1]} : vector<8x256xf32> to vector<8x16xf32>
    %69 = tpu.concatenate %67, %68 in 1 : vector<8x240xf32>, vector<8x16xf32> -> vector<8x256xf32>
    %cst_18 = arith.constant 0.000000e+00 : f32
    %70 = vector.broadcast %cst_18 : f32 to vector<8x256xf32>
    %71 = arith.select %25, %70, %69 : vector<8x256xi1>, vector<8x256xf32>
    %72 = vector.extract_strided_slice %66 {offsets = [0, 240], sizes = [8, 16], strides = [1, 1]} : vector<8x256xf32> to vector<8x16xf32>
    %73 = vector.extract_strided_slice %66 {offsets = [0, 0], sizes = [8, 240], strides = [1, 1]} : vector<8x256xf32> to vector<8x240xf32>
    %74 = tpu.concatenate %72, %73 in 1 : vector<8x16xf32>, vector<8x240xf32> -> vector<8x256xf32>
    %cst_19 = arith.constant 0.000000e+00 : f32
    %75 = vector.broadcast %cst_19 : f32 to vector<8x256xf32>
    %76 = arith.select %20, %75, %74 : vector<8x256xi1>, vector<8x256xf32>
    %77 = arith.maximumf %71, %76 : vector<8x256xf32>
    %78 = arith.maximumf %66, %77 : vector<8x256xf32>
    %79 = arith.maximumf %71, %76 : vector<8x256xf32>
    %80 = arith.maximumf %59, %64 : vector<8x256xf32>
    %81 = arith.maximumf %79, %80 : vector<8x256xf32>
    %cst_20 = arith.constant 0.000000e+00 : f32
    %82 = vector.broadcast %cst_20 : f32 to vector<8x256xf32>
    %83 = arith.maximumf %53, %82 : vector<8x256xf32>
    %84 = arith.maximumf %83, %78 : vector<8x256xf32>
    %85 = arith.cmpf ogt, %26, %84 : vector<8x256xf32>
    %86 = vector.extract_strided_slice %26 {offsets = [0, 1], sizes = [8, 255], strides = [1, 1]} : vector<8x256xf32> to vector<8x255xf32>
    %87 = vector.extract_strided_slice %26 {offsets = [0, 0], sizes = [8, 1], strides = [1, 1]} : vector<8x256xf32> to vector<8x1xf32>
    %88 = tpu.concatenate %86, %87 in 1 : vector<8x255xf32>, vector<8x1xf32> -> vector<8x256xf32>
    %89 = arith.select %15, %26, %88 : vector<8x256xi1>, vector<8x256xf32>
    %90 = vector.extract_strided_slice %26 {offsets = [0, 255], sizes = [8, 1], strides = [1, 1]} : vector<8x256xf32> to vector<8x1xf32>
    %91 = vector.extract_strided_slice %26 {offsets = [0, 0], sizes = [8, 255], strides = [1, 1]} : vector<8x256xf32> to vector<8x255xf32>
    %92 = tpu.concatenate %90, %91 in 1 : vector<8x1xf32>, vector<8x255xf32> -> vector<8x256xf32>
    %93 = arith.select %10, %26, %92 : vector<8x256xi1>, vector<8x256xf32>
    %94 = vector.extract_strided_slice %26 {offsets = [0, 16], sizes = [8, 240], strides = [1, 1]} : vector<8x256xf32> to vector<8x240xf32>
    %95 = vector.extract_strided_slice %26 {offsets = [0, 0], sizes = [8, 16], strides = [1, 1]} : vector<8x256xf32> to vector<8x16xf32>
    %96 = tpu.concatenate %94, %95 in 1 : vector<8x240xf32>, vector<8x16xf32> -> vector<8x256xf32>
    %97 = arith.select %25, %26, %96 : vector<8x256xi1>, vector<8x256xf32>
    %98 = vector.extract_strided_slice %26 {offsets = [0, 240], sizes = [8, 16], strides = [1, 1]} : vector<8x256xf32> to vector<8x16xf32>
    %99 = vector.extract_strided_slice %26 {offsets = [0, 0], sizes = [8, 240], strides = [1, 1]} : vector<8x256xf32> to vector<8x240xf32>
    %100 = tpu.concatenate %98, %99 in 1 : vector<8x16xf32>, vector<8x240xf32> -> vector<8x256xf32>
    %101 = arith.select %20, %26, %100 : vector<8x256xi1>, vector<8x256xf32>
    %102 = arith.subf %89, %93 : vector<8x256xf32>
    %cst_21 = arith.constant 5.000000e-01 : f32
    %103 = vector.broadcast %cst_21 : f32 to vector<8x256xf32>
    %104 = arith.mulf %103, %102 : vector<8x256xf32>
    %105 = arith.subf %97, %101 : vector<8x256xf32>
    %cst_22 = arith.constant 5.000000e-01 : f32
    %106 = vector.broadcast %cst_22 : f32 to vector<8x256xf32>
    %107 = arith.mulf %106, %105 : vector<8x256xf32>
    %108 = arith.subf %54, %26 : vector<8x256xf32>
    %cst_23 = arith.constant 5.000000e-01 : f32
    %109 = vector.broadcast %cst_23 : f32 to vector<8x256xf32>
    %110 = arith.mulf %109, %108 : vector<8x256xf32>
    %cst_24 = arith.constant 2.000000e+00 : f32
    %111 = vector.broadcast %cst_24 : f32 to vector<8x256xf32>
    %112 = arith.mulf %111, %26 : vector<8x256xf32>
    %113 = arith.subf %89, %112 : vector<8x256xf32>
    %114 = arith.addf %113, %93 : vector<8x256xf32>
    %cst_25 = arith.constant 2.000000e+00 : f32
    %115 = vector.broadcast %cst_25 : f32 to vector<8x256xf32>
    %116 = arith.mulf %115, %26 : vector<8x256xf32>
    %117 = arith.subf %97, %116 : vector<8x256xf32>
    %118 = arith.addf %117, %101 : vector<8x256xf32>
    %cst_26 = arith.constant 2.000000e+00 : f32
    %119 = vector.broadcast %cst_26 : f32 to vector<8x256xf32>
    %120 = arith.mulf %119, %26 : vector<8x256xf32>
    %121 = arith.subf %54, %120 : vector<8x256xf32>
    %122 = arith.addf %121, %26 : vector<8x256xf32>
    %123 = vector.extract_strided_slice %89 {offsets = [0, 16], sizes = [8, 240], strides = [1, 1]} : vector<8x256xf32> to vector<8x240xf32>
    %124 = vector.extract_strided_slice %89 {offsets = [0, 0], sizes = [8, 16], strides = [1, 1]} : vector<8x256xf32> to vector<8x16xf32>
    %125 = tpu.concatenate %123, %124 in 1 : vector<8x240xf32>, vector<8x16xf32> -> vector<8x256xf32>
    %126 = arith.select %25, %89, %125 : vector<8x256xi1>, vector<8x256xf32>
    %127 = vector.extract_strided_slice %93 {offsets = [0, 16], sizes = [8, 240], strides = [1, 1]} : vector<8x256xf32> to vector<8x240xf32>
    %128 = vector.extract_strided_slice %93 {offsets = [0, 0], sizes = [8, 16], strides = [1, 1]} : vector<8x256xf32> to vector<8x16xf32>
    %129 = tpu.concatenate %127, %128 in 1 : vector<8x240xf32>, vector<8x16xf32> -> vector<8x256xf32>
    %130 = arith.select %25, %93, %129 : vector<8x256xi1>, vector<8x256xf32>
    %131 = arith.subf %126, %130 : vector<8x256xf32>
    %132 = vector.extract_strided_slice %89 {offsets = [0, 240], sizes = [8, 16], strides = [1, 1]} : vector<8x256xf32> to vector<8x16xf32>
    %133 = vector.extract_strided_slice %89 {offsets = [0, 0], sizes = [8, 240], strides = [1, 1]} : vector<8x256xf32> to vector<8x240xf32>
    %134 = tpu.concatenate %132, %133 in 1 : vector<8x16xf32>, vector<8x240xf32> -> vector<8x256xf32>
    %135 = arith.select %20, %89, %134 : vector<8x256xi1>, vector<8x256xf32>
    %136 = arith.subf %131, %135 : vector<8x256xf32>
    %137 = vector.extract_strided_slice %93 {offsets = [0, 240], sizes = [8, 16], strides = [1, 1]} : vector<8x256xf32> to vector<8x16xf32>
    %138 = vector.extract_strided_slice %93 {offsets = [0, 0], sizes = [8, 240], strides = [1, 1]} : vector<8x256xf32> to vector<8x240xf32>
    %139 = tpu.concatenate %137, %138 in 1 : vector<8x16xf32>, vector<8x240xf32> -> vector<8x256xf32>
    %140 = arith.select %20, %93, %139 : vector<8x256xi1>, vector<8x256xf32>
    %141 = arith.addf %136, %140 : vector<8x256xf32>
    %cst_27 = arith.constant 2.500000e-01 : f32
    %142 = vector.broadcast %cst_27 : f32 to vector<8x256xf32>
    %143 = arith.mulf %142, %141 : vector<8x256xf32>
    %144 = vector.extract_strided_slice %54 {offsets = [0, 16], sizes = [8, 240], strides = [1, 1]} : vector<8x256xf32> to vector<8x240xf32>
    %145 = vector.extract_strided_slice %54 {offsets = [0, 0], sizes = [8, 16], strides = [1, 1]} : vector<8x256xf32> to vector<8x16xf32>
    %146 = tpu.concatenate %144, %145 in 1 : vector<8x240xf32>, vector<8x16xf32> -> vector<8x256xf32>
    %147 = arith.select %25, %54, %146 : vector<8x256xi1>, vector<8x256xf32>
    %148 = vector.extract_strided_slice %54 {offsets = [0, 240], sizes = [8, 16], strides = [1, 1]} : vector<8x256xf32> to vector<8x16xf32>
    %149 = vector.extract_strided_slice %54 {offsets = [0, 0], sizes = [8, 240], strides = [1, 1]} : vector<8x256xf32> to vector<8x240xf32>
    %150 = tpu.concatenate %148, %149 in 1 : vector<8x16xf32>, vector<8x240xf32> -> vector<8x256xf32>
    %151 = arith.select %20, %54, %150 : vector<8x256xi1>, vector<8x256xf32>
    %152 = arith.subf %147, %151 : vector<8x256xf32>
    %153 = vector.extract_strided_slice %26 {offsets = [0, 16], sizes = [8, 240], strides = [1, 1]} : vector<8x256xf32> to vector<8x240xf32>
    %154 = vector.extract_strided_slice %26 {offsets = [0, 0], sizes = [8, 16], strides = [1, 1]} : vector<8x256xf32> to vector<8x16xf32>
    %155 = tpu.concatenate %153, %154 in 1 : vector<8x240xf32>, vector<8x16xf32> -> vector<8x256xf32>
    %156 = arith.select %25, %26, %155 : vector<8x256xi1>, vector<8x256xf32>
    %157 = arith.subf %152, %156 : vector<8x256xf32>
    %158 = vector.extract_strided_slice %26 {offsets = [0, 240], sizes = [8, 16], strides = [1, 1]} : vector<8x256xf32> to vector<8x16xf32>
    %159 = vector.extract_strided_slice %26 {offsets = [0, 0], sizes = [8, 240], strides = [1, 1]} : vector<8x256xf32> to vector<8x240xf32>
    %160 = tpu.concatenate %158, %159 in 1 : vector<8x16xf32>, vector<8x240xf32> -> vector<8x256xf32>
    %161 = arith.select %20, %26, %160 : vector<8x256xi1>, vector<8x256xf32>
    %162 = arith.addf %157, %161 : vector<8x256xf32>
    %cst_28 = arith.constant 2.500000e-01 : f32
    %163 = vector.broadcast %cst_28 : f32 to vector<8x256xf32>
    %164 = arith.mulf %163, %162 : vector<8x256xf32>
    %165 = vector.extract_strided_slice %54 {offsets = [0, 1], sizes = [8, 255], strides = [1, 1]} : vector<8x256xf32> to vector<8x255xf32>
    %166 = vector.extract_strided_slice %54 {offsets = [0, 0], sizes = [8, 1], strides = [1, 1]} : vector<8x256xf32> to vector<8x1xf32>
    %167 = tpu.concatenate %165, %166 in 1 : vector<8x255xf32>, vector<8x1xf32> -> vector<8x256xf32>
    %168 = arith.select %15, %54, %167 : vector<8x256xi1>, vector<8x256xf32>
    %169 = vector.extract_strided_slice %54 {offsets = [0, 255], sizes = [8, 1], strides = [1, 1]} : vector<8x256xf32> to vector<8x1xf32>
    %170 = vector.extract_strided_slice %54 {offsets = [0, 0], sizes = [8, 255], strides = [1, 1]} : vector<8x256xf32> to vector<8x255xf32>
    %171 = tpu.concatenate %169, %170 in 1 : vector<8x1xf32>, vector<8x255xf32> -> vector<8x256xf32>
    %172 = arith.select %10, %54, %171 : vector<8x256xi1>, vector<8x256xf32>
    %173 = arith.subf %168, %172 : vector<8x256xf32>
    %174 = vector.extract_strided_slice %26 {offsets = [0, 1], sizes = [8, 255], strides = [1, 1]} : vector<8x256xf32> to vector<8x255xf32>
    %175 = vector.extract_strided_slice %26 {offsets = [0, 0], sizes = [8, 1], strides = [1, 1]} : vector<8x256xf32> to vector<8x1xf32>
    %176 = tpu.concatenate %174, %175 in 1 : vector<8x255xf32>, vector<8x1xf32> -> vector<8x256xf32>
    %177 = arith.select %15, %26, %176 : vector<8x256xi1>, vector<8x256xf32>
    %178 = arith.subf %173, %177 : vector<8x256xf32>
    %179 = vector.extract_strided_slice %26 {offsets = [0, 255], sizes = [8, 1], strides = [1, 1]} : vector<8x256xf32> to vector<8x1xf32>
    %180 = vector.extract_strided_slice %26 {offsets = [0, 0], sizes = [8, 255], strides = [1, 1]} : vector<8x256xf32> to vector<8x255xf32>
    %181 = tpu.concatenate %179, %180 in 1 : vector<8x1xf32>, vector<8x255xf32> -> vector<8x256xf32>
    %182 = arith.select %10, %26, %181 : vector<8x256xi1>, vector<8x256xf32>
    %183 = arith.addf %178, %182 : vector<8x256xf32>
    %cst_29 = arith.constant 2.500000e-01 : f32
    %184 = vector.broadcast %cst_29 : f32 to vector<8x256xf32>
    %185 = arith.mulf %184, %183 : vector<8x256xf32>
    %cst_30 = arith.constant 1.91519458E-8 : f32
    %186 = vector.broadcast %cst_30 : f32 to vector<8x256xf32>
    %187 = arith.addf %114, %186 : vector<8x256xf32>
    %cst_31 = arith.constant 6.221088E-8 : f32
    %188 = vector.broadcast %cst_31 : f32 to vector<8x256xf32>
    %189 = arith.addf %143, %188 : vector<8x256xf32>
    %cst_32 = arith.constant 4.37727756E-8 : f32
    %190 = vector.broadcast %cst_32 : f32 to vector<8x256xf32>
    %191 = arith.addf %185, %190 : vector<8x256xf32>
    %cst_33 = arith.constant 7.85358623E-8 : f32
    %192 = vector.broadcast %cst_33 : f32 to vector<8x256xf32>
    %193 = arith.addf %143, %192 : vector<8x256xf32>
    %cst_34 = arith.constant 7.79975835E-8 : f32
    %194 = vector.broadcast %cst_34 : f32 to vector<8x256xf32>
    %195 = arith.addf %118, %194 : vector<8x256xf32>
    %cst_35 = arith.constant 2.72592615E-8 : f32
    %196 = vector.broadcast %cst_35 : f32 to vector<8x256xf32>
    %197 = arith.addf %164, %196 : vector<8x256xf32>
    %cst_36 = arith.constant 2.76464256E-8 : f32
    %198 = vector.broadcast %cst_36 : f32 to vector<8x256xf32>
    %199 = arith.addf %185, %198 : vector<8x256xf32>
    %cst_37 = arith.constant 8.01872204E-8 : f32
    %200 = vector.broadcast %cst_37 : f32 to vector<8x256xf32>
    %201 = arith.addf %164, %200 : vector<8x256xf32>
    %cst_38 = arith.constant 9.58139381E-8 : f32
    %202 = vector.broadcast %cst_38 : f32 to vector<8x256xf32>
    %203 = arith.addf %122, %202 : vector<8x256xf32>
    %204 = arith.mulf %195, %203 : vector<8x256xf32>
    %205 = arith.mulf %197, %201 : vector<8x256xf32>
    %206 = arith.subf %204, %205 : vector<8x256xf32>
    %207 = arith.mulf %193, %203 : vector<8x256xf32>
    %208 = arith.mulf %197, %199 : vector<8x256xf32>
    %209 = arith.subf %207, %208 : vector<8x256xf32>
    %210 = arith.mulf %193, %201 : vector<8x256xf32>
    %211 = arith.mulf %195, %199 : vector<8x256xf32>
    %212 = arith.subf %210, %211 : vector<8x256xf32>
    %213 = arith.mulf %187, %206 : vector<8x256xf32>
    %214 = arith.mulf %189, %209 : vector<8x256xf32>
    %215 = arith.subf %213, %214 : vector<8x256xf32>
    %216 = arith.mulf %191, %212 : vector<8x256xf32>
    %217 = arith.addf %215, %216 : vector<8x256xf32>
    %cst_39 = arith.constant 0.000000e+00 : f32
    %218 = vector.broadcast %cst_39 : f32 to vector<8x256xf32>
    %219 = arith.cmpf oeq, %217, %218 : vector<8x256xf32>
    %cst_40 = arith.constant 1.000000e+00 : f32
    %220 = vector.broadcast %cst_40 : f32 to vector<8x256xf32>
    %221 = arith.select %219, %220, %217 : vector<8x256xi1>, vector<8x256xf32>
    %cst_41 = arith.constant 1.000000e+00 : f32
    %222 = vector.broadcast %cst_41 : f32 to vector<8x256xf32>
    %223 = arith.divf %222, %221 : vector<8x256xf32>
    %224 = arith.mulf %104, %206 : vector<8x256xf32>
    %225 = arith.mulf %107, %203 : vector<8x256xf32>
    %226 = arith.mulf %197, %110 : vector<8x256xf32>
    %227 = arith.subf %225, %226 : vector<8x256xf32>
    %228 = arith.mulf %189, %227 : vector<8x256xf32>
    %229 = arith.subf %224, %228 : vector<8x256xf32>
    %230 = arith.mulf %107, %201 : vector<8x256xf32>
    %231 = arith.mulf %195, %110 : vector<8x256xf32>
    %232 = arith.subf %230, %231 : vector<8x256xf32>
    %233 = arith.mulf %191, %232 : vector<8x256xf32>
    %234 = arith.addf %229, %233 : vector<8x256xf32>
    %235 = arith.mulf %234, %223 : vector<8x256xf32>
    %236 = arith.mulf %107, %203 : vector<8x256xf32>
    %237 = arith.mulf %197, %110 : vector<8x256xf32>
    %238 = arith.subf %236, %237 : vector<8x256xf32>
    %239 = arith.mulf %187, %238 : vector<8x256xf32>
    %240 = arith.mulf %104, %209 : vector<8x256xf32>
    %241 = arith.subf %239, %240 : vector<8x256xf32>
    %242 = arith.mulf %193, %110 : vector<8x256xf32>
    %243 = arith.mulf %107, %199 : vector<8x256xf32>
    %244 = arith.subf %242, %243 : vector<8x256xf32>
    %245 = arith.mulf %191, %244 : vector<8x256xf32>
    %246 = arith.addf %241, %245 : vector<8x256xf32>
    %247 = arith.mulf %246, %223 : vector<8x256xf32>
    %248 = arith.mulf %195, %110 : vector<8x256xf32>
    %249 = arith.mulf %107, %201 : vector<8x256xf32>
    %250 = arith.subf %248, %249 : vector<8x256xf32>
    %251 = arith.mulf %187, %250 : vector<8x256xf32>
    %252 = arith.mulf %193, %110 : vector<8x256xf32>
    %253 = arith.mulf %107, %199 : vector<8x256xf32>
    %254 = arith.subf %252, %253 : vector<8x256xf32>
    %255 = arith.mulf %189, %254 : vector<8x256xf32>
    %256 = arith.subf %251, %255 : vector<8x256xf32>
    %257 = arith.mulf %104, %212 : vector<8x256xf32>
    %258 = arith.addf %256, %257 : vector<8x256xf32>
    %259 = arith.mulf %258, %223 : vector<8x256xf32>
    %cst_42 = arith.constant 0.000000e+00 : f32
    %260 = vector.broadcast %cst_42 : f32 to vector<8x256xf32>
    %261 = arith.select %85, %235, %260 : vector<8x256xi1>, vector<8x256xf32>
    %262 = arith.select %85, %247, %260 : vector<8x256xi1>, vector<8x256xf32>
    %263 = arith.select %85, %259, %260 : vector<8x256xi1>, vector<8x256xf32>
    %cst_43 = arith.constant 0.000000e+00 : f32
    %264 = vector.broadcast %cst_43 : f32 to vector<8x256xf32>
    %265 = arith.subf %264, %261 : vector<8x256xf32>
    %cst_44 = arith.constant 0.000000e+00 : f32
    %266 = vector.broadcast %cst_44 : f32 to vector<8x256xf32>
    %267 = arith.subf %266, %262 : vector<8x256xf32>
    %cst_45 = arith.constant 0.000000e+00 : f32
    %268 = vector.broadcast %cst_45 : f32 to vector<8x256xf32>
    %269 = arith.subf %268, %263 : vector<8x256xf32>
    %270 = math.absf %265 : vector<8x256xf32>
    %271 = math.absf %267 : vector<8x256xf32>
    %272 = arith.maximumf %270, %271 : vector<8x256xf32>
    %273 = math.absf %269 : vector<8x256xf32>
    %274 = arith.maximumf %272, %273 : vector<8x256xf32>
    %cst_46 = arith.constant 0.699999988 : f32
    %275 = vector.broadcast %cst_46 : f32 to vector<8x256xf32>
    %276 = arith.cmpf ogt, %274, %275 : vector<8x256xf32>
    %277 = arith.select %276, %260, %265 : vector<8x256xi1>, vector<8x256xf32>
    %278 = arith.select %276, %260, %267 : vector<8x256xi1>, vector<8x256xf32>
    %279 = arith.select %276, %260, %269 : vector<8x256xi1>, vector<8x256xf32>
    %280 = arith.mulf %104, %277 : vector<8x256xf32>
    %281 = arith.mulf %107, %278 : vector<8x256xf32>
    %282 = arith.addf %280, %281 : vector<8x256xf32>
    %283 = arith.mulf %110, %279 : vector<8x256xf32>
    %284 = arith.addf %282, %283 : vector<8x256xf32>
    %cst_47 = arith.constant 5.000000e-01 : f32
    %285 = vector.broadcast %cst_47 : f32 to vector<8x256xf32>
    %286 = arith.mulf %285, %284 : vector<8x256xf32>
    %287 = arith.addf %26, %286 : vector<8x256xf32>
    %288 = arith.extui %85 : vector<8x256xi1> to vector<8x256xi32>
    %289 = arith.sitofp %288 : vector<8x256xi32> to vector<8x256xf32>
    %cst_48 = arith.constant 1.000000e+01 : f32
    %290 = vector.broadcast %cst_48 : f32 to vector<8x256xf32>
    %291 = arith.mulf %290, %289 : vector<8x256xf32>
    %292 = arith.addf %287, %291 : vector<8x256xf32>
    %c0_49 = arith.constant 0 : index
    %c0_50 = arith.constant 0 : index
    %293 = vector.load %arg3[%c0_49, %c0_50] : memref<8x1024xf32, #tpu.memory_space<vmem>>, vector<8x256xf32>
    tpu.vector_store %arg3[%c0_49, %c0_50], %292 {strides = array<i32>} : memref<8x1024xf32, #tpu.memory_space<vmem>>, vector<8x256xf32>,
    %cst_51 = arith.constant 0.000000e+00 : f32
    %294 = vector.broadcast %cst_51 : f32 to vector<8x256xf32>
    %295 = arith.addf %279, %294 : vector<8x256xf32>
    %c0_52 = arith.constant 0 : index
    %c0_53 = arith.constant 0 : index
    %296 = vector.load %arg4[%c0_52, %c0_53] : memref<8x3072xf32, #tpu.memory_space<vmem>>, vector<8x256xf32>
    tpu.vector_store %arg4[%c0_52, %c0_53], %295 {strides = array<i32>} : memref<8x3072xf32, #tpu.memory_space<vmem>>, vector<8x256xf32>,
    %297 = arith.addf %2, %278 : vector<8x256xf32>
    %c0_54 = arith.constant 0 : index
    %c1024 = arith.constant 1024 : index
    %298 = vector.load %arg4[%c0_54, %c1024] : memref<8x3072xf32, #tpu.memory_space<vmem>>, vector<8x256xf32>
    tpu.vector_store %arg4[%c0_54, %c1024], %297 {strides = array<i32>} : memref<8x3072xf32, #tpu.memory_space<vmem>>, vector<8x256xf32>,
    %299 = arith.addf %5, %277 : vector<8x256xf32>
    %c0_55 = arith.constant 0 : index
    %c2048 = arith.constant 2048 : index
    %300 = vector.load %arg4[%c0_55, %c2048] : memref<8x3072xf32, #tpu.memory_space<vmem>>, vector<8x256xf32>
    tpu.vector_store %arg4[%c0_55, %c2048], %299 {strides = array<i32>} : memref<8x3072xf32, #tpu.memory_space<vmem>>, vector<8x256xf32>,
    %c0_56 = arith.constant 0 : index
    %c512 = arith.constant 512 : index
    %301 = vector.load %arg2[%c0_56, %c512] : memref<8x1024xf32, #tpu.memory_space<vmem>>, vector<8x256xf32>
    %302 = vector.extract_strided_slice %301 {offsets = [0, 1], sizes = [8, 255], strides = [1, 1]} : vector<8x256xf32> to vector<8x255xf32>
    %303 = vector.extract_strided_slice %301 {offsets = [0, 0], sizes = [8, 1], strides = [1, 1]} : vector<8x256xf32> to vector<8x1xf32>
    %304 = tpu.concatenate %302, %303 in 1 : vector<8x255xf32>, vector<8x1xf32> -> vector<8x256xf32>
    %cst_57 = arith.constant 0.000000e+00 : f32
    %305 = vector.broadcast %cst_57 : f32 to vector<8x256xf32>
    %306 = arith.select %15, %305, %304 : vector<8x256xi1>, vector<8x256xf32>
    %307 = vector.extract_strided_slice %301 {offsets = [0, 255], sizes = [8, 1], strides = [1, 1]} : vector<8x256xf32> to vector<8x1xf32>
    %308 = vector.extract_strided_slice %301 {offsets = [0, 0], sizes = [8, 255], strides = [1, 1]} : vector<8x256xf32> to vector<8x255xf32>
    %309 = tpu.concatenate %307, %308 in 1 : vector<8x1xf32>, vector<8x255xf32> -> vector<8x256xf32>
    %cst_58 = arith.constant 0.000000e+00 : f32
    %310 = vector.broadcast %cst_58 : f32 to vector<8x256xf32>
    %311 = arith.select %10, %310, %309 : vector<8x256xi1>, vector<8x256xf32>
    %312 = arith.maximumf %306, %311 : vector<8x256xf32>
    %313 = arith.maximumf %301, %312 : vector<8x256xf32>
    %314 = vector.extract_strided_slice %313 {offsets = [0, 16], sizes = [8, 240], strides = [1, 1]} : vector<8x256xf32> to vector<8x240xf32>
    %315 = vector.extract_strided_slice %313 {offsets = [0, 0], sizes = [8, 16], strides = [1, 1]} : vector<8x256xf32> to vector<8x16xf32>
    %316 = tpu.concatenate %314, %315 in 1 : vector<8x240xf32>, vector<8x16xf32> -> vector<8x256xf32>
    %cst_59 = arith.constant 0.000000e+00 : f32
    %317 = vector.broadcast %cst_59 : f32 to vector<8x256xf32>
    %318 = arith.select %25, %317, %316 : vector<8x256xi1>, vector<8x256xf32>
    %319 = vector.extract_strided_slice %313 {offsets = [0, 240], sizes = [8, 16], strides = [1, 1]} : vector<8x256xf32> to vector<8x16xf32>
    %320 = vector.extract_strided_slice %313 {offsets = [0, 0], sizes = [8, 240], strides = [1, 1]} : vector<8x256xf32> to vector<8x240xf32>
    %321 = tpu.concatenate %319, %320 in 1 : vector<8x16xf32>, vector<8x240xf32> -> vector<8x256xf32>
    %cst_60 = arith.constant 0.000000e+00 : f32
    %322 = vector.broadcast %cst_60 : f32 to vector<8x256xf32>
    %323 = arith.select %20, %322, %321 : vector<8x256xi1>, vector<8x256xf32>
    %324 = arith.maximumf %318, %323 : vector<8x256xf32>
    %325 = arith.maximumf %313, %324 : vector<8x256xf32>
    %326 = arith.maximumf %318, %323 : vector<8x256xf32>
    %327 = arith.maximumf %306, %311 : vector<8x256xf32>
    %328 = arith.maximumf %326, %327 : vector<8x256xf32>
    %cst_61 = arith.constant 0.000000e+00 : f32
    %329 = vector.broadcast %cst_61 : f32 to vector<8x256xf32>
    %330 = arith.maximumf %81, %329 : vector<8x256xf32>
    %331 = arith.maximumf %330, %50 : vector<8x256xf32>
    %332 = arith.maximumf %331, %325 : vector<8x256xf32>
    %333 = arith.cmpf ogt, %54, %332 : vector<8x256xf32>
    %334 = vector.extract_strided_slice %54 {offsets = [0, 1], sizes = [8, 255], strides = [1, 1]} : vector<8x256xf32> to vector<8x255xf32>
    %335 = vector.extract_strided_slice %54 {offsets = [0, 0], sizes = [8, 1], strides = [1, 1]} : vector<8x256xf32> to vector<8x1xf32>
    %336 = tpu.concatenate %334, %335 in 1 : vector<8x255xf32>, vector<8x1xf32> -> vector<8x256xf32>
    %337 = arith.select %15, %54, %336 : vector<8x256xi1>, vector<8x256xf32>
    %338 = vector.extract_strided_slice %54 {offsets = [0, 255], sizes = [8, 1], strides = [1, 1]} : vector<8x256xf32> to vector<8x1xf32>
    %339 = vector.extract_strided_slice %54 {offsets = [0, 0], sizes = [8, 255], strides = [1, 1]} : vector<8x256xf32> to vector<8x255xf32>
    %340 = tpu.concatenate %338, %339 in 1 : vector<8x1xf32>, vector<8x255xf32> -> vector<8x256xf32>
    %341 = arith.select %10, %54, %340 : vector<8x256xi1>, vector<8x256xf32>
    %342 = vector.extract_strided_slice %54 {offsets = [0, 16], sizes = [8, 240], strides = [1, 1]} : vector<8x256xf32> to vector<8x240xf32>
    %343 = vector.extract_strided_slice %54 {offsets = [0, 0], sizes = [8, 16], strides = [1, 1]} : vector<8x256xf32> to vector<8x16xf32>
    %344 = tpu.concatenate %342, %343 in 1 : vector<8x240xf32>, vector<8x16xf32> -> vector<8x256xf32>
    %345 = arith.select %25, %54, %344 : vector<8x256xi1>, vector<8x256xf32>
    %346 = vector.extract_strided_slice %54 {offsets = [0, 240], sizes = [8, 16], strides = [1, 1]} : vector<8x256xf32> to vector<8x16xf32>
    %347 = vector.extract_strided_slice %54 {offsets = [0, 0], sizes = [8, 240], strides = [1, 1]} : vector<8x256xf32> to vector<8x240xf32>
    %348 = tpu.concatenate %346, %347 in 1 : vector<8x16xf32>, vector<8x240xf32> -> vector<8x256xf32>
    %349 = arith.select %20, %54, %348 : vector<8x256xi1>, vector<8x256xf32>
    %350 = arith.subf %337, %341 : vector<8x256xf32>
    %cst_62 = arith.constant 5.000000e-01 : f32
    %351 = vector.broadcast %cst_62 : f32 to vector<8x256xf32>
    %352 = arith.mulf %351, %350 : vector<8x256xf32>
    %353 = arith.subf %345, %349 : vector<8x256xf32>
    %cst_63 = arith.constant 5.000000e-01 : f32
    %354 = vector.broadcast %cst_63 : f32 to vector<8x256xf32>
    %355 = arith.mulf %354, %353 : vector<8x256xf32>
    %356 = arith.subf %301, %26 : vector<8x256xf32>
    %cst_64 = arith.constant 5.000000e-01 : f32
    %357 = vector.broadcast %cst_64 : f32 to vector<8x256xf32>
    %358 = arith.mulf %357, %356 : vector<8x256xf32>
    %cst_65 = arith.constant 2.000000e+00 : f32
    %359 = vector.broadcast %cst_65 : f32 to vector<8x256xf32>
    %360 = arith.mulf %359, %54 : vector<8x256xf32>
    %361 = arith.subf %337, %360 : vector<8x256xf32>
    %362 = arith.addf %361, %341 : vector<8x256xf32>
    %cst_66 = arith.constant 2.000000e+00 : f32
    %363 = vector.broadcast %cst_66 : f32 to vector<8x256xf32>
    %364 = arith.mulf %363, %54 : vector<8x256xf32>
    %365 = arith.subf %345, %364 : vector<8x256xf32>
    %366 = arith.addf %365, %349 : vector<8x256xf32>
    %cst_67 = arith.constant 2.000000e+00 : f32
    %367 = vector.broadcast %cst_67 : f32 to vector<8x256xf32>
    %368 = arith.mulf %367, %54 : vector<8x256xf32>
    %369 = arith.subf %301, %368 : vector<8x256xf32>
    %370 = arith.addf %369, %26 : vector<8x256xf32>
    %371 = vector.extract_strided_slice %337 {offsets = [0, 16], sizes = [8, 240], strides = [1, 1]} : vector<8x256xf32> to vector<8x240xf32>
    %372 = vector.extract_strided_slice %337 {offsets = [0, 0], sizes = [8, 16], strides = [1, 1]} : vector<8x256xf32> to vector<8x16xf32>
    %373 = tpu.concatenate %371, %372 in 1 : vector<8x240xf32>, vector<8x16xf32> -> vector<8x256xf32>
    %374 = arith.select %25, %337, %373 : vector<8x256xi1>, vector<8x256xf32>
    %375 = vector.extract_strided_slice %341 {offsets = [0, 16], sizes = [8, 240], strides = [1, 1]} : vector<8x256xf32> to vector<8x240xf32>
    %376 = vector.extract_strided_slice %341 {offsets = [0, 0], sizes = [8, 16], strides = [1, 1]} : vector<8x256xf32> to vector<8x16xf32>
    %377 = tpu.concatenate %375, %376 in 1 : vector<8x240xf32>, vector<8x16xf32> -> vector<8x256xf32>
    %378 = arith.select %25, %341, %377 : vector<8x256xi1>, vector<8x256xf32>
    %379 = arith.subf %374, %378 : vector<8x256xf32>
    %380 = vector.extract_strided_slice %337 {offsets = [0, 240], sizes = [8, 16], strides = [1, 1]} : vector<8x256xf32> to vector<8x16xf32>
    %381 = vector.extract_strided_slice %337 {offsets = [0, 0], sizes = [8, 240], strides = [1, 1]} : vector<8x256xf32> to vector<8x240xf32>
    %382 = tpu.concatenate %380, %381 in 1 : vector<8x16xf32>, vector<8x240xf32> -> vector<8x256xf32>
    %383 = arith.select %20, %337, %382 : vector<8x256xi1>, vector<8x256xf32>
    %384 = arith.subf %379, %383 : vector<8x256xf32>
    %385 = vector.extract_strided_slice %341 {offsets = [0, 240], sizes = [8, 16], strides = [1, 1]} : vector<8x256xf32> to vector<8x16xf32>
    %386 = vector.extract_strided_slice %341 {offsets = [0, 0], sizes = [8, 240], strides = [1, 1]} : vector<8x256xf32> to vector<8x240xf32>
    %387 = tpu.concatenate %385, %386 in 1 : vector<8x16xf32>, vector<8x240xf32> -> vector<8x256xf32>
    %388 = arith.select %20, %341, %387 : vector<8x256xi1>, vector<8x256xf32>
    %389 = arith.addf %384, %388 : vector<8x256xf32>
    %cst_68 = arith.constant 2.500000e-01 : f32
    %390 = vector.broadcast %cst_68 : f32 to vector<8x256xf32>
    %391 = arith.mulf %390, %389 : vector<8x256xf32>
    %392 = vector.extract_strided_slice %301 {offsets = [0, 16], sizes = [8, 240], strides = [1, 1]} : vector<8x256xf32> to vector<8x240xf32>
    %393 = vector.extract_strided_slice %301 {offsets = [0, 0], sizes = [8, 16], strides = [1, 1]} : vector<8x256xf32> to vector<8x16xf32>
    %394 = tpu.concatenate %392, %393 in 1 : vector<8x240xf32>, vector<8x16xf32> -> vector<8x256xf32>
    %395 = arith.select %25, %301, %394 : vector<8x256xi1>, vector<8x256xf32>
    %396 = vector.extract_strided_slice %301 {offsets = [0, 240], sizes = [8, 16], strides = [1, 1]} : vector<8x256xf32> to vector<8x16xf32>
    %397 = vector.extract_strided_slice %301 {offsets = [0, 0], sizes = [8, 240], strides = [1, 1]} : vector<8x256xf32> to vector<8x240xf32>
    %398 = tpu.concatenate %396, %397 in 1 : vector<8x16xf32>, vector<8x240xf32> -> vector<8x256xf32>
    %399 = arith.select %20, %301, %398 : vector<8x256xi1>, vector<8x256xf32>
    %400 = arith.subf %395, %399 : vector<8x256xf32>
    %401 = vector.extract_strided_slice %26 {offsets = [0, 16], sizes = [8, 240], strides = [1, 1]} : vector<8x256xf32> to vector<8x240xf32>
    %402 = vector.extract_strided_slice %26 {offsets = [0, 0], sizes = [8, 16], strides = [1, 1]} : vector<8x256xf32> to vector<8x16xf32>
    %403 = tpu.concatenate %401, %402 in 1 : vector<8x240xf32>, vector<8x16xf32> -> vector<8x256xf32>
    %404 = arith.select %25, %26, %403 : vector<8x256xi1>, vector<8x256xf32>
    %405 = arith.subf %400, %404 : vector<8x256xf32>
    %406 = vector.extract_strided_slice %26 {offsets = [0, 240], sizes = [8, 16], strides = [1, 1]} : vector<8x256xf32> to vector<8x16xf32>
    %407 = vector.extract_strided_slice %26 {offsets = [0, 0], sizes = [8, 240], strides = [1, 1]} : vector<8x256xf32> to vector<8x240xf32>
    %408 = tpu.concatenate %406, %407 in 1 : vector<8x16xf32>, vector<8x240xf32> -> vector<8x256xf32>
    %409 = arith.select %20, %26, %408 : vector<8x256xi1>, vector<8x256xf32>
    %410 = arith.addf %405, %409 : vector<8x256xf32>
    %cst_69 = arith.constant 2.500000e-01 : f32
    %411 = vector.broadcast %cst_69 : f32 to vector<8x256xf32>
    %412 = arith.mulf %411, %410 : vector<8x256xf32>
    %413 = vector.extract_strided_slice %301 {offsets = [0, 1], sizes = [8, 255], strides = [1, 1]} : vector<8x256xf32> to vector<8x255xf32>
    %414 = vector.extract_strided_slice %301 {offsets = [0, 0], sizes = [8, 1], strides = [1, 1]} : vector<8x256xf32> to vector<8x1xf32>
    %415 = tpu.concatenate %413, %414 in 1 : vector<8x255xf32>, vector<8x1xf32> -> vector<8x256xf32>
    %416 = arith.select %15, %301, %415 : vector<8x256xi1>, vector<8x256xf32>
    %417 = vector.extract_strided_slice %301 {offsets = [0, 255], sizes = [8, 1], strides = [1, 1]} : vector<8x256xf32> to vector<8x1xf32>
    %418 = vector.extract_strided_slice %301 {offsets = [0, 0], sizes = [8, 255], strides = [1, 1]} : vector<8x256xf32> to vector<8x255xf32>
    %419 = tpu.concatenate %417, %418 in 1 : vector<8x1xf32>, vector<8x255xf32> -> vector<8x256xf32>
    %420 = arith.select %10, %301, %419 : vector<8x256xi1>, vector<8x256xf32>
    %421 = arith.subf %416, %420 : vector<8x256xf32>
    %422 = vector.extract_strided_slice %26 {offsets = [0, 1], sizes = [8, 255], strides = [1, 1]} : vector<8x256xf32> to vector<8x255xf32>
    %423 = vector.extract_strided_slice %26 {offsets = [0, 0], sizes = [8, 1], strides = [1, 1]} : vector<8x256xf32> to vector<8x1xf32>
    %424 = tpu.concatenate %422, %423 in 1 : vector<8x255xf32>, vector<8x1xf32> -> vector<8x256xf32>
    %425 = arith.select %15, %26, %424 : vector<8x256xi1>, vector<8x256xf32>
    %426 = arith.subf %421, %425 : vector<8x256xf32>
    %427 = vector.extract_strided_slice %26 {offsets = [0, 255], sizes = [8, 1], strides = [1, 1]} : vector<8x256xf32> to vector<8x1xf32>
    %428 = vector.extract_strided_slice %26 {offsets = [0, 0], sizes = [8, 255], strides = [1, 1]} : vector<8x256xf32> to vector<8x255xf32>
    %429 = tpu.concatenate %427, %428 in 1 : vector<8x1xf32>, vector<8x255xf32> -> vector<8x256xf32>
    %430 = arith.select %10, %26, %429 : vector<8x256xi1>, vector<8x256xf32>
    %431 = arith.addf %426, %430 : vector<8x256xf32>
    %cst_70 = arith.constant 2.500000e-01 : f32
    %432 = vector.broadcast %cst_70 : f32 to vector<8x256xf32>
    %433 = arith.mulf %432, %431 : vector<8x256xf32>
    %cst_71 = arith.constant 1.91519458E-8 : f32
    %434 = vector.broadcast %cst_71 : f32 to vector<8x256xf32>
    %435 = arith.addf %362, %434 : vector<8x256xf32>
    %cst_72 = arith.constant 6.221088E-8 : f32
    %436 = vector.broadcast %cst_72 : f32 to vector<8x256xf32>
    %437 = arith.addf %391, %436 : vector<8x256xf32>
    %cst_73 = arith.constant 4.37727756E-8 : f32
    %438 = vector.broadcast %cst_73 : f32 to vector<8x256xf32>
    %439 = arith.addf %433, %438 : vector<8x256xf32>
    %cst_74 = arith.constant 7.85358623E-8 : f32
    %440 = vector.broadcast %cst_74 : f32 to vector<8x256xf32>
    %441 = arith.addf %391, %440 : vector<8x256xf32>
    %cst_75 = arith.constant 7.79975835E-8 : f32
    %442 = vector.broadcast %cst_75 : f32 to vector<8x256xf32>
    %443 = arith.addf %366, %442 : vector<8x256xf32>
    %cst_76 = arith.constant 2.72592615E-8 : f32
    %444 = vector.broadcast %cst_76 : f32 to vector<8x256xf32>
    %445 = arith.addf %412, %444 : vector<8x256xf32>
    %cst_77 = arith.constant 2.76464256E-8 : f32
    %446 = vector.broadcast %cst_77 : f32 to vector<8x256xf32>
    %447 = arith.addf %433, %446 : vector<8x256xf32>
    %cst_78 = arith.constant 8.01872204E-8 : f32
    %448 = vector.broadcast %cst_78 : f32 to vector<8x256xf32>
    %449 = arith.addf %412, %448 : vector<8x256xf32>
    %cst_79 = arith.constant 9.58139381E-8 : f32
    %450 = vector.broadcast %cst_79 : f32 to vector<8x256xf32>
    %451 = arith.addf %370, %450 : vector<8x256xf32>
    %452 = arith.mulf %443, %451 : vector<8x256xf32>
    %453 = arith.mulf %445, %449 : vector<8x256xf32>
    %454 = arith.subf %452, %453 : vector<8x256xf32>
    %455 = arith.mulf %441, %451 : vector<8x256xf32>
    %456 = arith.mulf %445, %447 : vector<8x256xf32>
    %457 = arith.subf %455, %456 : vector<8x256xf32>
    %458 = arith.mulf %441, %449 : vector<8x256xf32>
    %459 = arith.mulf %443, %447 : vector<8x256xf32>
    %460 = arith.subf %458, %459 : vector<8x256xf32>
    %461 = arith.mulf %435, %454 : vector<8x256xf32>
    %462 = arith.mulf %437, %457 : vector<8x256xf32>
    %463 = arith.subf %461, %462 : vector<8x256xf32>
    %464 = arith.mulf %439, %460 : vector<8x256xf32>
    %465 = arith.addf %463, %464 : vector<8x256xf32>
    %cst_80 = arith.constant 0.000000e+00 : f32
    %466 = vector.broadcast %cst_80 : f32 to vector<8x256xf32>
    %467 = arith.cmpf oeq, %465, %466 : vector<8x256xf32>
    %cst_81 = arith.constant 1.000000e+00 : f32
    %468 = vector.broadcast %cst_81 : f32 to vector<8x256xf32>
    %469 = arith.select %467, %468, %465 : vector<8x256xi1>, vector<8x256xf32>
    %cst_82 = arith.constant 1.000000e+00 : f32
    %470 = vector.broadcast %cst_82 : f32 to vector<8x256xf32>
    %471 = arith.divf %470, %469 : vector<8x256xf32>
    %472 = arith.mulf %352, %454 : vector<8x256xf32>
    %473 = arith.mulf %355, %451 : vector<8x256xf32>
    %474 = arith.mulf %445, %358 : vector<8x256xf32>
    %475 = arith.subf %473, %474 : vector<8x256xf32>
    %476 = arith.mulf %437, %475 : vector<8x256xf32>
    %477 = arith.subf %472, %476 : vector<8x256xf32>
    %478 = arith.mulf %355, %449 : vector<8x256xf32>
    %479 = arith.mulf %443, %358 : vector<8x256xf32>
    %480 = arith.subf %478, %479 : vector<8x256xf32>
    %481 = arith.mulf %439, %480 : vector<8x256xf32>
    %482 = arith.addf %477, %481 : vector<8x256xf32>
    %483 = arith.mulf %482, %471 : vector<8x256xf32>
    %484 = arith.mulf %355, %451 : vector<8x256xf32>
    %485 = arith.mulf %445, %358 : vector<8x256xf32>
    %486 = arith.subf %484, %485 : vector<8x256xf32>
    %487 = arith.mulf %435, %486 : vector<8x256xf32>
    %488 = arith.mulf %352, %457 : vector<8x256xf32>
    %489 = arith.subf %487, %488 : vector<8x256xf32>
    %490 = arith.mulf %441, %358 : vector<8x256xf32>
    %491 = arith.mulf %355, %447 : vector<8x256xf32>
    %492 = arith.subf %490, %491 : vector<8x256xf32>
    %493 = arith.mulf %439, %492 : vector<8x256xf32>
    %494 = arith.addf %489, %493 : vector<8x256xf32>
    %495 = arith.mulf %494, %471 : vector<8x256xf32>
    %496 = arith.mulf %443, %358 : vector<8x256xf32>
    %497 = arith.mulf %355, %449 : vector<8x256xf32>
    %498 = arith.subf %496, %497 : vector<8x256xf32>
    %499 = arith.mulf %435, %498 : vector<8x256xf32>
    %500 = arith.mulf %441, %358 : vector<8x256xf32>
    %501 = arith.mulf %355, %447 : vector<8x256xf32>
    %502 = arith.subf %500, %501 : vector<8x256xf32>
    %503 = arith.mulf %437, %502 : vector<8x256xf32>
    %504 = arith.subf %499, %503 : vector<8x256xf32>
    %505 = arith.mulf %352, %460 : vector<8x256xf32>
    %506 = arith.addf %504, %505 : vector<8x256xf32>
    %507 = arith.mulf %506, %471 : vector<8x256xf32>
    %cst_83 = arith.constant 0.000000e+00 : f32
    %508 = vector.broadcast %cst_83 : f32 to vector<8x256xf32>
    %509 = arith.select %333, %483, %508 : vector<8x256xi1>, vector<8x256xf32>
    %510 = arith.select %333, %495, %508 : vector<8x256xi1>, vector<8x256xf32>
    %511 = arith.select %333, %507, %508 : vector<8x256xi1>, vector<8x256xf32>
    %cst_84 = arith.constant 0.000000e+00 : f32
    %512 = vector.broadcast %cst_84 : f32 to vector<8x256xf32>
    %513 = arith.subf %512, %509 : vector<8x256xf32>
    %cst_85 = arith.constant 0.000000e+00 : f32
    %514 = vector.broadcast %cst_85 : f32 to vector<8x256xf32>
    %515 = arith.subf %514, %510 : vector<8x256xf32>
    %cst_86 = arith.constant 0.000000e+00 : f32
    %516 = vector.broadcast %cst_86 : f32 to vector<8x256xf32>
    %517 = arith.subf %516, %511 : vector<8x256xf32>
    %518 = math.absf %513 : vector<8x256xf32>
    %519 = math.absf %515 : vector<8x256xf32>
    %520 = arith.maximumf %518, %519 : vector<8x256xf32>
    %521 = math.absf %517 : vector<8x256xf32>
    %522 = arith.maximumf %520, %521 : vector<8x256xf32>
    %cst_87 = arith.constant 0.699999988 : f32
    %523 = vector.broadcast %cst_87 : f32 to vector<8x256xf32>
    %524 = arith.cmpf ogt, %522, %523 : vector<8x256xf32>
    %525 = arith.select %524, %508, %513 : vector<8x256xi1>, vector<8x256xf32>
    %526 = arith.select %524, %508, %515 : vector<8x256xi1>, vector<8x256xf32>
    %527 = arith.select %524, %508, %517 : vector<8x256xi1>, vector<8x256xf32>
    %528 = arith.mulf %352, %525 : vector<8x256xf32>
    %529 = arith.mulf %355, %526 : vector<8x256xf32>
    %530 = arith.addf %528, %529 : vector<8x256xf32>
    %531 = arith.mulf %358, %527 : vector<8x256xf32>
    %532 = arith.addf %530, %531 : vector<8x256xf32>
    %cst_88 = arith.constant 5.000000e-01 : f32
    %533 = vector.broadcast %cst_88 : f32 to vector<8x256xf32>
    %534 = arith.mulf %533, %532 : vector<8x256xf32>
    %535 = arith.addf %54, %534 : vector<8x256xf32>
    %536 = arith.extui %333 : vector<8x256xi1> to vector<8x256xi32>
    %537 = arith.sitofp %536 : vector<8x256xi32> to vector<8x256xf32>
    %cst_89 = arith.constant 1.000000e+01 : f32
    %538 = vector.broadcast %cst_89 : f32 to vector<8x256xf32>
    %539 = arith.mulf %538, %537 : vector<8x256xf32>
    %540 = arith.addf %535, %539 : vector<8x256xf32>
    %c0_90 = arith.constant 0 : index
    %c256_91 = arith.constant 256 : index
    %541 = vector.load %arg3[%c0_90, %c256_91] : memref<8x1024xf32, #tpu.memory_space<vmem>>, vector<8x256xf32>
    tpu.vector_store %arg3[%c0_90, %c256_91], %540 {strides = array<i32>} : memref<8x1024xf32, #tpu.memory_space<vmem>>, vector<8x256xf32>,
    %cst_92 = arith.constant 1.000000e+00 : f32
    %542 = vector.broadcast %cst_92 : f32 to vector<8x256xf32>
    %543 = arith.addf %527, %542 : vector<8x256xf32>
    %c0_93 = arith.constant 0 : index
    %c256_94 = arith.constant 256 : index
    %544 = vector.load %arg4[%c0_93, %c256_94] : memref<8x3072xf32, #tpu.memory_space<vmem>>, vector<8x256xf32>
    tpu.vector_store %arg4[%c0_93, %c256_94], %543 {strides = array<i32>} : memref<8x3072xf32, #tpu.memory_space<vmem>>, vector<8x256xf32>,
    %545 = arith.addf %2, %526 : vector<8x256xf32>
    %c0_95 = arith.constant 0 : index
    %c1280 = arith.constant 1280 : index
    %546 = vector.load %arg4[%c0_95, %c1280] : memref<8x3072xf32, #tpu.memory_space<vmem>>, vector<8x256xf32>
    tpu.vector_store %arg4[%c0_95, %c1280], %545 {strides = array<i32>} : memref<8x3072xf32, #tpu.memory_space<vmem>>, vector<8x256xf32>,
    %547 = arith.addf %5, %525 : vector<8x256xf32>
    %c0_96 = arith.constant 0 : index
    %c2304 = arith.constant 2304 : index
    %548 = vector.load %arg4[%c0_96, %c2304] : memref<8x3072xf32, #tpu.memory_space<vmem>>, vector<8x256xf32>
    tpu.vector_store %arg4[%c0_96, %c2304], %547 {strides = array<i32>} : memref<8x3072xf32, #tpu.memory_space<vmem>>, vector<8x256xf32>,
    %c0_97 = arith.constant 0 : index
    %c768 = arith.constant 768 : index
    %549 = vector.load %arg2[%c0_97, %c768] : memref<8x1024xf32, #tpu.memory_space<vmem>>, vector<8x256xf32>
    %550 = vector.extract_strided_slice %549 {offsets = [0, 1], sizes = [8, 255], strides = [1, 1]} : vector<8x256xf32> to vector<8x255xf32>
    %551 = vector.extract_strided_slice %549 {offsets = [0, 0], sizes = [8, 1], strides = [1, 1]} : vector<8x256xf32> to vector<8x1xf32>
    %552 = tpu.concatenate %550, %551 in 1 : vector<8x255xf32>, vector<8x1xf32> -> vector<8x256xf32>
    %cst_98 = arith.constant 0.000000e+00 : f32
    %553 = vector.broadcast %cst_98 : f32 to vector<8x256xf32>
    %554 = arith.select %15, %553, %552 : vector<8x256xi1>, vector<8x256xf32>
    %555 = vector.extract_strided_slice %549 {offsets = [0, 255], sizes = [8, 1], strides = [1, 1]} : vector<8x256xf32> to vector<8x1xf32>
    %556 = vector.extract_strided_slice %549 {offsets = [0, 0], sizes = [8, 255], strides = [1, 1]} : vector<8x256xf32> to vector<8x255xf32>
    %557 = tpu.concatenate %555, %556 in 1 : vector<8x1xf32>, vector<8x255xf32> -> vector<8x256xf32>
    %cst_99 = arith.constant 0.000000e+00 : f32
    %558 = vector.broadcast %cst_99 : f32 to vector<8x256xf32>
    %559 = arith.select %10, %558, %557 : vector<8x256xi1>, vector<8x256xf32>
    %560 = arith.maximumf %554, %559 : vector<8x256xf32>
    %561 = arith.maximumf %549, %560 : vector<8x256xf32>
    %562 = vector.extract_strided_slice %561 {offsets = [0, 16], sizes = [8, 240], strides = [1, 1]} : vector<8x256xf32> to vector<8x240xf32>
    %563 = vector.extract_strided_slice %561 {offsets = [0, 0], sizes = [8, 16], strides = [1, 1]} : vector<8x256xf32> to vector<8x16xf32>
    %564 = tpu.concatenate %562, %563 in 1 : vector<8x240xf32>, vector<8x16xf32> -> vector<8x256xf32>
    %cst_100 = arith.constant 0.000000e+00 : f32
    %565 = vector.broadcast %cst_100 : f32 to vector<8x256xf32>
    %566 = arith.select %25, %565, %564 : vector<8x256xi1>, vector<8x256xf32>
    %567 = vector.extract_strided_slice %561 {offsets = [0, 240], sizes = [8, 16], strides = [1, 1]} : vector<8x256xf32> to vector<8x16xf32>
    %568 = vector.extract_strided_slice %561 {offsets = [0, 0], sizes = [8, 240], strides = [1, 1]} : vector<8x256xf32> to vector<8x240xf32>
    %569 = tpu.concatenate %567, %568 in 1 : vector<8x16xf32>, vector<8x240xf32> -> vector<8x256xf32>
    %cst_101 = arith.constant 0.000000e+00 : f32
    %570 = vector.broadcast %cst_101 : f32 to vector<8x256xf32>
    %571 = arith.select %20, %570, %569 : vector<8x256xi1>, vector<8x256xf32>
    %572 = arith.maximumf %566, %571 : vector<8x256xf32>
    %573 = arith.maximumf %561, %572 : vector<8x256xf32>
    %574 = arith.maximumf %566, %571 : vector<8x256xf32>
    %575 = arith.maximumf %554, %559 : vector<8x256xf32>
    %576 = arith.maximumf %574, %575 : vector<8x256xf32>
    %cst_102 = arith.constant 0.000000e+00 : f32
    %577 = vector.broadcast %cst_102 : f32 to vector<8x256xf32>
    %578 = arith.maximumf %328, %577 : vector<8x256xf32>
    %579 = arith.maximumf %578, %78 : vector<8x256xf32>
    %580 = arith.maximumf %579, %573 : vector<8x256xf32>
    %581 = arith.cmpf ogt, %301, %580 : vector<8x256xf32>
    %582 = vector.extract_strided_slice %301 {offsets = [0, 1], sizes = [8, 255], strides = [1, 1]} : vector<8x256xf32> to vector<8x255xf32>
    %583 = vector.extract_strided_slice %301 {offsets = [0, 0], sizes = [8, 1], strides = [1, 1]} : vector<8x256xf32> to vector<8x1xf32>
    %584 = tpu.concatenate %582, %583 in 1 : vector<8x255xf32>, vector<8x1xf32> -> vector<8x256xf32>
    %585 = arith.select %15, %301, %584 : vector<8x256xi1>, vector<8x256xf32>
    %586 = vector.extract_strided_slice %301 {offsets = [0, 255], sizes = [8, 1], strides = [1, 1]} : vector<8x256xf32> to vector<8x1xf32>
    %587 = vector.extract_strided_slice %301 {offsets = [0, 0], sizes = [8, 255], strides = [1, 1]} : vector<8x256xf32> to vector<8x255xf32>
    %588 = tpu.concatenate %586, %587 in 1 : vector<8x1xf32>, vector<8x255xf32> -> vector<8x256xf32>
    %589 = arith.select %10, %301, %588 : vector<8x256xi1>, vector<8x256xf32>
    %590 = vector.extract_strided_slice %301 {offsets = [0, 16], sizes = [8, 240], strides = [1, 1]} : vector<8x256xf32> to vector<8x240xf32>
    %591 = vector.extract_strided_slice %301 {offsets = [0, 0], sizes = [8, 16], strides = [1, 1]} : vector<8x256xf32> to vector<8x16xf32>
    %592 = tpu.concatenate %590, %591 in 1 : vector<8x240xf32>, vector<8x16xf32> -> vector<8x256xf32>
    %593 = arith.select %25, %301, %592 : vector<8x256xi1>, vector<8x256xf32>
    %594 = vector.extract_strided_slice %301 {offsets = [0, 240], sizes = [8, 16], strides = [1, 1]} : vector<8x256xf32> to vector<8x16xf32>
    %595 = vector.extract_strided_slice %301 {offsets = [0, 0], sizes = [8, 240], strides = [1, 1]} : vector<8x256xf32> to vector<8x240xf32>
    %596 = tpu.concatenate %594, %595 in 1 : vector<8x16xf32>, vector<8x240xf32> -> vector<8x256xf32>
    %597 = arith.select %20, %301, %596 : vector<8x256xi1>, vector<8x256xf32>
    %598 = arith.subf %585, %589 : vector<8x256xf32>
    %cst_103 = arith.constant 5.000000e-01 : f32
    %599 = vector.broadcast %cst_103 : f32 to vector<8x256xf32>
    %600 = arith.mulf %599, %598 : vector<8x256xf32>
    %601 = arith.subf %593, %597 : vector<8x256xf32>
    %cst_104 = arith.constant 5.000000e-01 : f32
    %602 = vector.broadcast %cst_104 : f32 to vector<8x256xf32>
    %603 = arith.mulf %602, %601 : vector<8x256xf32>
    %604 = arith.subf %549, %54 : vector<8x256xf32>
    %cst_105 = arith.constant 5.000000e-01 : f32
    %605 = vector.broadcast %cst_105 : f32 to vector<8x256xf32>
    %606 = arith.mulf %605, %604 : vector<8x256xf32>
    %cst_106 = arith.constant 2.000000e+00 : f32
    %607 = vector.broadcast %cst_106 : f32 to vector<8x256xf32>
    %608 = arith.mulf %607, %301 : vector<8x256xf32>
    %609 = arith.subf %585, %608 : vector<8x256xf32>
    %610 = arith.addf %609, %589 : vector<8x256xf32>
    %cst_107 = arith.constant 2.000000e+00 : f32
    %611 = vector.broadcast %cst_107 : f32 to vector<8x256xf32>
    %612 = arith.mulf %611, %301 : vector<8x256xf32>
    %613 = arith.subf %593, %612 : vector<8x256xf32>
    %614 = arith.addf %613, %597 : vector<8x256xf32>
    %cst_108 = arith.constant 2.000000e+00 : f32
    %615 = vector.broadcast %cst_108 : f32 to vector<8x256xf32>
    %616 = arith.mulf %615, %301 : vector<8x256xf32>
    %617 = arith.subf %549, %616 : vector<8x256xf32>
    %618 = arith.addf %617, %54 : vector<8x256xf32>
    %619 = vector.extract_strided_slice %585 {offsets = [0, 16], sizes = [8, 240], strides = [1, 1]} : vector<8x256xf32> to vector<8x240xf32>
    %620 = vector.extract_strided_slice %585 {offsets = [0, 0], sizes = [8, 16], strides = [1, 1]} : vector<8x256xf32> to vector<8x16xf32>
    %621 = tpu.concatenate %619, %620 in 1 : vector<8x240xf32>, vector<8x16xf32> -> vector<8x256xf32>
    %622 = arith.select %25, %585, %621 : vector<8x256xi1>, vector<8x256xf32>
    %623 = vector.extract_strided_slice %589 {offsets = [0, 16], sizes = [8, 240], strides = [1, 1]} : vector<8x256xf32> to vector<8x240xf32>
    %624 = vector.extract_strided_slice %589 {offsets = [0, 0], sizes = [8, 16], strides = [1, 1]} : vector<8x256xf32> to vector<8x16xf32>
    %625 = tpu.concatenate %623, %624 in 1 : vector<8x240xf32>, vector<8x16xf32> -> vector<8x256xf32>
    %626 = arith.select %25, %589, %625 : vector<8x256xi1>, vector<8x256xf32>
    %627 = arith.subf %622, %626 : vector<8x256xf32>
    %628 = vector.extract_strided_slice %585 {offsets = [0, 240], sizes = [8, 16], strides = [1, 1]} : vector<8x256xf32> to vector<8x16xf32>
    %629 = vector.extract_strided_slice %585 {offsets = [0, 0], sizes = [8, 240], strides = [1, 1]} : vector<8x256xf32> to vector<8x240xf32>
    %630 = tpu.concatenate %628, %629 in 1 : vector<8x16xf32>, vector<8x240xf32> -> vector<8x256xf32>
    %631 = arith.select %20, %585, %630 : vector<8x256xi1>, vector<8x256xf32>
    %632 = arith.subf %627, %631 : vector<8x256xf32>
    %633 = vector.extract_strided_slice %589 {offsets = [0, 240], sizes = [8, 16], strides = [1, 1]} : vector<8x256xf32> to vector<8x16xf32>
    %634 = vector.extract_strided_slice %589 {offsets = [0, 0], sizes = [8, 240], strides = [1, 1]} : vector<8x256xf32> to vector<8x240xf32>
    %635 = tpu.concatenate %633, %634 in 1 : vector<8x16xf32>, vector<8x240xf32> -> vector<8x256xf32>
    %636 = arith.select %20, %589, %635 : vector<8x256xi1>, vector<8x256xf32>
    %637 = arith.addf %632, %636 : vector<8x256xf32>
    %cst_109 = arith.constant 2.500000e-01 : f32
    %638 = vector.broadcast %cst_109 : f32 to vector<8x256xf32>
    %639 = arith.mulf %638, %637 : vector<8x256xf32>
    %640 = vector.extract_strided_slice %549 {offsets = [0, 16], sizes = [8, 240], strides = [1, 1]} : vector<8x256xf32> to vector<8x240xf32>
    %641 = vector.extract_strided_slice %549 {offsets = [0, 0], sizes = [8, 16], strides = [1, 1]} : vector<8x256xf32> to vector<8x16xf32>
    %642 = tpu.concatenate %640, %641 in 1 : vector<8x240xf32>, vector<8x16xf32> -> vector<8x256xf32>
    %643 = arith.select %25, %549, %642 : vector<8x256xi1>, vector<8x256xf32>
    %644 = vector.extract_strided_slice %549 {offsets = [0, 240], sizes = [8, 16], strides = [1, 1]} : vector<8x256xf32> to vector<8x16xf32>
    %645 = vector.extract_strided_slice %549 {offsets = [0, 0], sizes = [8, 240], strides = [1, 1]} : vector<8x256xf32> to vector<8x240xf32>
    %646 = tpu.concatenate %644, %645 in 1 : vector<8x16xf32>, vector<8x240xf32> -> vector<8x256xf32>
    %647 = arith.select %20, %549, %646 : vector<8x256xi1>, vector<8x256xf32>
    %648 = arith.subf %643, %647 : vector<8x256xf32>
    %649 = vector.extract_strided_slice %54 {offsets = [0, 16], sizes = [8, 240], strides = [1, 1]} : vector<8x256xf32> to vector<8x240xf32>
    %650 = vector.extract_strided_slice %54 {offsets = [0, 0], sizes = [8, 16], strides = [1, 1]} : vector<8x256xf32> to vector<8x16xf32>
    %651 = tpu.concatenate %649, %650 in 1 : vector<8x240xf32>, vector<8x16xf32> -> vector<8x256xf32>
    %652 = arith.select %25, %54, %651 : vector<8x256xi1>, vector<8x256xf32>
    %653 = arith.subf %648, %652 : vector<8x256xf32>
    %654 = vector.extract_strided_slice %54 {offsets = [0, 240], sizes = [8, 16], strides = [1, 1]} : vector<8x256xf32> to vector<8x16xf32>
    %655 = vector.extract_strided_slice %54 {offsets = [0, 0], sizes = [8, 240], strides = [1, 1]} : vector<8x256xf32> to vector<8x240xf32>
    %656 = tpu.concatenate %654, %655 in 1 : vector<8x16xf32>, vector<8x240xf32> -> vector<8x256xf32>
    %657 = arith.select %20, %54, %656 : vector<8x256xi1>, vector<8x256xf32>
    %658 = arith.addf %653, %657 : vector<8x256xf32>
    %cst_110 = arith.constant 2.500000e-01 : f32
    %659 = vector.broadcast %cst_110 : f32 to vector<8x256xf32>
    %660 = arith.mulf %659, %658 : vector<8x256xf32>
    %661 = vector.extract_strided_slice %549 {offsets = [0, 1], sizes = [8, 255], strides = [1, 1]} : vector<8x256xf32> to vector<8x255xf32>
    %662 = vector.extract_strided_slice %549 {offsets = [0, 0], sizes = [8, 1], strides = [1, 1]} : vector<8x256xf32> to vector<8x1xf32>
    %663 = tpu.concatenate %661, %662 in 1 : vector<8x255xf32>, vector<8x1xf32> -> vector<8x256xf32>
    %664 = arith.select %15, %549, %663 : vector<8x256xi1>, vector<8x256xf32>
    %665 = vector.extract_strided_slice %549 {offsets = [0, 255], sizes = [8, 1], strides = [1, 1]} : vector<8x256xf32> to vector<8x1xf32>
    %666 = vector.extract_strided_slice %549 {offsets = [0, 0], sizes = [8, 255], strides = [1, 1]} : vector<8x256xf32> to vector<8x255xf32>
    %667 = tpu.concatenate %665, %666 in 1 : vector<8x1xf32>, vector<8x255xf32> -> vector<8x256xf32>
    %668 = arith.select %10, %549, %667 : vector<8x256xi1>, vector<8x256xf32>
    %669 = arith.subf %664, %668 : vector<8x256xf32>
    %670 = vector.extract_strided_slice %54 {offsets = [0, 1], sizes = [8, 255], strides = [1, 1]} : vector<8x256xf32> to vector<8x255xf32>
    %671 = vector.extract_strided_slice %54 {offsets = [0, 0], sizes = [8, 1], strides = [1, 1]} : vector<8x256xf32> to vector<8x1xf32>
    %672 = tpu.concatenate %670, %671 in 1 : vector<8x255xf32>, vector<8x1xf32> -> vector<8x256xf32>
    %673 = arith.select %15, %54, %672 : vector<8x256xi1>, vector<8x256xf32>
    %674 = arith.subf %669, %673 : vector<8x256xf32>
    %675 = vector.extract_strided_slice %54 {offsets = [0, 255], sizes = [8, 1], strides = [1, 1]} : vector<8x256xf32> to vector<8x1xf32>
    %676 = vector.extract_strided_slice %54 {offsets = [0, 0], sizes = [8, 255], strides = [1, 1]} : vector<8x256xf32> to vector<8x255xf32>
    %677 = tpu.concatenate %675, %676 in 1 : vector<8x1xf32>, vector<8x255xf32> -> vector<8x256xf32>
    %678 = arith.select %10, %54, %677 : vector<8x256xi1>, vector<8x256xf32>
    %679 = arith.addf %674, %678 : vector<8x256xf32>
    %cst_111 = arith.constant 2.500000e-01 : f32
    %680 = vector.broadcast %cst_111 : f32 to vector<8x256xf32>
    %681 = arith.mulf %680, %679 : vector<8x256xf32>
    %cst_112 = arith.constant 1.91519458E-8 : f32
    %682 = vector.broadcast %cst_112 : f32 to vector<8x256xf32>
    %683 = arith.addf %610, %682 : vector<8x256xf32>
    %cst_113 = arith.constant 6.221088E-8 : f32
    %684 = vector.broadcast %cst_113 : f32 to vector<8x256xf32>
    %685 = arith.addf %639, %684 : vector<8x256xf32>
    %cst_114 = arith.constant 4.37727756E-8 : f32
    %686 = vector.broadcast %cst_114 : f32 to vector<8x256xf32>
    %687 = arith.addf %681, %686 : vector<8x256xf32>
    %cst_115 = arith.constant 7.85358623E-8 : f32
    %688 = vector.broadcast %cst_115 : f32 to vector<8x256xf32>
    %689 = arith.addf %639, %688 : vector<8x256xf32>
    %cst_116 = arith.constant 7.79975835E-8 : f32
    %690 = vector.broadcast %cst_116 : f32 to vector<8x256xf32>
    %691 = arith.addf %614, %690 : vector<8x256xf32>
    %cst_117 = arith.constant 2.72592615E-8 : f32
    %692 = vector.broadcast %cst_117 : f32 to vector<8x256xf32>
    %693 = arith.addf %660, %692 : vector<8x256xf32>
    %cst_118 = arith.constant 2.76464256E-8 : f32
    %694 = vector.broadcast %cst_118 : f32 to vector<8x256xf32>
    %695 = arith.addf %681, %694 : vector<8x256xf32>
    %cst_119 = arith.constant 8.01872204E-8 : f32
    %696 = vector.broadcast %cst_119 : f32 to vector<8x256xf32>
    %697 = arith.addf %660, %696 : vector<8x256xf32>
    %cst_120 = arith.constant 9.58139381E-8 : f32
    %698 = vector.broadcast %cst_120 : f32 to vector<8x256xf32>
    %699 = arith.addf %618, %698 : vector<8x256xf32>
    %700 = arith.mulf %691, %699 : vector<8x256xf32>
    %701 = arith.mulf %693, %697 : vector<8x256xf32>
    %702 = arith.subf %700, %701 : vector<8x256xf32>
    %703 = arith.mulf %689, %699 : vector<8x256xf32>
    %704 = arith.mulf %693, %695 : vector<8x256xf32>
    %705 = arith.subf %703, %704 : vector<8x256xf32>
    %706 = arith.mulf %689, %697 : vector<8x256xf32>
    %707 = arith.mulf %691, %695 : vector<8x256xf32>
    %708 = arith.subf %706, %707 : vector<8x256xf32>
    %709 = arith.mulf %683, %702 : vector<8x256xf32>
    %710 = arith.mulf %685, %705 : vector<8x256xf32>
    %711 = arith.subf %709, %710 : vector<8x256xf32>
    %712 = arith.mulf %687, %708 : vector<8x256xf32>
    %713 = arith.addf %711, %712 : vector<8x256xf32>
    %cst_121 = arith.constant 0.000000e+00 : f32
    %714 = vector.broadcast %cst_121 : f32 to vector<8x256xf32>
    %715 = arith.cmpf oeq, %713, %714 : vector<8x256xf32>
    %cst_122 = arith.constant 1.000000e+00 : f32
    %716 = vector.broadcast %cst_122 : f32 to vector<8x256xf32>
    %717 = arith.select %715, %716, %713 : vector<8x256xi1>, vector<8x256xf32>
    %cst_123 = arith.constant 1.000000e+00 : f32
    %718 = vector.broadcast %cst_123 : f32 to vector<8x256xf32>
    %719 = arith.divf %718, %717 : vector<8x256xf32>
    %720 = arith.mulf %600, %702 : vector<8x256xf32>
    %721 = arith.mulf %603, %699 : vector<8x256xf32>
    %722 = arith.mulf %693, %606 : vector<8x256xf32>
    %723 = arith.subf %721, %722 : vector<8x256xf32>
    %724 = arith.mulf %685, %723 : vector<8x256xf32>
    %725 = arith.subf %720, %724 : vector<8x256xf32>
    %726 = arith.mulf %603, %697 : vector<8x256xf32>
    %727 = arith.mulf %691, %606 : vector<8x256xf32>
    %728 = arith.subf %726, %727 : vector<8x256xf32>
    %729 = arith.mulf %687, %728 : vector<8x256xf32>
    %730 = arith.addf %725, %729 : vector<8x256xf32>
    %731 = arith.mulf %730, %719 : vector<8x256xf32>
    %732 = arith.mulf %603, %699 : vector<8x256xf32>
    %733 = arith.mulf %693, %606 : vector<8x256xf32>
    %734 = arith.subf %732, %733 : vector<8x256xf32>
    %735 = arith.mulf %683, %734 : vector<8x256xf32>
    %736 = arith.mulf %600, %705 : vector<8x256xf32>
    %737 = arith.subf %735, %736 : vector<8x256xf32>
    %738 = arith.mulf %689, %606 : vector<8x256xf32>
    %739 = arith.mulf %603, %695 : vector<8x256xf32>
    %740 = arith.subf %738, %739 : vector<8x256xf32>
    %741 = arith.mulf %687, %740 : vector<8x256xf32>
    %742 = arith.addf %737, %741 : vector<8x256xf32>
    %743 = arith.mulf %742, %719 : vector<8x256xf32>
    %744 = arith.mulf %691, %606 : vector<8x256xf32>
    %745 = arith.mulf %603, %697 : vector<8x256xf32>
    %746 = arith.subf %744, %745 : vector<8x256xf32>
    %747 = arith.mulf %683, %746 : vector<8x256xf32>
    %748 = arith.mulf %689, %606 : vector<8x256xf32>
    %749 = arith.mulf %603, %695 : vector<8x256xf32>
    %750 = arith.subf %748, %749 : vector<8x256xf32>
    %751 = arith.mulf %685, %750 : vector<8x256xf32>
    %752 = arith.subf %747, %751 : vector<8x256xf32>
    %753 = arith.mulf %600, %708 : vector<8x256xf32>
    %754 = arith.addf %752, %753 : vector<8x256xf32>
    %755 = arith.mulf %754, %719 : vector<8x256xf32>
    %cst_124 = arith.constant 0.000000e+00 : f32
    %756 = vector.broadcast %cst_124 : f32 to vector<8x256xf32>
    %757 = arith.select %581, %731, %756 : vector<8x256xi1>, vector<8x256xf32>
    %758 = arith.select %581, %743, %756 : vector<8x256xi1>, vector<8x256xf32>
    %759 = arith.select %581, %755, %756 : vector<8x256xi1>, vector<8x256xf32>
    %cst_125 = arith.constant 0.000000e+00 : f32
    %760 = vector.broadcast %cst_125 : f32 to vector<8x256xf32>
    %761 = arith.subf %760, %757 : vector<8x256xf32>
    %cst_126 = arith.constant 0.000000e+00 : f32
    %762 = vector.broadcast %cst_126 : f32 to vector<8x256xf32>
    %763 = arith.subf %762, %758 : vector<8x256xf32>
    %cst_127 = arith.constant 0.000000e+00 : f32
    %764 = vector.broadcast %cst_127 : f32 to vector<8x256xf32>
    %765 = arith.subf %764, %759 : vector<8x256xf32>
    %766 = math.absf %761 : vector<8x256xf32>
    %767 = math.absf %763 : vector<8x256xf32>
    %768 = arith.maximumf %766, %767 : vector<8x256xf32>
    %769 = math.absf %765 : vector<8x256xf32>
    %770 = arith.maximumf %768, %769 : vector<8x256xf32>
    %cst_128 = arith.constant 0.699999988 : f32
    %771 = vector.broadcast %cst_128 : f32 to vector<8x256xf32>
    %772 = arith.cmpf ogt, %770, %771 : vector<8x256xf32>
    %773 = arith.select %772, %756, %761 : vector<8x256xi1>, vector<8x256xf32>
    %774 = arith.select %772, %756, %763 : vector<8x256xi1>, vector<8x256xf32>
    %775 = arith.select %772, %756, %765 : vector<8x256xi1>, vector<8x256xf32>
    %776 = arith.mulf %600, %773 : vector<8x256xf32>
    %777 = arith.mulf %603, %774 : vector<8x256xf32>
    %778 = arith.addf %776, %777 : vector<8x256xf32>
    %779 = arith.mulf %606, %775 : vector<8x256xf32>
    %780 = arith.addf %778, %779 : vector<8x256xf32>
    %cst_129 = arith.constant 5.000000e-01 : f32
    %781 = vector.broadcast %cst_129 : f32 to vector<8x256xf32>
    %782 = arith.mulf %781, %780 : vector<8x256xf32>
    %783 = arith.addf %301, %782 : vector<8x256xf32>
    %784 = arith.extui %581 : vector<8x256xi1> to vector<8x256xi32>
    %785 = arith.sitofp %784 : vector<8x256xi32> to vector<8x256xf32>
    %cst_130 = arith.constant 1.000000e+01 : f32
    %786 = vector.broadcast %cst_130 : f32 to vector<8x256xf32>
    %787 = arith.mulf %786, %785 : vector<8x256xf32>
    %788 = arith.addf %783, %787 : vector<8x256xf32>
    %c0_131 = arith.constant 0 : index
    %c512_132 = arith.constant 512 : index
    %789 = vector.load %arg3[%c0_131, %c512_132] : memref<8x1024xf32, #tpu.memory_space<vmem>>, vector<8x256xf32>
    tpu.vector_store %arg3[%c0_131, %c512_132], %788 {strides = array<i32>} : memref<8x1024xf32, #tpu.memory_space<vmem>>, vector<8x256xf32>,
    %cst_133 = arith.constant 2.000000e+00 : f32
    %790 = vector.broadcast %cst_133 : f32 to vector<8x256xf32>
    %791 = arith.addf %775, %790 : vector<8x256xf32>
    %c0_134 = arith.constant 0 : index
    %c512_135 = arith.constant 512 : index
    %792 = vector.load %arg4[%c0_134, %c512_135] : memref<8x3072xf32, #tpu.memory_space<vmem>>, vector<8x256xf32>
    tpu.vector_store %arg4[%c0_134, %c512_135], %791 {strides = array<i32>} : memref<8x3072xf32, #tpu.memory_space<vmem>>, vector<8x256xf32>,
    %793 = arith.addf %2, %774 : vector<8x256xf32>
    %c0_136 = arith.constant 0 : index
    %c1536 = arith.constant 1536 : index
    %794 = vector.load %arg4[%c0_136, %c1536] : memref<8x3072xf32, #tpu.memory_space<vmem>>, vector<8x256xf32>
    tpu.vector_store %arg4[%c0_136, %c1536], %793 {strides = array<i32>} : memref<8x3072xf32, #tpu.memory_space<vmem>>, vector<8x256xf32>,
    %795 = arith.addf %5, %773 : vector<8x256xf32>
    %c0_137 = arith.constant 0 : index
    %c2560 = arith.constant 2560 : index
    %796 = vector.load %arg4[%c0_137, %c2560] : memref<8x3072xf32, #tpu.memory_space<vmem>>, vector<8x256xf32>
    tpu.vector_store %arg4[%c0_137, %c2560], %795 {strides = array<i32>} : memref<8x3072xf32, #tpu.memory_space<vmem>>, vector<8x256xf32>,
    %cst_138 = arith.constant 0.000000e+00 : f32
    %797 = vector.broadcast %cst_138 : f32 to vector<8x256xf32>
    %798 = arith.maximumf %576, %797 : vector<8x256xf32>
    %799 = arith.maximumf %798, %325 : vector<8x256xf32>
    %800 = arith.cmpf ogt, %549, %799 : vector<8x256xf32>
    %801 = vector.extract_strided_slice %549 {offsets = [0, 1], sizes = [8, 255], strides = [1, 1]} : vector<8x256xf32> to vector<8x255xf32>
    %802 = vector.extract_strided_slice %549 {offsets = [0, 0], sizes = [8, 1], strides = [1, 1]} : vector<8x256xf32> to vector<8x1xf32>
    %803 = tpu.concatenate %801, %802 in 1 : vector<8x255xf32>, vector<8x1xf32> -> vector<8x256xf32>
    %804 = arith.select %15, %549, %803 : vector<8x256xi1>, vector<8x256xf32>
    %805 = vector.extract_strided_slice %549 {offsets = [0, 255], sizes = [8, 1], strides = [1, 1]} : vector<8x256xf32> to vector<8x1xf32>
    %806 = vector.extract_strided_slice %549 {offsets = [0, 0], sizes = [8, 255], strides = [1, 1]} : vector<8x256xf32> to vector<8x255xf32>
    %807 = tpu.concatenate %805, %806 in 1 : vector<8x1xf32>, vector<8x255xf32> -> vector<8x256xf32>
    %808 = arith.select %10, %549, %807 : vector<8x256xi1>, vector<8x256xf32>
    %809 = vector.extract_strided_slice %549 {offsets = [0, 16], sizes = [8, 240], strides = [1, 1]} : vector<8x256xf32> to vector<8x240xf32>
    %810 = vector.extract_strided_slice %549 {offsets = [0, 0], sizes = [8, 16], strides = [1, 1]} : vector<8x256xf32> to vector<8x16xf32>
    %811 = tpu.concatenate %809, %810 in 1 : vector<8x240xf32>, vector<8x16xf32> -> vector<8x256xf32>
    %812 = arith.select %25, %549, %811 : vector<8x256xi1>, vector<8x256xf32>
    %813 = vector.extract_strided_slice %549 {offsets = [0, 240], sizes = [8, 16], strides = [1, 1]} : vector<8x256xf32> to vector<8x16xf32>
    %814 = vector.extract_strided_slice %549 {offsets = [0, 0], sizes = [8, 240], strides = [1, 1]} : vector<8x256xf32> to vector<8x240xf32>
    %815 = tpu.concatenate %813, %814 in 1 : vector<8x16xf32>, vector<8x240xf32> -> vector<8x256xf32>
    %816 = arith.select %20, %549, %815 : vector<8x256xi1>, vector<8x256xf32>
    %817 = arith.subf %804, %808 : vector<8x256xf32>
    %cst_139 = arith.constant 5.000000e-01 : f32
    %818 = vector.broadcast %cst_139 : f32 to vector<8x256xf32>
    %819 = arith.mulf %818, %817 : vector<8x256xf32>
    %820 = arith.subf %812, %816 : vector<8x256xf32>
    %cst_140 = arith.constant 5.000000e-01 : f32
    %821 = vector.broadcast %cst_140 : f32 to vector<8x256xf32>
    %822 = arith.mulf %821, %820 : vector<8x256xf32>
    %823 = arith.subf %549, %301 : vector<8x256xf32>
    %cst_141 = arith.constant 5.000000e-01 : f32
    %824 = vector.broadcast %cst_141 : f32 to vector<8x256xf32>
    %825 = arith.mulf %824, %823 : vector<8x256xf32>
    %cst_142 = arith.constant 2.000000e+00 : f32
    %826 = vector.broadcast %cst_142 : f32 to vector<8x256xf32>
    %827 = arith.mulf %826, %549 : vector<8x256xf32>
    %828 = arith.subf %804, %827 : vector<8x256xf32>
    %829 = arith.addf %828, %808 : vector<8x256xf32>
    %cst_143 = arith.constant 2.000000e+00 : f32
    %830 = vector.broadcast %cst_143 : f32 to vector<8x256xf32>
    %831 = arith.mulf %830, %549 : vector<8x256xf32>
    %832 = arith.subf %812, %831 : vector<8x256xf32>
    %833 = arith.addf %832, %816 : vector<8x256xf32>
    %cst_144 = arith.constant 2.000000e+00 : f32
    %834 = vector.broadcast %cst_144 : f32 to vector<8x256xf32>
    %835 = arith.mulf %834, %549 : vector<8x256xf32>
    %836 = arith.subf %549, %835 : vector<8x256xf32>
    %837 = arith.addf %836, %301 : vector<8x256xf32>
    %838 = vector.extract_strided_slice %804 {offsets = [0, 16], sizes = [8, 240], strides = [1, 1]} : vector<8x256xf32> to vector<8x240xf32>
    %839 = vector.extract_strided_slice %804 {offsets = [0, 0], sizes = [8, 16], strides = [1, 1]} : vector<8x256xf32> to vector<8x16xf32>
    %840 = tpu.concatenate %838, %839 in 1 : vector<8x240xf32>, vector<8x16xf32> -> vector<8x256xf32>
    %841 = arith.select %25, %804, %840 : vector<8x256xi1>, vector<8x256xf32>
    %842 = vector.extract_strided_slice %808 {offsets = [0, 16], sizes = [8, 240], strides = [1, 1]} : vector<8x256xf32> to vector<8x240xf32>
    %843 = vector.extract_strided_slice %808 {offsets = [0, 0], sizes = [8, 16], strides = [1, 1]} : vector<8x256xf32> to vector<8x16xf32>
    %844 = tpu.concatenate %842, %843 in 1 : vector<8x240xf32>, vector<8x16xf32> -> vector<8x256xf32>
    %845 = arith.select %25, %808, %844 : vector<8x256xi1>, vector<8x256xf32>
    %846 = arith.subf %841, %845 : vector<8x256xf32>
    %847 = vector.extract_strided_slice %804 {offsets = [0, 240], sizes = [8, 16], strides = [1, 1]} : vector<8x256xf32> to vector<8x16xf32>
    %848 = vector.extract_strided_slice %804 {offsets = [0, 0], sizes = [8, 240], strides = [1, 1]} : vector<8x256xf32> to vector<8x240xf32>
    %849 = tpu.concatenate %847, %848 in 1 : vector<8x16xf32>, vector<8x240xf32> -> vector<8x256xf32>
    %850 = arith.select %20, %804, %849 : vector<8x256xi1>, vector<8x256xf32>
    %851 = arith.subf %846, %850 : vector<8x256xf32>
    %852 = vector.extract_strided_slice %808 {offsets = [0, 240], sizes = [8, 16], strides = [1, 1]} : vector<8x256xf32> to vector<8x16xf32>
    %853 = vector.extract_strided_slice %808 {offsets = [0, 0], sizes = [8, 240], strides = [1, 1]} : vector<8x256xf32> to vector<8x240xf32>
    %854 = tpu.concatenate %852, %853 in 1 : vector<8x16xf32>, vector<8x240xf32> -> vector<8x256xf32>
    %855 = arith.select %20, %808, %854 : vector<8x256xi1>, vector<8x256xf32>
    %856 = arith.addf %851, %855 : vector<8x256xf32>
    %cst_145 = arith.constant 2.500000e-01 : f32
    %857 = vector.broadcast %cst_145 : f32 to vector<8x256xf32>
    %858 = arith.mulf %857, %856 : vector<8x256xf32>
    %859 = vector.extract_strided_slice %549 {offsets = [0, 16], sizes = [8, 240], strides = [1, 1]} : vector<8x256xf32> to vector<8x240xf32>
    %860 = vector.extract_strided_slice %549 {offsets = [0, 0], sizes = [8, 16], strides = [1, 1]} : vector<8x256xf32> to vector<8x16xf32>
    %861 = tpu.concatenate %859, %860 in 1 : vector<8x240xf32>, vector<8x16xf32> -> vector<8x256xf32>
    %862 = arith.select %25, %549, %861 : vector<8x256xi1>, vector<8x256xf32>
    %863 = vector.extract_strided_slice %549 {offsets = [0, 240], sizes = [8, 16], strides = [1, 1]} : vector<8x256xf32> to vector<8x16xf32>
    %864 = vector.extract_strided_slice %549 {offsets = [0, 0], sizes = [8, 240], strides = [1, 1]} : vector<8x256xf32> to vector<8x240xf32>
    %865 = tpu.concatenate %863, %864 in 1 : vector<8x16xf32>, vector<8x240xf32> -> vector<8x256xf32>
    %866 = arith.select %20, %549, %865 : vector<8x256xi1>, vector<8x256xf32>
    %867 = arith.subf %862, %866 : vector<8x256xf32>
    %868 = vector.extract_strided_slice %301 {offsets = [0, 16], sizes = [8, 240], strides = [1, 1]} : vector<8x256xf32> to vector<8x240xf32>
    %869 = vector.extract_strided_slice %301 {offsets = [0, 0], sizes = [8, 16], strides = [1, 1]} : vector<8x256xf32> to vector<8x16xf32>
    %870 = tpu.concatenate %868, %869 in 1 : vector<8x240xf32>, vector<8x16xf32> -> vector<8x256xf32>
    %871 = arith.select %25, %301, %870 : vector<8x256xi1>, vector<8x256xf32>
    %872 = arith.subf %867, %871 : vector<8x256xf32>
    %873 = vector.extract_strided_slice %301 {offsets = [0, 240], sizes = [8, 16], strides = [1, 1]} : vector<8x256xf32> to vector<8x16xf32>
    %874 = vector.extract_strided_slice %301 {offsets = [0, 0], sizes = [8, 240], strides = [1, 1]} : vector<8x256xf32> to vector<8x240xf32>
    %875 = tpu.concatenate %873, %874 in 1 : vector<8x16xf32>, vector<8x240xf32> -> vector<8x256xf32>
    %876 = arith.select %20, %301, %875 : vector<8x256xi1>, vector<8x256xf32>
    %877 = arith.addf %872, %876 : vector<8x256xf32>
    %cst_146 = arith.constant 2.500000e-01 : f32
    %878 = vector.broadcast %cst_146 : f32 to vector<8x256xf32>
    %879 = arith.mulf %878, %877 : vector<8x256xf32>
    %880 = vector.extract_strided_slice %549 {offsets = [0, 1], sizes = [8, 255], strides = [1, 1]} : vector<8x256xf32> to vector<8x255xf32>
    %881 = vector.extract_strided_slice %549 {offsets = [0, 0], sizes = [8, 1], strides = [1, 1]} : vector<8x256xf32> to vector<8x1xf32>
    %882 = tpu.concatenate %880, %881 in 1 : vector<8x255xf32>, vector<8x1xf32> -> vector<8x256xf32>
    %883 = arith.select %15, %549, %882 : vector<8x256xi1>, vector<8x256xf32>
    %884 = vector.extract_strided_slice %549 {offsets = [0, 255], sizes = [8, 1], strides = [1, 1]} : vector<8x256xf32> to vector<8x1xf32>
    %885 = vector.extract_strided_slice %549 {offsets = [0, 0], sizes = [8, 255], strides = [1, 1]} : vector<8x256xf32> to vector<8x255xf32>
    %886 = tpu.concatenate %884, %885 in 1 : vector<8x1xf32>, vector<8x255xf32> -> vector<8x256xf32>
    %887 = arith.select %10, %549, %886 : vector<8x256xi1>, vector<8x256xf32>
    %888 = arith.subf %883, %887 : vector<8x256xf32>
    %889 = vector.extract_strided_slice %301 {offsets = [0, 1], sizes = [8, 255], strides = [1, 1]} : vector<8x256xf32> to vector<8x255xf32>
    %890 = vector.extract_strided_slice %301 {offsets = [0, 0], sizes = [8, 1], strides = [1, 1]} : vector<8x256xf32> to vector<8x1xf32>
    %891 = tpu.concatenate %889, %890 in 1 : vector<8x255xf32>, vector<8x1xf32> -> vector<8x256xf32>
    %892 = arith.select %15, %301, %891 : vector<8x256xi1>, vector<8x256xf32>
    %893 = arith.subf %888, %892 : vector<8x256xf32>
    %894 = vector.extract_strided_slice %301 {offsets = [0, 255], sizes = [8, 1], strides = [1, 1]} : vector<8x256xf32> to vector<8x1xf32>
    %895 = vector.extract_strided_slice %301 {offsets = [0, 0], sizes = [8, 255], strides = [1, 1]} : vector<8x256xf32> to vector<8x255xf32>
    %896 = tpu.concatenate %894, %895 in 1 : vector<8x1xf32>, vector<8x255xf32> -> vector<8x256xf32>
    %897 = arith.select %10, %301, %896 : vector<8x256xi1>, vector<8x256xf32>
    %898 = arith.addf %893, %897 : vector<8x256xf32>
    %cst_147 = arith.constant 2.500000e-01 : f32
    %899 = vector.broadcast %cst_147 : f32 to vector<8x256xf32>
    %900 = arith.mulf %899, %898 : vector<8x256xf32>
    %cst_148 = arith.constant 1.91519458E-8 : f32
    %901 = vector.broadcast %cst_148 : f32 to vector<8x256xf32>
    %902 = arith.addf %829, %901 : vector<8x256xf32>
    %cst_149 = arith.constant 6.221088E-8 : f32
    %903 = vector.broadcast %cst_149 : f32 to vector<8x256xf32>
    %904 = arith.addf %858, %903 : vector<8x256xf32>
    %cst_150 = arith.constant 4.37727756E-8 : f32
    %905 = vector.broadcast %cst_150 : f32 to vector<8x256xf32>
    %906 = arith.addf %900, %905 : vector<8x256xf32>
    %cst_151 = arith.constant 7.85358623E-8 : f32
    %907 = vector.broadcast %cst_151 : f32 to vector<8x256xf32>
    %908 = arith.addf %858, %907 : vector<8x256xf32>
    %cst_152 = arith.constant 7.79975835E-8 : f32
    %909 = vector.broadcast %cst_152 : f32 to vector<8x256xf32>
    %910 = arith.addf %833, %909 : vector<8x256xf32>
    %cst_153 = arith.constant 2.72592615E-8 : f32
    %911 = vector.broadcast %cst_153 : f32 to vector<8x256xf32>
    %912 = arith.addf %879, %911 : vector<8x256xf32>
    %cst_154 = arith.constant 2.76464256E-8 : f32
    %913 = vector.broadcast %cst_154 : f32 to vector<8x256xf32>
    %914 = arith.addf %900, %913 : vector<8x256xf32>
    %cst_155 = arith.constant 8.01872204E-8 : f32
    %915 = vector.broadcast %cst_155 : f32 to vector<8x256xf32>
    %916 = arith.addf %879, %915 : vector<8x256xf32>
    %cst_156 = arith.constant 9.58139381E-8 : f32
    %917 = vector.broadcast %cst_156 : f32 to vector<8x256xf32>
    %918 = arith.addf %837, %917 : vector<8x256xf32>
    %919 = arith.mulf %910, %918 : vector<8x256xf32>
    %920 = arith.mulf %912, %916 : vector<8x256xf32>
    %921 = arith.subf %919, %920 : vector<8x256xf32>
    %922 = arith.mulf %908, %918 : vector<8x256xf32>
    %923 = arith.mulf %912, %914 : vector<8x256xf32>
    %924 = arith.subf %922, %923 : vector<8x256xf32>
    %925 = arith.mulf %908, %916 : vector<8x256xf32>
    %926 = arith.mulf %910, %914 : vector<8x256xf32>
    %927 = arith.subf %925, %926 : vector<8x256xf32>
    %928 = arith.mulf %902, %921 : vector<8x256xf32>
    %929 = arith.mulf %904, %924 : vector<8x256xf32>
    %930 = arith.subf %928, %929 : vector<8x256xf32>
    %931 = arith.mulf %906, %927 : vector<8x256xf32>
    %932 = arith.addf %930, %931 : vector<8x256xf32>
    %cst_157 = arith.constant 0.000000e+00 : f32
    %933 = vector.broadcast %cst_157 : f32 to vector<8x256xf32>
    %934 = arith.cmpf oeq, %932, %933 : vector<8x256xf32>
    %cst_158 = arith.constant 1.000000e+00 : f32
    %935 = vector.broadcast %cst_158 : f32 to vector<8x256xf32>
    %936 = arith.select %934, %935, %932 : vector<8x256xi1>, vector<8x256xf32>
    %cst_159 = arith.constant 1.000000e+00 : f32
    %937 = vector.broadcast %cst_159 : f32 to vector<8x256xf32>
    %938 = arith.divf %937, %936 : vector<8x256xf32>
    %939 = arith.mulf %819, %921 : vector<8x256xf32>
    %940 = arith.mulf %822, %918 : vector<8x256xf32>
    %941 = arith.mulf %912, %825 : vector<8x256xf32>
    %942 = arith.subf %940, %941 : vector<8x256xf32>
    %943 = arith.mulf %904, %942 : vector<8x256xf32>
    %944 = arith.subf %939, %943 : vector<8x256xf32>
    %945 = arith.mulf %822, %916 : vector<8x256xf32>
    %946 = arith.mulf %910, %825 : vector<8x256xf32>
    %947 = arith.subf %945, %946 : vector<8x256xf32>
    %948 = arith.mulf %906, %947 : vector<8x256xf32>
    %949 = arith.addf %944, %948 : vector<8x256xf32>
    %950 = arith.mulf %949, %938 : vector<8x256xf32>
    %951 = arith.mulf %822, %918 : vector<8x256xf32>
    %952 = arith.mulf %912, %825 : vector<8x256xf32>
    %953 = arith.subf %951, %952 : vector<8x256xf32>
    %954 = arith.mulf %902, %953 : vector<8x256xf32>
    %955 = arith.mulf %819, %924 : vector<8x256xf32>
    %956 = arith.subf %954, %955 : vector<8x256xf32>
    %957 = arith.mulf %908, %825 : vector<8x256xf32>
    %958 = arith.mulf %822, %914 : vector<8x256xf32>
    %959 = arith.subf %957, %958 : vector<8x256xf32>
    %960 = arith.mulf %906, %959 : vector<8x256xf32>
    %961 = arith.addf %956, %960 : vector<8x256xf32>
    %962 = arith.mulf %961, %938 : vector<8x256xf32>
    %963 = arith.mulf %910, %825 : vector<8x256xf32>
    %964 = arith.mulf %822, %916 : vector<8x256xf32>
    %965 = arith.subf %963, %964 : vector<8x256xf32>
    %966 = arith.mulf %902, %965 : vector<8x256xf32>
    %967 = arith.mulf %908, %825 : vector<8x256xf32>
    %968 = arith.mulf %822, %914 : vector<8x256xf32>
    %969 = arith.subf %967, %968 : vector<8x256xf32>
    %970 = arith.mulf %904, %969 : vector<8x256xf32>
    %971 = arith.subf %966, %970 : vector<8x256xf32>
    %972 = arith.mulf %819, %927 : vector<8x256xf32>
    %973 = arith.addf %971, %972 : vector<8x256xf32>
    %974 = arith.mulf %973, %938 : vector<8x256xf32>
    %cst_160 = arith.constant 0.000000e+00 : f32
    %975 = vector.broadcast %cst_160 : f32 to vector<8x256xf32>
    %976 = arith.select %800, %950, %975 : vector<8x256xi1>, vector<8x256xf32>
    %977 = arith.select %800, %962, %975 : vector<8x256xi1>, vector<8x256xf32>
    %978 = arith.select %800, %974, %975 : vector<8x256xi1>, vector<8x256xf32>
    %cst_161 = arith.constant 0.000000e+00 : f32
    %979 = vector.broadcast %cst_161 : f32 to vector<8x256xf32>
    %980 = arith.subf %979, %976 : vector<8x256xf32>
    %cst_162 = arith.constant 0.000000e+00 : f32
    %981 = vector.broadcast %cst_162 : f32 to vector<8x256xf32>
    %982 = arith.subf %981, %977 : vector<8x256xf32>
    %cst_163 = arith.constant 0.000000e+00 : f32
    %983 = vector.broadcast %cst_163 : f32 to vector<8x256xf32>
    %984 = arith.subf %983, %978 : vector<8x256xf32>
    %985 = math.absf %980 : vector<8x256xf32>
    %986 = math.absf %982 : vector<8x256xf32>
    %987 = arith.maximumf %985, %986 : vector<8x256xf32>
    %988 = math.absf %984 : vector<8x256xf32>
    %989 = arith.maximumf %987, %988 : vector<8x256xf32>
    %cst_164 = arith.constant 0.699999988 : f32
    %990 = vector.broadcast %cst_164 : f32 to vector<8x256xf32>
    %991 = arith.cmpf ogt, %989, %990 : vector<8x256xf32>
    %992 = arith.select %991, %975, %980 : vector<8x256xi1>, vector<8x256xf32>
    %993 = arith.select %991, %975, %982 : vector<8x256xi1>, vector<8x256xf32>
    %994 = arith.select %991, %975, %984 : vector<8x256xi1>, vector<8x256xf32>
    %995 = arith.mulf %819, %992 : vector<8x256xf32>
    %996 = arith.mulf %822, %993 : vector<8x256xf32>
    %997 = arith.addf %995, %996 : vector<8x256xf32>
    %998 = arith.mulf %825, %994 : vector<8x256xf32>
    %999 = arith.addf %997, %998 : vector<8x256xf32>
    %cst_165 = arith.constant 5.000000e-01 : f32
    %1000 = vector.broadcast %cst_165 : f32 to vector<8x256xf32>
    %1001 = arith.mulf %1000, %999 : vector<8x256xf32>
    %1002 = arith.addf %549, %1001 : vector<8x256xf32>
    %1003 = arith.extui %800 : vector<8x256xi1> to vector<8x256xi32>
    %1004 = arith.sitofp %1003 : vector<8x256xi32> to vector<8x256xf32>
    %cst_166 = arith.constant 1.000000e+01 : f32
    %1005 = vector.broadcast %cst_166 : f32 to vector<8x256xf32>
    %1006 = arith.mulf %1005, %1004 : vector<8x256xf32>
    %1007 = arith.addf %1002, %1006 : vector<8x256xf32>
    %c0_167 = arith.constant 0 : index
    %c768_168 = arith.constant 768 : index
    %1008 = vector.load %arg3[%c0_167, %c768_168] : memref<8x1024xf32, #tpu.memory_space<vmem>>, vector<8x256xf32>
    tpu.vector_store %arg3[%c0_167, %c768_168], %1007 {strides = array<i32>} : memref<8x1024xf32, #tpu.memory_space<vmem>>, vector<8x256xf32>,
    %cst_169 = arith.constant 3.000000e+00 : f32
    %1009 = vector.broadcast %cst_169 : f32 to vector<8x256xf32>
    %1010 = arith.addf %994, %1009 : vector<8x256xf32>
    %c0_170 = arith.constant 0 : index
    %c768_171 = arith.constant 768 : index
    %1011 = vector.load %arg4[%c0_170, %c768_171] : memref<8x3072xf32, #tpu.memory_space<vmem>>, vector<8x256xf32>
    tpu.vector_store %arg4[%c0_170, %c768_171], %1010 {strides = array<i32>} : memref<8x3072xf32, #tpu.memory_space<vmem>>, vector<8x256xf32>,
    %1012 = arith.addf %2, %993 : vector<8x256xf32>
    %c0_172 = arith.constant 0 : index
    %c1792 = arith.constant 1792 : index
    %1013 = vector.load %arg4[%c0_172, %c1792] : memref<8x3072xf32, #tpu.memory_space<vmem>>, vector<8x256xf32>
    tpu.vector_store %arg4[%c0_172, %c1792], %1012 {strides = array<i32>} : memref<8x3072xf32, #tpu.memory_space<vmem>>, vector<8x256xf32>,
    %1014 = arith.addf %5, %992 : vector<8x256xf32>
    %c0_173 = arith.constant 0 : index
    %c2816 = arith.constant 2816 : index
    %1015 = vector.load %arg4[%c0_173, %c2816] : memref<8x3072xf32, #tpu.memory_space<vmem>>, vector<8x256xf32>
    tpu.vector_store %arg4[%c0_173, %c2816], %1014 {strides = array<i32>} : memref<8x3072xf32, #tpu.memory_space<vmem>>, vector<8x256xf32>,
    return
  }
  func.func @transform_0(%arg0: i32) -> (i32, i32) {
    %c0_i32 = arith.constant 0 : i32
    %c0_i32_0 = arith.constant 0 : i32
    %c0_i32_1 = arith.constant 0 : i32
    return %c0_i32, %c0_i32_0 : i32, i32
  }
  func.func @transform_1(%arg0: i32) -> (i32, i32) {
    %c0_i32 = arith.constant 0 : i32
    %c0_i32_0 = arith.constant 0 : i32
    return %arg0, %c0_i32 : i32, i32
  }
  func.func @transform_2(%arg0: i32) -> (i32, i32) {
    %c0_i32 = arith.constant 0 : i32
    %c0_i32_0 = arith.constant 0 : i32
    return %arg0, %c0_i32 : i32, i32
  }
  func.func @transform_3(%arg0: i32) -> (i32, i32) {
    %c0_i32 = arith.constant 0 : i32
    %c0_i32_0 = arith.constant 0 : i32
    return %arg0, %c0_i32 : i32, i32
  }
}

</mosaic_0001>

<bundles_post_ra>
// kernel: tpu_custom_call.1
= control target key start
LH: loop header
LB: loop body
LE: loop exit
PB: predicated region body
PF: predicated region fallthrough
CT: control target
= control target key end

     0   :  { %9 = vsyncpa [#allocation3], 0  ;;  %s3974_s0 = inlined_call_operand.hbm [shape: f32[8,256], index: 0, kind: input, shape index: {}]   ;;  %s3975_s1 = inlined_call_operand.hbm [shape: f32[8,1024], index: 1, kind: input, shape index: {}]   ;;  %s3976_s2 = inlined_call_operand.hbm [shape: f32[8,1024], index: 2, kind: output, shape index: {0}]   ;;  %s3977_s3 = inlined_call_operand.hbm [shape: f32[8,3072], index: 3, kind: output, shape index: {1}]  }
   0x1   :  { %10 = vsyncpa [#allocation6], 0 }
   0x2   :  { %11 = vsyncpa [#allocation4], 0 }
   0x3   :  { %12 = vsyncpa [#allocation9], 0  ;;  %s1747_s12 = smov [#allocation2]   ;;  %s1748_s14 = smov [#allocation5]  }
   0x4   :  { %s19_s13 = sshll.u32 %s1747_s12, 4  ;;  %s29_s15 = sshll.u32 %s1748_s14, 4  ;;  %s20_s13 = int_to_ptr.vmem [resolvable:$true] %s19_s13  ;;  %s30_s15 = int_to_ptr.vmem [resolvable:$true] %s29_s15 }
   0x5   :  { %s1651_s18 = scalar_lea.hbm %s3974_s0, 256 }
   0x6   :  { %p1652_p0 = scmp.ne.s32.totalorder %s3974_s0, %s1651_s18  ;;  %p1655_p1 = scmp.lt.u32.totalorder %s1651_s18, %s3974_s0 }
   0x8   :  { %p1657_p2 = pnand %p1655_p1, %p1652_p0 }
   0xa   :  { %1660 = shalt.err (!%p1657_p2)
}
   0xb   :  { %s1661_s23 = scalar_lea.vmem %s20_s13, 256  ;;  %p1666_p4 = scmp.lt.s32.totalorder %s20_s13, %s20_s13 }
   0xc   :  { %p1662_p3 = scmp.ne.s32.totalorder %s20_s13, %s1661_s23  ;;  %p1667_p5 = scmp.lt.s32.totalorder %s1661_s23, %s1661_s23 }
   0xe   :  { %p1668_p6 = por %p1667_p5, %p1666_p4 }
  0x10   :  { %p1669_p7 = pnand %p1668_p6, %p1662_p3 }
  0x12   :  { %1672 = shalt.err (!%p1669_p7)
}
  0x13   :  { %22 = dma.hbm_to_vmem [thread:$0]  %s3974_s0, 256, %s20_s13, [#allocation3]  }
  0x14   :  { %s1673_s28 = scalar_lea.hbm %s3975_s1, 1024 }
  0x15   :  { %p1674_p8 = scmp.ne.s32.totalorder %s3975_s1, %s1673_s28  ;;  %p1677_p9 = scmp.lt.u32.totalorder %s1673_s28, %s3975_s1 }
  0x17   :  { %p1679_p10 = pnand %p1677_p9, %p1674_p8 }
  0x19   :  { %1682 = shalt.err (!%p1679_p10)
}
  0x1a   :  { %s1683_s6 = scalar_lea.vmem %s30_s15, 1024  ;;  %p1688_p12 = scmp.lt.s32.totalorder %s30_s15, %s30_s15 }
  0x1b   :  { %p1684_p11 = scmp.ne.s32.totalorder %s30_s15, %s1683_s6  ;;  %p1689_p13 = scmp.lt.s32.totalorder %s1683_s6, %s1683_s6 }
  0x1d   :  { %p1690_p0 = por %p1689_p13, %p1688_p12 }
  0x1f   :  { %p1691_p1 = pnand %p1690_p0, %p1684_p11 }
  0x21   :  { %1694 = shalt.err (!%p1691_p1)
}
  0x22   :  { %32 = dma.hbm_to_vmem [thread:$0]  %s3975_s1, 1024, %s30_s15, [#allocation6]  }
  0x23   :  { %1739 = dma.done.wait [#allocation3], 256  }
  0x24   :  { %1740 = vsyncadd [#allocation3], 4294967040 }
  0x25   :  { %1741 = dma.done.wait [#allocation6], 1024  }
  0x26   :  { %1742 = vsyncadd [#allocation6], 4294966272  ;;  %v1800_v0 = vld [vmem:[#allocation5 + $0x8] sm:$0xff]  ;;  %v1802_v1 = vld [vmem:[#allocation5] sm:$0xff]  ;;  %s1749_s8 = smov 1   ;;  %s1750_s9 = smov 127   ;;  %v41_v8 = vlaneseq }
  0x27   :  { %140 = vrot.lane.b32.xlu1 %v1800_v0, %s1749_s8  ;;  %128 = vrot.lane.b32.xlu0 %v1802_v1, %s1750_s9  ;;  %v1808_v2 = vld [vmem:[#allocation5 + $0x18] sm:$0xff]  ;;  %v1810_v3 = vld [vmem:[#allocation5 + $0x10] sm:$0xff]  ;;  %v1816_v4 = vld [vmem:[#allocation5 + $0x28] sm:$0xff]  ;;  %s1751_s1 = smov 112   ;;  %s1752_s10 = smov 16   ;;  %vm132_vm0 = vcmask 1039360  }
  0x28   :  { %v1818_v5 = vld [vmem:[#allocation5 + $0x20] sm:$0xff]  ;;  %v1824_v6 = vld [vmem:[#allocation5 + $0x38] sm:$0xff]  ;;  %v1826_v7 = vld [vmem:[#allocation5 + $0x30] sm:$0xff]  ;;  %v42_v9 = vshrl.u32 %v41_v8, 7  ;;  %vm145_vm3 = vcmask 7168   ;;  %vm162_vm6 = vcmask 916480  }
  0x29   :  { %v80_v12 = vld [vmem:[#allocation2 + $0x3] ss:$8 sm:$0x3]  ;;  %v65_v17 = vld [vmem:[#allocation2 + $0x2] ss:$8 sm:$0x3] }
  0x2a   :  { %v1864_v10 = vsub.s32 0, %v42_v9  ;;  %v1866_v11 = vsub.s32 1, %v42_v9  ;;  %vm175_vm9 = vcmask 130048   ;;  %s1754_s11 = smov [#allocation8]  }
  0x2b   :  { %143 = vrot.lane.b32.xlu1 %v1802_v1, %s1749_s8  ;;  %130 = vrot.lane.b32.xlu0 %v1800_v0, %s1750_s9  ;;  %s1596_s12 = sshll.u32 %s1754_s11, 4  ;;  %s1597_s12 = int_to_ptr.vmem [resolvable:$true] %s1596_s12 }
  0x2c   :  { %4193 = vst [vmem:[#allocation14_spill] sm:$0xff] %v1864_v10  ;;  %4194 = vst [vmem:[#allocation15_spill] sm:$0xff] %v1866_v11  ;;  %v85_v15 = vrot.slane %v80_v12, %v1864_v10  ;;  %v89_v16 = vrot.slane %v80_v12, %v1866_v11  ;;  %v74_v19 = vrot.slane %v65_v17, %v1866_v11  ;;  %s1695_s13 = scalar_lea.vmem %s1597_s12, 3072  ;;  %p1700_p3 = scmp.lt.s32.totalorder %s1597_s12, %s1597_s12 }
  0x2d   :  { %v70_v23 = vrot.slane %v65_v17, %v1864_v10  ;;  %p1696_p2 = scmp.ne.s32.totalorder %s1597_s12, %s1695_s13  ;;  %p1701_p4 = scmp.lt.s32.totalorder %s1695_s13, %s1695_s13 }
  0x2e   :  { %vm1871_vm1 = vcmp.gt.f32.partialorder %v85_v15, 0.5  ;;  %vm1875_vm2 = vcmp.gt.f32.partialorder %v89_v16, 0.5  ;;  %vm1898_vm4 = vcmp.gt.f32.partialorder %v74_v19, 0.5 }
  0x2f   :  { %194 = vrot.lane.b32.xlu1 %v1808_v2, %s1750_s9  ;;  %192 = vrot.lane.b32.xlu0 %v1810_v3, %s1750_s9  ;;  %vm1907_vm5 = vcmp.gt.f32.partialorder %v70_v23, 0.5  ;;  %p1702_p5 = por %p1701_p4, %p1700_p3 }
  0x31   :  { %p1703_p6 = pnand %p1702_p5, %p1696_p2 }
  0x33   :  { %206 = vrot.lane.b32.xlu1 %v1810_v3, %s1749_s8  ;;  %203 = vrot.lane.b32.xlu0 %v1808_v2, %s1749_s8 }
  0x37   :  { %586 = vrot.lane.b32.xlu1 %v1816_v4, %s1750_s9  ;;  %584 = vrot.lane.b32.xlu0 %v1818_v5, %s1750_s9 }
  0x3b   :  { %598 = vrot.lane.b32.xlu1 %v1818_v5, %s1749_s8  ;;  %595 = vrot.lane.b32.xlu0 %v1816_v4, %s1749_s8 }
  0x3f   :  { %950 = vrot.lane.b32.xlu1 %v1824_v6, %s1750_s9  ;;  %948 = vrot.lane.b32.xlu0 %v1826_v7, %s1750_s9 }
  0x43   :  { %962 = vrot.lane.b32.xlu1 %v1826_v7, %s1749_s8  ;;  %959 = vrot.lane.b32.xlu0 %v1824_v6, %s1749_s8 }
  0x47   :  { %362 = vrot.lane.b32.xlu1 %v1810_v3, %s1751_s1  ;;  %364 = vrot.lane.b32.xlu0 %v1808_v2, %s1751_s1 }
  0x4b   :  { %373 = vrot.lane.b32.xlu1 %v1808_v2, %s1752_s10  ;;  %376 = vrot.lane.b32.xlu0 %v1810_v3, %s1752_s10 }
  0x4f   :  { %726 = vrot.lane.b32.xlu1 %v1818_v5, %s1751_s1  ;;  %728 = vrot.lane.b32.xlu0 %v1816_v4, %s1751_s1 }
  0x53   :  { %737 = vrot.lane.b32.xlu1 %v1816_v4, %s1752_s10  ;;  %740 = vrot.lane.b32.xlu0 %v1818_v5, %s1752_s10 }
  0x57   :  { %1090 = vrot.lane.b32.xlu1 %v1826_v7, %s1751_s1  ;;  %1092 = vrot.lane.b32.xlu0 %v1824_v6, %s1751_s1 }
  0x5b   :  { %1101 = vrot.lane.b32.xlu1 %v1824_v6, %s1752_s10  ;;  %1104 = vrot.lane.b32.xlu0 %v1826_v7, %s1752_s10 }
  0x5f   :  { %258 = vrot.lane.b32.xlu1 %v1802_v1, %s1751_s1  ;;  %260 = vrot.lane.b32.xlu0 %v1800_v0, %s1751_s1 }
  0x63   :  { %269 = vrot.lane.b32.xlu1 %v1800_v0, %s1752_s10  ;;  %272 = vrot.lane.b32.xlu0 %v1802_v1, %s1752_s10 }
  0x99   :  { %v141_v13 = vpop.permute.xlu1 %140  ;;  %v129_v14 = vpop.permute.xlu0 %128 }
  0x9d   :  { %v144_v18 = vpop.permute.xlu1 %143  ;;  %v131_v20 = vpop.permute.xlu0 %130 }
  0x9e   :  { %v1881_v24 = vsel %vm132_vm0, %v129_v14, %v131_v20  ;;  %v1884_v25 = vsel %vm132_vm0, %v131_v20, %v129_v14  ;;  %v1903_v29 = vsel %vm145_vm3, %v144_v18, %v141_v13  ;;  %v1912_v33 = vsel %vm145_vm3, %v141_v13, %v144_v18  ;;  %v110_v13 = vld [vmem:[#allocation2 + $0x5] ss:$8 sm:$0x3]  ;;  %v95_v18 = vld [vmem:[#allocation2 + $0x4] ss:$8 sm:$0x3] }
  0x9f   :  { %v1890_v26 = vsel %vm1871_vm1, %v1802_v1, %v1881_v24  ;;  %v1896_v27 = vsel %vm1875_vm2, %v1800_v0, %v1884_v25  ;;  %v1921_v35 = vsel %vm1898_vm4, %v1800_v0, %v1903_v29  ;;  %v1930_v37 = vsel %vm1907_vm5, %v1802_v1, %v1912_v33 }
  0xa0   :  { %4199 = vst [vmem:[#allocation16_spill] sm:$0xff] %v1890_v26  ;;  %4200 = vst [vmem:[#allocation17_spill] sm:$0xff] %v1896_v27  ;;  %310 = vrot.lane.b32.xlu0 %v1896_v27, %s1751_s1  ;;  %308 = vrot.lane.b32.xlu1 %v1890_v26, %s1751_s1  ;;  %v115_v17 = vrot.slane %v110_v13, %v1864_v10 }
  0xa1   :  { %v195_v30 = vpop.permute.xlu1 %194  ;;  %v193_v31 = vpop.permute.xlu0 %192  ;;  %4205 = vst [vmem:[#allocation18_spill] sm:$0xff] %v1921_v35  ;;  %4206 = vst [vmem:[#allocation19_spill] sm:$0xff] %v1930_v37 }
  0xa2   :  { %v200_v34 = vsel %vm132_vm0, %v195_v30, %v193_v31  ;;  %v1924_v36 = vsel %vm132_vm0, %v193_v31, %v195_v30  ;;  %vm2052_vm7 = vcmp.gt.f32.partialorder %v115_v17, 0.5  ;;  %v4232_v17 = vmov 0 }
  0xa3   :  { %v202_v38 = vsel %vm1875_vm2, 0.0, %v200_v34  ;;  %v1939_v41 = vsel %vm1875_vm2, %v1808_v2, %v200_v34  ;;  %v1948_v43 = vsel %vm1871_vm1, %v1810_v3, %v1924_v36  ;;  %v119_v34 = vrot.slane %v110_v13, %v1866_v11 }
  0xa4   :  { %323 = vrot.lane.b32.xlu0 %v1921_v35, %s1751_s1  ;;  %4207 = vst [vmem:[#allocation20_spill] sm:$0xff] %v1939_v41  ;;  %321 = vrot.lane.b32.xlu1 %v1930_v37, %s1751_s1  ;;  %4208 = vst [vmem:[#allocation21_spill] sm:$0xff] %v1948_v43 }
  0xa5   :  { %v207_v39 = vpop.permute.xlu1 %206  ;;  %v204_v40 = vpop.permute.xlu0 %203  ;;  %vm2056_vm8 = vcmp.gt.f32.partialorder %v119_v34, 0.5 }
  0xa6   :  { %v208_v42 = vsel %vm145_vm3, %v207_v39, %v204_v40  ;;  %v1957_v48 = vsel %vm145_vm3, %v204_v40, %v207_v39 }
  0xa7   :  { %v213_v44 = vsel %vm1898_vm4, 0.0, %v208_v42  ;;  %v1966_v51 = vsel %vm1898_vm4, %v1808_v2, %v208_v42  ;;  %v1972_v52 = vsel %vm1907_vm5, %v1810_v3, %v1957_v48  ;;  %v212_v22 = vsel %vm1907_vm5, 0.0, %v1957_v48 }
  0xa8   :  { %v1952_v45 = vmax.f32 %v202_v38, %v213_v44  ;;  %674 = vrot.lane.b32.xlu0 %v1939_v41, %s1751_s1  ;;  %672 = vrot.lane.b32.xlu1 %v1948_v43, %s1751_s1  ;;  %4210 = vst [vmem:[#allocation23_spill] sm:$0xff] %v1966_v51  ;;  %4211 = vst [vmem:[#allocation24_spill] sm:$0xff] %v1972_v52 }
  0xa9   :  { %v587_v46 = vpop.permute.xlu1 %586  ;;  %v585_v47 = vpop.permute.xlu0 %584 }
  0xaa   :  { %4209 = vst [vmem:[#allocation22_spill] sm:$0xff] %v1952_v45  ;;  %v588_v49 = vsel %vm132_vm0, %v585_v47, %v587_v46  ;;  %v592_v50 = vsel %vm132_vm0, %v587_v46, %v585_v47  ;;  %v100_v47 = vrot.slane %v95_v18, %v1864_v10 }
  0xab   :  { %v593_v53 = vsel %vm1871_vm1, 0.0, %v588_v49  ;;  %v594_v54 = vsel %vm1875_vm2, 0.0, %v592_v50  ;;  %v1983_v57 = vsel %vm1875_vm2, %v1816_v4, %v592_v50  ;;  %v1992_v60 = vsel %vm1871_vm1, %v1818_v5, %v588_v49 }
  0xac   :  { %687 = vrot.lane.b32.xlu0 %v1966_v51, %s1751_s1  ;;  %4212 = vst [vmem:[#allocation25_spill] sm:$0xff] %v1983_v57  ;;  %685 = vrot.lane.b32.xlu1 %v1972_v52, %s1751_s1  ;;  %4213 = vst [vmem:[#allocation26_spill] sm:$0xff] %v1992_v60  ;;  %vm2070_vm10 = vcmp.gt.f32.partialorder %v100_v47, 0.5 }
  0xad   :  { %v599_v55 = vpop.permute.xlu1 %598  ;;  %v596_v56 = vpop.permute.xlu0 %595 }
  0xae   :  { %v600_v58 = vsel %vm145_vm3, %v599_v55, %v596_v56  ;;  %v603_v59 = vsel %vm145_vm3, %v596_v56, %v599_v55  ;;  %v4222_v56 = vmov 0 }
  0xaf   :  { %v604_v61 = vsel %vm1907_vm5, 0.0, %v603_v59  ;;  %v605_v62 = vsel %vm1898_vm4, 0.0, %v600_v58  ;;  %v2011_v16 = vsel %vm1898_vm4, %v1816_v4, %v600_v58  ;;  %v2017_v19 = vsel %vm1907_vm5, %v1818_v5, %v603_v59 }
  0xb0   :  { %v1998_v63 = vmax.f32 %v593_v53, %v604_v61  ;;  %v2000_v8 = vmax.f32 %v594_v54, %v605_v62  ;;  %1038 = vrot.lane.b32.xlu0 %v1983_v57, %s1751_s1  ;;  %1036 = vrot.lane.b32.xlu1 %v1992_v60, %s1751_s1  ;;  %4216 = vst [vmem:[#allocation29_spill] sm:$0xff] %v2011_v16  ;;  %4217 = vst [vmem:[#allocation30_spill] sm:$0xff] %v2017_v19  ;;  %v4223_v56 = vsel %vm2052_vm7, 4294967295, %v4222_v56  ;;  %v4225_v58 = vmov 0 }
  0xb1   :  { %v951_v9 = vpop.permute.xlu1 %950  ;;  %v949_v12 = vpop.permute.xlu0 %948  ;;  %v104_v53 = vrot.slane %v95_v18, %v1866_v11  ;;  %4224 = vst [vmem:[#allocation35_spill] sm:$0xff] %v4223_v56  ;;  %v4226_v58 = vsel %vm2056_vm8, 4294967295, %v4225_v58  ;;  %v2063_v59 = vmul.f32 2.0, %v1810_v3  ;;  %v2066_v61 = vmul.f32 2.0, %v1808_v2 }
  0xb2   :  { %4214 = vst [vmem:[#allocation27_spill] sm:$0xff] %v1998_v63  ;;  %4215 = vst [vmem:[#allocation28_spill] sm:$0xff] %v2000_v8  ;;  %v952_v14 = vsel %vm132_vm0, %v949_v12, %v951_v9  ;;  %v956_v15 = vsel %vm132_vm0, %v951_v9, %v949_v12  ;;  %v4228_v12 = vmov 0 }
  0xb3   :  { %v957_v20 = vsel %vm1871_vm1, 0.0, %v952_v14  ;;  %v958_v23 = vsel %vm1875_vm2, 0.0, %v956_v15  ;;  %v2029_v38 = vsel %vm1875_vm2, %v1824_v6, %v956_v15  ;;  %v2038_v42 = vsel %vm1871_vm1, %v1826_v7, %v952_v14  ;;  %4227 = vst [vmem:[#allocation36_spill] sm:$0xff] %v4226_v58 }
  0xb4   :  { %1051 = vrot.lane.b32.xlu0 %v2011_v16, %s1751_s1  ;;  %4218 = vst [vmem:[#allocation31_spill] sm:$0xff] %v2029_v38  ;;  %1049 = vrot.lane.b32.xlu1 %v2017_v19, %s1751_s1  ;;  %4219 = vst [vmem:[#allocation32_spill] sm:$0xff] %v2038_v42  ;;  %v4229_v12 = vsel %vm2070_vm10, 4294967295, %v4228_v12  ;;  %vm2089_vm11 = vcmp.gt.f32.partialorder %v104_v53, 0.5 }
  0xb5   :  { %v963_v30 = vpop.permute.xlu1 %962  ;;  %v960_v31 = vpop.permute.xlu0 %959  ;;  %4230 = vst [vmem:[#allocation37_spill] sm:$0xff] %v4229_v12  ;;  %v4233_v17 = vsel %vm2089_vm11, 4294967295, %v4232_v17  ;;  %v2424_v12 = vmax.f32 %v1808_v2, %v1952_v45 }
  0xb6   :  { %v964_v39 = vsel %vm145_vm3, %v963_v30, %v960_v31  ;;  %v967_v40 = vsel %vm145_vm3, %v960_v31, %v963_v30  ;;  %4234 = vst [vmem:[#allocation39_spill] sm:$0xff] %v4233_v17 }
  0xb7   :  { %v968_v44 = vsel %vm1907_vm5, 0.0, %v967_v40  ;;  %v969_v46 = vsel %vm1898_vm4, 0.0, %v964_v39  ;;  %v2077_v13 = vsel %vm1898_vm4, %v1824_v6, %v964_v39  ;;  %v2096_v18 = vsel %vm1907_vm5, %v1826_v7, %v967_v40  ;;  %4281 = vst [vmem:[#allocation86_spill] sm:$0xff] %v2424_v12 }
  0xb8   :  { %v2045_v49 = vmax.f32 %v957_v20, %v968_v44  ;;  %v2047_v50 = vmax.f32 %v958_v23, %v969_v46  ;;  %1340 = vrot.lane.b32.xlu0 %v2029_v38, %s1751_s1  ;;  %1338 = vrot.lane.b32.xlu1 %v2038_v42, %s1751_s1  ;;  %4231 = vst [vmem:[#allocation38_spill] sm:$0xff] %v2077_v13  ;;  %4235 = vst [vmem:[#allocation40_spill] sm:$0xff] %v2096_v18 }
  0xb9   :  { %v363_v54 = vpop.permute.xlu1 %362  ;;  %v365_v55 = vpop.permute.xlu0 %364 }
  0xba   :  { %4220 = vst [vmem:[#allocation33_spill] sm:$0xff] %v2045_v49  ;;  %4221 = vst [vmem:[#allocation34_spill] sm:$0xff] %v2047_v50  ;;  %v366_v62 = vsel %vm162_vm6, %v363_v54, %v365_v55  ;;  %v370_v9 = vsel %vm162_vm6, %v365_v55, %v363_v54 }
  0xbb   :  { %v2082_v14 = vsel %vm2052_vm7, %v1810_v3, %v366_v62  ;;  %v2087_v15 = vsel %vm2056_vm8, %v1808_v2, %v370_v9 }
  0xbc   :  { %v662_v20 = vsub.f32 %v2082_v14, %v2063_v59  ;;  %v663_v23 = vsub.f32 %v2087_v15, %v2066_v61  ;;  %1353 = vrot.lane.b32.xlu0 %v2077_v13, %s1751_s1  ;;  %1351 = vrot.lane.b32.xlu1 %v2096_v18, %s1751_s1 }
  0xbd   :  { %v374_v30 = vpop.permute.xlu1 %373  ;;  %v377_v31 = vpop.permute.xlu0 %376 }
  0xbe   :  { %v378_v34 = vsel %vm175_vm9, %v377_v31, %v374_v30  ;;  %v381_v39 = vsel %vm175_vm9, %v374_v30, %v377_v31  ;;  %v2139_v31 = vmul.f32 2.0, %v1818_v5 }
  0xbf   :  { %v2111_v40 = vsel %vm2070_vm10, %v1810_v3, %v381_v39  ;;  %v2116_v44 = vsel %vm2089_vm11, %v1808_v2, %v378_v34 }
  0xc0   :  { %v2120_v46 = vsub.f32 %v2082_v14, %v2111_v40  ;;  %v2124_v47 = vsub.f32 %v2087_v15, %v2116_v44  ;;  %v2127_v53 = vadd.f32 %v662_v20, %v2111_v40  ;;  %v2130_v54 = vadd.f32 %v663_v23, %v2116_v44  ;;  %337 = vrot.lane.b32.xlu0 %v1890_v26, %s1752_s10 }
  0xc1   :  { %v727_v55 = vpop.permute.xlu1 %726  ;;  %v729_v62 = vpop.permute.xlu0 %728  ;;  %334 = vrot.lane.b32.xlu1 %v1896_v27, %s1752_s10  ;;  %v2142_v20 = vmul.f32 2.0, %v1816_v4 }
  0xc2   :  { %4236 = vst [vmem:[#allocation41_spill] sm:$0xff] %v2120_v46  ;;  %4237 = vst [vmem:[#allocation42_spill] sm:$0xff] %v2124_v47  ;;  %v730_v9 = vsel %vm162_vm6, %v727_v55, %v729_v62  ;;  %v734_v30 = vsel %vm162_vm6, %v729_v62, %v727_v55  ;;  %v2157_v62 = vmul.f32 2.0, %v1826_v7 }
  0xc3   :  { %4238 = vst [vmem:[#allocation43_spill] sm:$0xff] %v2130_v54  ;;  %4239 = vst [vmem:[#allocation44_spill] sm:$0xff] %v2142_v20  ;;  %v2147_v23 = vsel %vm2052_vm7, %v1818_v5, %v730_v9  ;;  %v2152_v34 = vsel %vm2056_vm8, %v1816_v4, %v734_v30 }
  0xc4   :  { %701 = vrot.lane.b32.xlu0 %v1948_v43, %s1752_s10  ;;  %4240 = vst [vmem:[#allocation45_spill] sm:$0xff] %v2157_v62  ;;  %v1026_v11 = vsub.f32 %v2147_v23, %v2139_v31  ;;  %v1027_v9 = vsub.f32 %v2152_v34, %v2142_v20  ;;  %v2174_v43 = vmul.f32 2.0, %v1824_v6  ;;  %v1332_v50 = vsub.f32 %v1826_v7, %v2157_v62 }
  0xc5   :  { %v738_v39 = vpop.permute.xlu1 %737  ;;  %v741_v55 = vpop.permute.xlu0 %740  ;;  %698 = vrot.lane.b32.xlu1 %v1939_v41, %s1752_s10 }
  0xc6   :  { %v742_v30 = vsel %vm175_vm9, %v741_v55, %v738_v39  ;;  %v745_v10 = vsel %vm175_vm9, %v738_v39, %v741_v55  ;;  %4241 = vst [vmem:[#allocation46_spill] sm:$0xff] %v2174_v43 }
  0xc7   :  { %v746_v27 = vsel %vm2070_vm10, %v1818_v5, %v745_v10  ;;  %v747_v26 = vsel %vm2089_vm11, %v1816_v4, %v742_v30  ;;  %v1333_v30 = vsub.f32 %v1824_v6, %v2174_v43 }
  0xc8   :  { %v2179_v41 = vsub.f32 %v2147_v23, %v746_v27  ;;  %v2182_v49 = vsub.f32 %v2152_v34, %v747_v26  ;;  %v2184_v39 = vadd.f32 %v1026_v11, %v746_v27  ;;  %v2186_v55 = vadd.f32 %v1027_v9, %v747_v26  ;;  %1065 = vrot.lane.b32.xlu0 %v1992_v60, %s1752_s10 }
  0xc9   :  { %v1091_v10 = vpop.permute.xlu1 %1090  ;;  %v1093_v63 = vpop.permute.xlu0 %1092  ;;  %1062 = vrot.lane.b32.xlu1 %v1983_v57, %s1752_s10  ;;  %v1318_v11 = vsub.f32 %v1826_v7, %v1818_v5  ;;  %v150_v9 = vsel %vm1907_vm5, 0.0, %v1912_v33  ;;  %v138_v60 = vsel %vm1871_vm1, 0.0, %v1881_v24  ;;  %v1334_v57 = vadd.f32 %v1332_v50, %v1818_v5 }
  0xca   :  { %4242 = vst [vmem:[#allocation47_spill] sm:$0xff] %v2184_v39  ;;  %4243 = vst [vmem:[#allocation48_spill] sm:$0xff] %v2186_v55  ;;  %v1094_v8 = vsel %vm162_vm6, %v1091_v10, %v1093_v63  ;;  %v1098_v47 = vsel %vm162_vm6, %v1093_v63, %v1091_v10  ;;  %v1319_v55 = vsub.f32 %v1824_v6, %v1816_v4  ;;  %v151_v63 = vsel %vm1898_vm4, 0.0, %v1903_v29 }
  0xcb   :  { %v1099_v10 = vsel %vm2052_vm7, %v1826_v7, %v1094_v8  ;;  %v1100_v33 = vsel %vm2056_vm8, %v1824_v6, %v1098_v47  ;;  %v1335_v39 = vadd.f32 %v1333_v30, %v1816_v4  ;;  %v139_v47 = vsel %vm1875_vm2, 0.0, %v1884_v25 }
  0xcc   :  { %1367 = vrot.lane.b32.xlu0 %v2038_v42, %s1752_s10  ;;  %v1328_v50 = vsub.f32 %v1099_v10, %v2157_v62  ;;  %v1329_v28 = vsub.f32 %v1100_v33, %v2174_v43  ;;  %v2228_v42 = vmax.f32 %v138_v60, %v150_v9  ;;  %v2242_v25 = vmul.f32 0.5, %v1318_v11 }
  0xcd   :  { %v1102_v24 = vpop.permute.xlu1 %1101  ;;  %v1105_v46 = vpop.permute.xlu0 %1104  ;;  %1364 = vrot.lane.b32.xlu1 %v2029_v38, %s1752_s10  ;;  %v2244_v60 = vmul.f32 0.5, %v1319_v55  ;;  %v2248_v9 = vadd.f32 9.581394e-08, %v1334_v57  ;;  %v2256_v32 = vmax.f32 %v139_v47, %v151_v63  ;;  %v2272_v11 = vmul.f32 0.5, %v2182_v49 }
  0xce   :  { %v1106_v29 = vsel %vm175_vm9, %v1105_v46, %v1102_v24  ;;  %v1109_v8 = vsel %vm175_vm9, %v1102_v24, %v1105_v46  ;;  %4244 = vst [vmem:[#allocation49_spill] sm:$0xff] %v2228_v42  ;;  %v201_v46 = vsel %vm1871_vm1, 0.0, %v1924_v36  ;;  %4245 = vst [vmem:[#allocation50_spill] sm:$0xff] %v2242_v25  ;;  %v2262_v55 = vmax.f32 %v1802_v1, %v2228_v42 }
  0xcf   :  { %v1110_v30 = vsel %vm2070_vm10, %v1826_v7, %v1109_v8  ;;  %v1111_v43 = vsel %vm2089_vm11, %v1824_v6, %v1106_v29  ;;  %4246 = vst [vmem:[#allocation51_spill] sm:$0xff] %v2244_v60  ;;  %4247 = vst [vmem:[#allocation52_spill] sm:$0xff] %v2248_v9  ;;  %v2264_v57 = vmax.f32 %v201_v46, %v212_v22 }
  0xd0   :  { %v1112_v62 = vsub.f32 %v1099_v10, %v1110_v30  ;;  %v1113_v38 = vsub.f32 %v1100_v33, %v1111_v43  ;;  %v1330_v54 = vadd.f32 %v1328_v50, %v1110_v30  ;;  %v1331_v18 = vadd.f32 %v1329_v28, %v1111_v43  ;;  %350 = vrot.lane.b32.xlu0 %v1930_v37, %s1752_s10 }
  0xd1   :  { %v2250_v10 = vadd.f32 9.581394e-08, %v1335_v39  ;;  %347 = vrot.lane.b32.xlu1 %v1921_v35, %s1752_s10  ;;  %4249 = vst [vmem:[#allocation54_spill] sm:$0xff] %v2256_v32  ;;  %4250 = vst [vmem:[#allocation55_spill] sm:$0xff] %v2262_v55  ;;  %v2267_v39 = vmul.f32 0.5, %v2179_v41 }
  0xd2   :  { %v1114_v43 = vsub.f32 %v1112_v62, %v2082_v14  ;;  %v1115_v21 = vsub.f32 %v1113_v38, %v2087_v15  ;;  %v1392_v36 = vsub.f32 %v1112_v62, %v2147_v23  ;;  %v1393_v48 = vsub.f32 %v1113_v38, %v2152_v34  ;;  %4251 = vst [vmem:[#allocation56_spill] sm:$0xff] %v2264_v57 }
  0xd3   :  { %4248 = vst [vmem:[#allocation53_spill] sm:$0xff] %v2250_v10  ;;  %4252 = vst [vmem:[#allocation57_spill] sm:$0xff] %v2267_v39  ;;  %v2274_v63 = vmul.f32 0.5, %v1112_v62  ;;  %v2282_v50 = vadd.f32 7.799758e-08, %v1330_v54  ;;  %v2288_v62 = vmul.f32 0.5, %v1113_v38 }
  0xd4   :  { %v1116_v14 = vadd.f32 %v1114_v43, %v2111_v40  ;;  %v1117_v15 = vadd.f32 %v1115_v21, %v2116_v44  ;;  %4253 = vst [vmem:[#allocation58_spill] sm:$0xff] %v2272_v11  ;;  %v1394_v23 = vadd.f32 %v1392_v36, %v746_v27  ;;  %v1395_v34 = vadd.f32 %v1393_v48, %v747_v26  ;;  %v259_v40 = vpop.permute.xlu1 %258  ;;  %v261_v44 = vpop.permute.xlu0 %260 }
  0xd5   :  { %4254 = vst [vmem:[#allocation59_spill] sm:$0xff] %v2274_v63  ;;  %714 = vrot.lane.b32.xlu0 %v1972_v52, %s1752_s10  ;;  %4255 = vst [vmem:[#allocation60_spill] sm:$0xff] %v2282_v50  ;;  %v2284_v28 = vadd.f32 7.799758e-08, %v1331_v18  ;;  %711 = vrot.lane.b32.xlu1 %v1966_v51, %s1752_s10  ;;  %v262_v29 = vsel %vm162_vm6, %v259_v40, %v261_v44  ;;  %v1422_v54 = vmul.f32 %v2248_v9, %v2282_v50 }
  0xd6   :  { %v2278_v33 = vmul.f32 0.25, %v1116_v14  ;;  %v2280_v24 = vmul.f32 0.25, %v1117_v15  ;;  %4257 = vst [vmem:[#allocation62_spill] sm:$0xff] %v2288_v62  ;;  %v1396_v27 = vmul.f32 0.25, %v1394_v23  ;;  %v1397_v26 = vmul.f32 0.25, %v1395_v34 }
  0xd7   :  { %4256 = vst [vmem:[#allocation61_spill] sm:$0xff] %v2284_v28  ;;  %v1423_v18 = vmul.f32 %v2250_v10, %v2284_v28  ;;  %v266_v47 = vsel %vm162_vm6, %v261_v44, %v259_v40  ;;  %v2308_v22 = vmul.f32 %v2282_v50, %v2242_v25  ;;  %v2322_v48 = vmul.f32 %v2284_v28, %v2244_v60 }
  0xd8   :  { %v2292_v8 = vadd.f32 8.018722e-08, %v2278_v33  ;;  %v2300_v30 = vadd.f32 8.018722e-08, %v2280_v24  ;;  %v2302_v38 = vadd.f32 2.7259262e-08, %v1396_v27  ;;  %v2332_v15 = vmax.f32 %v1800_v0, %v2256_v32 }
  0xd9   :  { %v2304_v46 = vadd.f32 2.7259262e-08, %v1397_v26  ;;  %4262 = vst [vmem:[#allocation67_spill] sm:$0xff] %v2308_v22  ;;  %158 = vrot.lane.b32.xlu0 %v2262_v55, %s1751_s1  ;;  %v2316_v21 = vadd.f32 8.018722e-08, %v1396_v27  ;;  %4266 = vst [vmem:[#allocation71_spill] sm:$0xff] %v2322_v48  ;;  %1075 = vrot.lane.b32.xlu1 %v2011_v16, %s1752_s10  ;;  %v270_v27 = vpop.permute.xlu1 %269  ;;  %v2349_v32 = vsel %vm2052_vm7, %v1802_v1, %v262_v29 }
  0xda   :  { %4258 = vst [vmem:[#allocation63_spill] sm:$0xff] %v2292_v8  ;;  %4259 = vst [vmem:[#allocation64_spill] sm:$0xff] %v2300_v30  ;;  %v2314_v43 = vmul.f32 %v2292_v8, %v2267_v39  ;;  %v2318_v36 = vadd.f32 8.018722e-08, %v1397_v26  ;;  %v2328_v14 = vmul.f32 %v2300_v30, %v2272_v11  ;;  %v273_v26 = vpop.permute.xlu0 %272  ;;  %v2354_v42 = vsel %vm2056_vm8, %v1800_v0, %v266_v47 }
  0xdb   :  { %4260 = vst [vmem:[#allocation65_spill] sm:$0xff] %v2302_v38  ;;  %4261 = vst [vmem:[#allocation66_spill] sm:$0xff] %v2304_v46  ;;  %v1424_v23 = vmul.f32 %v2316_v21, %v2302_v38  ;;  %v2340_v40 = vmul.f32 %v2316_v21, %v2274_v63  ;;  %v750_v56 = vsub.f32 %v2179_v41, %v2349_v32  ;;  %v2429_v48 = vadd.f32 7.799758e-08, %v2127_v53 }
  0xdc   :  { %4263 = vst [vmem:[#allocation68_spill] sm:$0xff] %v2314_v43  ;;  %4264 = vst [vmem:[#allocation69_spill] sm:$0xff] %v2316_v21  ;;  %v1425_v34 = vmul.f32 %v2318_v36, %v2304_v46  ;;  %v2344_v44 = vmul.f32 %v2318_v36, %v2288_v62  ;;  %v2360_v21 = vmax.f32 %v1810_v3, %v2264_v57  ;;  %v4330_v43 = vld [vmem:[#allocation44_spill] sm:$0xff] }
  0xdd   :  { %4265 = vst [vmem:[#allocation70_spill] sm:$0xff] %v2318_v36  ;;  %4267 = vst [vmem:[#allocation72_spill] sm:$0xff] %v2328_v14  ;;  %170 = vrot.lane.b32.xlu0 %v2332_v15, %s1752_s10  ;;  %v2362_v36 = vsub.f32 %v1422_v54, %v1424_v23  ;;  %160 = vrot.lane.b32.xlu1 %v2332_v15, %s1751_s1  ;;  %v274_v54 = vsel %vm175_vm9, %v273_v26, %v270_v27 }
  0xde   :  { %4268 = vst [vmem:[#allocation73_spill] sm:$0xff] %v2332_v15  ;;  %4269 = vst [vmem:[#allocation74_spill] sm:$0xff] %v2340_v40  ;;  %v2364_v28 = vsub.f32 %v1423_v18, %v1425_v34  ;;  %v277_v18 = vsel %vm175_vm9, %v270_v27, %v273_v26  ;;  %v666_v23 = vsub.f32 %v1818_v5, %v2063_v59  ;;  %v4289_v40 = vld [vmem:[#allocation41_spill] sm:$0xff] }
  0xdf   :  { %4270 = vst [vmem:[#allocation75_spill] sm:$0xff] %v2344_v44  ;;  %4271 = vst [vmem:[#allocation76_spill] sm:$0xff] %v2349_v32  ;;  %v667_v34 = vsub.f32 %v1816_v4, %v2066_v61  ;;  %v751_v29 = vsub.f32 %v2182_v49, %v2354_v42  ;;  %v2391_v57 = vsel %vm2070_vm10, %v1802_v1, %v277_v18 }
  0xe0   :  { %4272 = vst [vmem:[#allocation77_spill] sm:$0xff] %v2354_v42  ;;  %4273 = vst [vmem:[#allocation78_spill] sm:$0xff] %v2360_v21  ;;  %v2396_v27 = vsel %vm2089_vm11, %v1800_v0, %v274_v54  ;;  %v653_v41 = vsub.f32 %v1816_v4, %v1800_v0  ;;  %v668_v26 = vadd.f32 %v666_v23, %v1802_v1 }
  0xe1   :  { %4274 = vst [vmem:[#allocation79_spill] sm:$0xff] %v2362_v36  ;;  %4275 = vst [vmem:[#allocation80_spill] sm:$0xff] %v2364_v28  ;;  %220 = vrot.lane.b32.xlu0 %v2360_v21, %s1751_s1  ;;  %173 = vrot.lane.b32.xlu1 %v2262_v55, %s1752_s10  ;;  %v669_v49 = vadd.f32 %v667_v34, %v1800_v0  ;;  %v752_v47 = vadd.f32 %v750_v56, %v2391_v57  ;;  %v2457_v28 = vmul.f32 0.5, %v4289_v40  ;;  %v4291_v36 = vld [vmem:[#allocation42_spill] sm:$0xff] }
  0xe2   :  { %4276 = vst [vmem:[#allocation81_spill] sm:$0xff] %v2391_v57  ;;  %4277 = vst [vmem:[#allocation82_spill] sm:$0xff] %v2396_v27  ;;  %v753_v18 = vadd.f32 %v751_v29, %v2396_v27  ;;  %v652_v15 = vsub.f32 %v1818_v5, %v1802_v1  ;;  %v1030_v54 = vsub.f32 %v1826_v7, %v2139_v31  ;;  %v2416_v56 = vmul.f32 0.5, %v653_v41  ;;  %v4284_v41 = vld [vmem:[#allocation40_spill] sm:$0xff] }
  0xe3   :  { %v1031_v55 = vsub.f32 %v1824_v6, %v2142_v20  ;;  %v754_v17 = vmul.f32 0.25, %v752_v47  ;;  %v2418_v29 = vadd.f32 9.581394e-08, %v669_v49  ;;  %v2420_v23 = vadd.f32 9.581394e-08, %v668_v26  ;;  %4283 = vst [vmem:[#allocation88_spill] sm:$0xff] %v2429_v48 }
  0xe4   :  { %v755_v34 = vmul.f32 0.25, %v753_v18  ;;  %4278 = vst [vmem:[#allocation83_spill] sm:$0xff] %v2416_v56  ;;  %v2426_v58 = vmul.f32 0.5, %v652_v15  ;;  %v1032_v47 = vadd.f32 %v1030_v54, %v1810_v3  ;;  %v4285_v49 = vld [vmem:[#allocation43_spill] sm:$0xff]  ;;  %v1016_v53 = vsub.f32 %v1826_v7, %v1810_v3  ;;  %4290 = vst [vmem:[#allocation91_spill] sm:$0xff] %v2457_v28 }
  0xe5   :  { %1078 = vrot.lane.b32.xlu0 %v2017_v19, %s1752_s10  ;;  %1377 = vrot.lane.b32.xlu1 %v2077_v13, %s1752_s10  ;;  %4279 = vst [vmem:[#allocation84_spill] sm:$0xff] %v2418_v29  ;;  %4280 = vst [vmem:[#allocation85_spill] sm:$0xff] %v2420_v23  ;;  %v1033_v18 = vadd.f32 %v1031_v55, %v1808_v2  ;;  %v2436_v44 = vadd.f32 7.799758e-08, %v4285_v49  ;;  %v2438_v26 = vadd.f32 2.7259262e-08, %v754_v17 }
  0xe6   :  { %4282 = vst [vmem:[#allocation87_spill] sm:$0xff] %v2426_v58  ;;  %v2440_v22 = vadd.f32 2.7259262e-08, %v755_v34  ;;  %v1017_v15 = vsub.f32 %v1824_v6, %v1808_v2  ;;  %v786_v55 = vmul.f32 %v2420_v23, %v2429_v48  ;;  %v2452_v49 = vadd.f32 8.018722e-08, %v754_v17 }
  0xe7   :  { %4286 = vst [vmem:[#allocation43_spill] sm:$0xff] %v2436_v44  ;;  %v787_v54 = vmul.f32 %v2418_v29, %v2436_v44  ;;  %v2454_v45 = vadd.f32 8.018722e-08, %v755_v34  ;;  %v2460_v50 = vmul.f32 0.5, %v4291_v36  ;;  %v2462_v27 = vadd.f32 9.581394e-08, %v1032_v47 }
  0xe8   :  { %4287 = vst [vmem:[#allocation89_spill] sm:$0xff] %v2452_v49  ;;  %v2464_v57 = vadd.f32 9.581394e-08, %v1033_v18  ;;  %v2470_v42 = vmul.f32 %v2429_v48, %v2426_v58  ;;  %v2474_v17 = vmul.f32 %v2436_v44, %v2416_v56  ;;  %v788_v34 = vmul.f32 %v2452_v49, %v2438_v26  ;;  %v4297_v48 = vld [vmem:[#allocation28_spill] sm:$0xff]  ;;  %v4299_v44 = vld [vmem:[#allocation27_spill] sm:$0xff] }
  0xe9   :  { %1380 = vrot.lane.b32.xlu0 %v4284_v41, %s1752_s10  ;;  %222 = vrot.lane.b32.xlu1 %v2424_v12, %s1751_s1  ;;  %4288 = vst [vmem:[#allocation90_spill] sm:$0xff] %v2454_v45  ;;  %4292 = vst [vmem:[#allocation92_spill] sm:$0xff] %v2460_v50  ;;  %v789_v47 = vmul.f32 %v2454_v45, %v2440_v22  ;;  %v2483_v18 = vadd.f32 2.7259262e-08, %v2278_v33  ;;  %v2490_v36 = vmax.f32 %v1816_v4, %v4297_v48 }
  0xea   :  { %4293 = vst [vmem:[#allocation93_spill] sm:$0xff] %v2462_v27  ;;  %4294 = vst [vmem:[#allocation94_spill] sm:$0xff] %v2464_v57  ;;  %v2494_v40 = vmax.f32 %v1818_v5, %v4299_v44  ;;  %v2496_v32 = vsub.f32 %v786_v55, %v788_v34  ;;  %v2506_v33 = vmul.f32 %v2454_v45, %v2460_v50  ;;  %v4302_v44 = vld [vmem:[#allocation47_spill] sm:$0xff]  ;;  %v4303_v45 = vld [vmem:[#allocation48_spill] sm:$0xff] }
  0xeb   :  { %4295 = vst [vmem:[#allocation95_spill] sm:$0xff] %v2483_v18  ;;  %4298 = vst [vmem:[#allocation97_spill] sm:$0xff] %v2490_v36  ;;  %v2498_v20 = vsub.f32 %v787_v54, %v789_v47  ;;  %v826_v4 = vmul.f32 %v2438_v26, %v2426_v58  ;;  %v824_v5 = vmul.f32 %v2420_v23, %v2457_v28  ;;  %v2534_v58 = vmul.f32 0.5, %v1016_v53 }
  0xec   :  { %4300 = vst [vmem:[#allocation98_spill] sm:$0xff] %v2494_v40  ;;  %v825_v55 = vmul.f32 %v2418_v29, %v2460_v50  ;;  %v2532_v29 = vadd.f32 7.799758e-08, %v4303_v45  ;;  %v2536_v54 = vmul.f32 0.5, %v1017_v15  ;;  %v1152_v48 = vmul.f32 %v2292_v8, %v2483_v18  ;;  %v4308_v15 = vld [vmem:[#allocation33_spill] sm:$0xff] }
  0xed   :  { %231 = vrot.lane.b32.xlu0 %v2424_v12, %s1752_s10  ;;  %234 = vrot.lane.b32.xlu1 %v2360_v21, %s1752_s10  ;;  %v2486_v12 = vadd.f32 2.7259262e-08, %v2280_v24  ;;  %v2502_v21 = vmul.f32 %v2452_v49, %v2457_v28  ;;  %v827_v24 = vmul.f32 %v2440_v22, %v2416_v56  ;;  %v2529_v56 = vadd.f32 7.799758e-08, %v4302_v44  ;;  %4304 = vst [vmem:[#allocation47_spill] sm:$0xff] %v2534_v58 }
  0xee   :  { %4305 = vst [vmem:[#allocation48_spill] sm:$0xff] %v2536_v54  ;;  %v1151_v47 = vmul.f32 %v2464_v57, %v2532_v29  ;;  %v2550_v45 = vsub.f32 %v824_v5, %v826_v4  ;;  %v2556_v49 = vmax.f32 %v1826_v7, %v4308_v15  ;;  %v1188_v7 = vmul.f32 %v2462_v27, %v2267_v39 }
  0xef   :  { %4296 = vst [vmem:[#allocation96_spill] sm:$0xff] %v2486_v12  ;;  %4301 = vst [vmem:[#allocation99_spill] sm:$0xff] %v2502_v21  ;;  %v1150_v34 = vmul.f32 %v2462_v27, %v2529_v56  ;;  %v1153_v44 = vmul.f32 %v2300_v30, %v2486_v12  ;;  %v2552_v53 = vsub.f32 %v825_v55, %v827_v24 }
  0xf0   :  { %4306 = vst [vmem:[#allocation100_spill] sm:$0xff] %v2550_v45  ;;  %4309 = vst [vmem:[#allocation102_spill] sm:$0xff] %v2556_v49  ;;  %v2560_v8 = vmul.f32 %v2529_v56, %v2534_v58  ;;  %v2564_v30 = vmul.f32 %v2532_v29, %v2536_v54  ;;  %v1189_v5 = vmul.f32 %v2464_v57, %v2272_v11  ;;  %v4328_v11 = vld [vmem:[#allocation31_spill] sm:$0xff]  ;;  %v4358_v45 = vld [vmem:[#allocation82_spill] sm:$0xff] }
  0xf1   :  { %612 = vrot.lane.b32.xlu0 %v2494_v40, %s1751_s1  ;;  %614 = vrot.lane.b32.xlu1 %v2490_v36, %s1751_s1  ;;  %4307 = vst [vmem:[#allocation101_spill] sm:$0xff] %v2552_v53  ;;  %v2572_v4 = vsub.f32 %v1150_v34, %v1152_v48  ;;  %v2574_v24 = vsub.f32 %v1151_v47, %v1153_v44  ;;  %v4344_v53 = vld [vmem:[#allocation41_spill] sm:$0xff] }
  0xf2   :  { %4310 = vst [vmem:[#allocation103_spill] sm:$0xff] %v2560_v8  ;;  %4311 = vst [vmem:[#allocation104_spill] sm:$0xff] %v2564_v30  ;;  %v1191_v55 = vmul.f32 %v2486_v12, %v2536_v54  ;;  %v1463_v44 = vmul.f32 %v2304_v46, %v2244_v60  ;;  %v4320_v60 = vld [vmem:[#allocation21_spill] sm:$0xff] }
  0xf3   :  { %4314 = vst [vmem:[#allocation106_spill] sm:$0xff] %v2572_v4  ;;  %4315 = vst [vmem:[#allocation107_spill] sm:$0xff] %v2574_v24 }
  0xf4   :  { %v2588_v48 = vsub.f32 %v1189_v5, %v1191_v55  ;;  %v1460_v5 = vmul.f32 %v2248_v9, %v2274_v63  ;;  %v1462_v55 = vmul.f32 %v2302_v38, %v2242_v25  ;;  %v396_v25 = vsub.f32 %v4320_v60, %v1972_v52  ;;  %v4321_v9 = vld [vmem:[#allocation16_spill] sm:$0xff] }
  0xf5   :  { %623 = vrot.lane.b32.xlu0 %v2490_v36, %s1752_s10  ;;  %626 = vrot.lane.b32.xlu1 %v2494_v40, %s1752_s10  ;;  %v4312_v36 = vld [vmem:[#allocation34_spill] sm:$0xff]  ;;  %v289_v40 = vsub.f32 %v1808_v2, %v1800_v0 }
  0xf6   :  { %v2568_v23 = vmax.f32 %v1824_v6, %v4312_v36  ;;  %v1190_v6 = vmul.f32 %v2483_v18, %v2534_v58  ;;  %4317 = vst [vmem:[#allocation109_spill] sm:$0xff] %v2588_v48  ;;  %v2615_v47 = vsub.f32 %v1460_v5, %v1462_v55  ;;  %v4323_v55 = vld [vmem:[#allocation20_spill] sm:$0xff]  ;;  %v288_v58 = vsub.f32 %v1810_v3, %v1802_v1 }
  0xf7   :  { %v397_v54 = vsub.f32 %v4323_v55, %v1966_v51 }
  0xf8   :  { %4313 = vst [vmem:[#allocation105_spill] sm:$0xff] %v2568_v23  ;;  %v2586_v36 = vsub.f32 %v1188_v7, %v1190_v6  ;;  %v2603_v7 = vmul.f32 2.0, %v1800_v0  ;;  %v1461_v6 = vmul.f32 %v2250_v10, %v2288_v62  ;;  %4318 = vst [vmem:[#allocation110_spill] sm:$0xff] %v2615_v47  ;;  %v2642_v62 = vmul.f32 0.5, %v289_v40 }
  0xf9   :  { %976 = vrot.lane.b32.xlu0 %v2556_v49, %s1751_s1  ;;  %978 = vrot.lane.b32.xlu1 %v2568_v23, %s1751_s1  ;;  %v280_v47 = vsub.f32 %v4321_v9, %v1930_v37  ;;  %v659_v40 = vsub.f32 %v4323_v55, %v2066_v61  ;;  %v2662_v30 = vmul.f32 0.5, %v288_v58  ;;  %v2686_v12 = vmul.f32 0.5, %v397_v54 }
  0xfa   :  { %4316 = vst [vmem:[#allocation108_spill] sm:$0xff] %v2586_v36  ;;  %v303_v15 = vsub.f32 %v1808_v2, %v2603_v7  ;;  %v2617_v34 = vsub.f32 %v1461_v6, %v1463_v44  ;;  %v4322_v44 = vld [vmem:[#allocation17_spill] sm:$0xff]  ;;  %v4324_v2 = vld [vmem:[#allocation26_spill] sm:$0xff]  ;;  %4326 = vst [vmem:[#allocation112_spill] sm:$0xff] %v2642_v62  ;;  %v1125_v36 = vsub.f32 %v4328_v11, %v2077_v13 }
  0xfb   :  { %v295_v6 = vsub.f32 %v4322_v44, %v2603_v7  ;;  %v281_v63 = vsub.f32 %v4322_v44, %v1921_v35  ;;  %v399_v48 = vsub.f32 %v397_v54, %v4322_v44  ;;  %v1022_v61 = vsub.f32 %v4324_v2, %v2139_v31  ;;  %4334 = vst [vmem:[#allocation114_spill] sm:$0xff] %v2686_v12 }
  0xfc   :  { %4319 = vst [vmem:[#allocation111_spill] sm:$0xff] %v2617_v34  ;;  %v305_v10 = vadd.f32 %v303_v15, %v1800_v0  ;;  %v760_v0 = vsub.f32 %v4324_v2, %v2017_v19  ;;  %v4325_v15 = vld [vmem:[#allocation25_spill] sm:$0xff]  ;;  %v2684_v31 = vmul.f32 0.5, %v396_v25 }
  0xfd   :  { %987 = vrot.lane.b32.xlu0 %v2568_v23, %s1752_s10  ;;  %990 = vrot.lane.b32.xlu1 %v2556_v49, %s1752_s10  ;;  %v2620_v23 = vmul.f32 2.0, %v1802_v1  ;;  %v761_v27 = vsub.f32 %v4325_v15, %v2011_v16  ;;  %v297_v38 = vadd.f32 %v295_v6, %v1921_v35  ;;  %v2672_v6 = vmul.f32 0.5, %v280_v47 }
  0xfe   :  { %v2644_v34 = vadd.f32 9.581394e-08, %v305_v10  ;;  %v2674_v39 = vmul.f32 0.5, %v281_v63  ;;  %4333 = vst [vmem:[#allocation113_spill] sm:$0xff] %v2684_v31  ;;  %v401_v63 = vadd.f32 %v399_v48, %v1921_v35  ;;  %v1399_v48 = vsub.f32 %v1125_v36, %v4325_v15 }
  0xff   :  { %v302_v49 = vsub.f32 %v1810_v3, %v2620_v23  ;;  %v294_v5 = vsub.f32 %v4321_v9, %v2620_v23  ;;  %v398_v3 = vsub.f32 %v396_v25, %v4321_v9  ;;  %v763_v8 = vsub.f32 %v761_v27, %v4322_v44  ;;  %4331 = vst [vmem:[#allocation31_spill] sm:$0xff] %v2672_v6  ;;  %v4335_v25 = vld [vmem:[#allocation45_spill] sm:$0xff] }
 0x100   :  { %4332 = vst [vmem:[#allocation44_spill] sm:$0xff] %v2674_v39  ;;  %v2682_v44 = vadd.f32 1.9151946e-08, %v297_v38 }
 0x101   :  { %v304_v57 = vadd.f32 %v302_v49, %v1802_v1  ;;  %v658_v1 = vsub.f32 %v4320_v60, %v2063_v59  ;;  %v4327_v49 = vld [vmem:[#allocation32_spill] sm:$0xff]  ;;  %v296_v10 = vadd.f32 %v294_v5, %v1930_v37  ;;  %v762_v59 = vsub.f32 %v760_v0, %v4321_v9 }
 0x102   :  { %v1124_v46 = vsub.f32 %v4327_v49, %v4284_v41  ;;  %4329 = vst [vmem:[#allocation32_spill] sm:$0xff] %v2662_v30  ;;  %v1023_v5 = vsub.f32 %v4325_v15, %v4330_v43  ;;  %v400_v58 = vadd.f32 %v398_v3, %v1930_v37  ;;  %v661_v9 = vadd.f32 %v659_v40, %v1966_v51 }
 0x103   :  { %v2664_v14 = vadd.f32 9.581394e-08, %v304_v57  ;;  %v660_v24 = vadd.f32 %v658_v1, %v1972_v52  ;;  %v2680_v4 = vadd.f32 1.9151946e-08, %v296_v10  ;;  %v1127_v43 = vsub.f32 %v1125_v36, %v4323_v55 }
 0x104   :  { %v1126_v57 = vsub.f32 %v1124_v46, %v4320_v60  ;;  %v764_v47 = vadd.f32 %v762_v59, %v1930_v37  ;;  %v765_v3 = vadd.f32 %v763_v8, %v1921_v35  ;;  %v1024_v1 = vadd.f32 %v1022_v61, %v2017_v19  ;;  %v4337_v59 = vld [vmem:[#allocation46_spill] sm:$0xff] }
 0x105   :  { %v1025_v40 = vadd.f32 %v1023_v5, %v2011_v16  ;;  %v1398_v10 = vsub.f32 %v1124_v46, %v4324_v2  ;;  %v2695_v38 = vadd.f32 1.9151946e-08, %v660_v24  ;;  %v1324_v54 = vsub.f32 %v4327_v49, %v4335_v25 }
 0x106   :  { %v402_v60 = vmul.f32 0.25, %v400_v58  ;;  %v2702_v55 = vadd.f32 1.9151946e-08, %v661_v9  ;;  %v1128_v8 = vadd.f32 %v1126_v57, %v1972_v52  ;;  %v1325_v61 = vsub.f32 %v4328_v11, %v4337_v59  ;;  %v4343_v59 = vld [vmem:[#allocation76_spill] sm:$0xff] }
 0x107   :  { %v2709_v35 = vmul.f32 0.5, %v760_v0  ;;  %v2711_v24 = vmul.f32 0.5, %v761_v27  ;;  %v1129_v25 = vadd.f32 %v1127_v43, %v1966_v51  ;;  %v403_v58 = vmul.f32 0.25, %v401_v63 }
 0x108   :  { %v766_v37 = vmul.f32 0.25, %v764_v47  ;;  %v2714_v28 = vadd.f32 1.9151946e-08, %v1024_v1  ;;  %v2716_v9 = vadd.f32 1.9151946e-08, %v1025_v40  ;;  %v1326_v57 = vadd.f32 %v1324_v54, %v4284_v41  ;;  %v4346_v47 = vld [vmem:[#allocation77_spill] sm:$0xff] }
 0x109   :  { %4339 = vst [vmem:[#allocation115_spill] sm:$0xff] %v2709_v35  ;;  %4340 = vst [vmem:[#allocation116_spill] sm:$0xff] %v2711_v24  ;;  %v1400_v52 = vadd.f32 %v1398_v10, %v2017_v19  ;;  %v2722_v0 = vadd.f32 4.3772776e-08, %v402_v60  ;;  %v1130_v24 = vmul.f32 0.25, %v1128_v8  ;;  %v1327_v43 = vadd.f32 %v1325_v61, %v2077_v13 }
 0x10a   :  { %4341 = vst [vmem:[#allocation117_spill] sm:$0xff] %v2714_v28  ;;  %4342 = vst [vmem:[#allocation118_spill] sm:$0xff] %v2716_v9  ;;  %v1401_v63 = vadd.f32 %v1399_v48, %v2011_v16  ;;  %v2732_v54 = vmul.f32 0.5, %v1124_v46  ;;  %v2734_v10 = vmul.f32 0.5, %v1125_v36  ;;  %v1131_v51 = vmul.f32 0.25, %v1129_v25  ;;  %v4354_v9 = vld [vmem:[#allocation81_spill] sm:$0xff] }
 0x10b   :  { %v2738_v35 = vadd.f32 4.3772776e-08, %v766_v37  ;;  %v2742_v8 = vadd.f32 2.7646426e-08, %v766_v37  ;;  %v2746_v48 = vadd.f32 1.9151946e-08, %v1326_v57 }
 0x10c   :  { %4349 = vst [vmem:[#allocation77_spill] sm:$0xff] %v2732_v54  ;;  %v2751_v36 = vadd.f32 4.3772776e-08, %v1130_v24  ;;  %v2753_v25 = vadd.f32 1.9151946e-08, %v1327_v43  ;;  %v1403_v28 = vmul.f32 0.25, %v1401_v63  ;;  %v299_v43 = vsub.f32 %v4346_v47, %v2603_v7 }
 0x10d   :  { %4351 = vst [vmem:[#allocation119_spill] sm:$0xff] %v2738_v35  ;;  %4353 = vst [vmem:[#allocation121_spill] sm:$0xff] %v2746_v48  ;;  %v4360_v37 = vld [vmem:[#allocation88_spill] sm:$0xff]  ;;  %v2762_v57 = vadd.f32 4.3772776e-08, %v1131_v51 }
 0x10e   :  { %4356 = vst [vmem:[#allocation122_spill] sm:$0xff] %v2751_v36  ;;  %4357 = vst [vmem:[#allocation123_spill] sm:$0xff] %v2753_v25  ;;  %v2772_v63 = vadd.f32 2.7646426e-08, %v402_v60  ;;  %v284_v60 = vsub.f32 %v4343_v59, %v4354_v9 }
 0x10f   :  { %4362 = vst [vmem:[#allocation124_spill] sm:$0xff] %v2762_v57 }
 0x112   :  { %v2699_v18 = vpop.permute.xlu0 %310  ;;  %v2707_v5 = vpop.permute.xlu1 %308 }
 0x113   :  { %4336 = vst [vmem:[#allocation45_spill] sm:$0xff] %v2699_v18  ;;  %4338 = vst [vmem:[#allocation46_spill] sm:$0xff] %v2707_v5  ;;  %v767_v18 = vmul.f32 0.25, %v765_v3  ;;  %v386_v5 = vsub.f32 %v4344_v53, %v4343_v59  ;;  %v4347_v3 = vld [vmem:[#allocation42_spill] sm:$0xff]  ;;  %v2736_v53 = vadd.f32 4.3772776e-08, %v403_v58 }
 0x114   :  { %v387_v1 = vsub.f32 %v4347_v3, %v4346_v47  ;;  %4350 = vst [vmem:[#allocation42_spill] sm:$0xff] %v2734_v10  ;;  %v1402_v3 = vmul.f32 0.25, %v1400_v52  ;;  %v2764_v52 = vadd.f32 2.7646426e-08, %v1130_v24 }
 0x115   :  { %v2744_v61 = vadd.f32 2.7646426e-08, %v767_v18 }
 0x116   :  { %v2724_v27 = vpop.permute.xlu0 %323  ;;  %v2730_v40 = vpop.permute.xlu1 %321  ;;  %v389_v35 = vadd.f32 %v387_v1, %v4358_v45  ;;  %v2774_v1 = vadd.f32 2.7646426e-08, %v403_v58  ;;  %v2782_v24 = vadd.f32 2.7646426e-08, %v1402_v3 }
 0x117   :  { %4345 = vst [vmem:[#allocation76_spill] sm:$0xff] %v2724_v27  ;;  %4348 = vst [vmem:[#allocation41_spill] sm:$0xff] %v2730_v40  ;;  %v2740_v27 = vadd.f32 4.3772776e-08, %v767_v18  ;;  %v388_v40 = vadd.f32 %v386_v5, %v4354_v9  ;;  %v2760_v18 = vmul.f32 %v2742_v8, %v4360_v37  ;;  %v298_v5 = vsub.f32 %v4343_v59, %v2620_v23 }
 0x118   :  { %4367 = vst [vmem:[#allocation127_spill] sm:$0xff] %v2782_v24  ;;  %v2788_v23 = vadd.f32 2.7646426e-08, %v1403_v28  ;;  %v391_v7 = vmul.f32 0.25, %v389_v35  ;;  %v4378_v35 = vld [vmem:[#allocation79_spill] sm:$0xff] }
 0x119   :  { %4352 = vst [vmem:[#allocation120_spill] sm:$0xff] %v2740_v27  ;;  %4361 = vst [vmem:[#allocation88_spill] sm:$0xff] %v2760_v18  ;;  %v2780_v18 = vadd.f32 4.3772776e-08, %v1402_v3  ;;  %v390_v57 = vmul.f32 0.25, %v388_v40  ;;  %v4374_v40 = vld [vmem:[#allocation60_spill] sm:$0xff] }
 0x11a   :  { %v2749_v46 = vpop.permute.xlu0 %674  ;;  %v2756_v21 = vpop.permute.xlu1 %672  ;;  %4370 = vst [vmem:[#allocation130_spill] sm:$0xff] %v2788_v23 }
 0x11b   :  { %4355 = vst [vmem:[#allocation81_spill] sm:$0xff] %v2749_v46  ;;  %4359 = vst [vmem:[#allocation82_spill] sm:$0xff] %v2756_v21  ;;  %v2768_v46 = vadd.f32 2.7646426e-08, %v1131_v51  ;;  %v4364_v21 = vld [vmem:[#allocation43_spill] sm:$0xff] }
 0x11c   :  { %v2778_v37 = vmul.f32 %v2744_v61, %v4364_v21  ;;  %4366 = vst [vmem:[#allocation126_spill] sm:$0xff] %v2780_v18  ;;  %v2786_v51 = vadd.f32 4.3772776e-08, %v1403_v28  ;;  %v2796_v21 = vmul.f32 %v2764_v52, %v2529_v56  ;;  %v300_v28 = vadd.f32 %v298_v5, %v4354_v9 }
 0x11d   :  { %4363 = vst [vmem:[#allocation125_spill] sm:$0xff] %v2768_v46  ;;  %v2800_v3 = vmul.f32 %v2768_v46, %v2532_v29  ;;  %v285_v56 = vsub.f32 %v4346_v47, %v4358_v45  ;;  %v301_v29 = vadd.f32 %v299_v43, %v4358_v45  ;;  %v2824_v9 = vmul.f32 %v4378_v35, %v2732_v54  ;;  %v4386_v47 = vld [vmem:[#allocation67_spill] sm:$0xff] }
 0x11e   :  { %4365 = vst [vmem:[#allocation43_spill] sm:$0xff] %v2778_v37  ;;  %v2784_v36 = vpop.permute.xlu0 %687  ;;  %4369 = vst [vmem:[#allocation129_spill] sm:$0xff] %v2786_v51  ;;  %v2792_v58 = vpop.permute.xlu1 %685  ;;  %v2804_v37 = vmul.f32 %v2782_v24, %v4374_v40  ;;  %v2830_v5 = vadd.f32 8.018722e-08, %v390_v57  ;;  %v2838_v43 = vmul.f32 0.5, %v284_v60 }
 0x11f   :  { %4368 = vst [vmem:[#allocation128_spill] sm:$0xff] %v2784_v36  ;;  %4371 = vst [vmem:[#allocation131_spill] sm:$0xff] %v2792_v58  ;;  %v4376_v36 = vld [vmem:[#allocation61_spill] sm:$0xff]  ;;  %v2813_v58 = vmul.f32 %v4378_v35, %v2746_v48  ;;  %v412_v54 = vadd.f32 7.799758e-08, %v300_v28 }
 0x120   :  { %4372 = vst [vmem:[#allocation132_spill] sm:$0xff] %v2796_v21  ;;  %4373 = vst [vmem:[#allocation133_spill] sm:$0xff] %v2800_v3  ;;  %v2809_v59 = vmul.f32 %v2788_v23, %v4376_v36  ;;  %v4380_v3 = vld [vmem:[#allocation80_spill] sm:$0xff]  ;;  %v4392_v23 = vld [vmem:[#allocation71_spill] sm:$0xff]  ;;  %v413_v28 = vadd.f32 7.799758e-08, %v301_v29 }
 0x121   :  { %4375 = vst [vmem:[#allocation60_spill] sm:$0xff] %v2804_v37  ;;  %4379 = vst [vmem:[#allocation79_spill] sm:$0xff] %v2813_v58  ;;  %v2820_v21 = vmul.f32 %v4380_v3, %v2753_v25  ;;  %v2828_v36 = vmul.f32 %v4380_v3, %v2734_v10  ;;  %v4385_v58 = vld [vmem:[#allocation74_spill] sm:$0xff]  ;;  %v2840_v37 = vadd.f32 8.018722e-08, %v391_v7 }
 0x122   :  { %4377 = vst [vmem:[#allocation61_spill] sm:$0xff] %v2809_v59  ;;  %4382 = vst [vmem:[#allocation134_spill] sm:$0xff] %v2824_v9  ;;  %v1039_v40 = vpop.permute.xlu0 %1038  ;;  %v4387_v59 = vsub.f32 %v4385_v58, %v4386_v47  ;;  %v1037_v35 = vpop.permute.xlu1 %1036  ;;  %v414_v9 = vadd.f32 2.7259262e-08, %v390_v57  ;;  %v4395_v60 = vsub.f32 %v4386_v47, %v4385_v58  ;;  %v423_v58 = vmul.f32 %v2644_v34, %v413_v28 }
 0x123   :  { %4381 = vst [vmem:[#allocation80_spill] sm:$0xff] %v2820_v21  ;;  %4383 = vst [vmem:[#allocation135_spill] sm:$0xff] %v2828_v36  ;;  %v415_v21 = vadd.f32 2.7259262e-08, %v391_v7  ;;  %v1040_v3 = vsel %vm162_vm6, %v1037_v35, %v1039_v40  ;;  %v1044_v10 = vsel %vm162_vm6, %v1039_v40, %v1037_v35  ;;  %v4391_v36 = vld [vmem:[#allocation75_spill] sm:$0xff]  ;;  %v2856_v7 = vmul.f32 0.5, %v285_v56 }
 0x124   :  { %4384 = vst [vmem:[#allocation136_spill] sm:$0xff] %v2830_v5  ;;  %v2836_v45 = vmul.f32 %v4387_v59, %v2780_v18  ;;  %4389 = vst [vmem:[#allocation67_spill] sm:$0xff] %v2838_v43  ;;  %v4393_v24 = vsub.f32 %v4391_v36, %v4392_v23  ;;  %v2854_v59 = vmul.f32 %v4395_v60, %v2746_v48 }
 0x125   :  { %4390 = vst [vmem:[#allocation137_spill] sm:$0xff] %v2840_v37  ;;  %4397 = vst [vmem:[#allocation138_spill] sm:$0xff] %v2856_v7  ;;  %v4398_v57 = vsub.f32 %v4392_v23, %v4391_v36  ;;  %v422_v35 = vmul.f32 %v2664_v14, %v412_v54  ;;  %v425_v56 = vmul.f32 %v2840_v37, %v415_v21 }
 0x126   :  { %4388 = vst [vmem:[#allocation74_spill] sm:$0xff] %v2836_v45  ;;  %v2848_v46 = vmul.f32 %v4393_v24, %v2786_v51  ;;  %4396 = vst [vmem:[#allocation71_spill] sm:$0xff] %v2854_v59  ;;  %v470_v24 = vmul.f32 %v2830_v5, %v2838_v43  ;;  %v472_v51 = vmul.f32 %v412_v54, %v2662_v30  ;;  %v1052_v18 = vpop.permute.xlu0 %1051  ;;  %v1050_v23 = vpop.permute.xlu1 %1049 }
 0x127   :  { %v2862_v40 = vmul.f32 %v4398_v57, %v2753_v25  ;;  %v471_v29 = vmul.f32 %v2840_v37, %v2856_v7  ;;  %v473_v47 = vmul.f32 %v413_v28, %v2642_v62  ;;  %v424_v36 = vmul.f32 %v2830_v5, %v414_v9 }
 0x128   :  { %4394 = vst [vmem:[#allocation75_spill] sm:$0xff] %v2848_v46  ;;  %v2875_v60 = vmul.f32 %v2772_v63, %v412_v54  ;;  %v1053_v57 = vsel %vm162_vm6, %v1050_v23, %v1052_v18  ;;  %v1045_v46 = vsel %vm2052_vm7, %v4324_v2, %v1040_v3  ;;  %v1046_v37 = vsel %vm2056_vm8, %v4325_v15, %v1044_v10 }
 0x129   :  { %4399 = vst [vmem:[#allocation139_spill] sm:$0xff] %v2862_v40  ;;  %v1057_v40 = vsel %vm162_vm6, %v1052_v18, %v1050_v23  ;;  %v1058_v25 = vsel %vm2052_vm7, %v2017_v19, %v1053_v57  ;;  %v474_v18 = vsub.f32 %v470_v24, %v472_v51  ;;  %v427_v2 = vsub.f32 %v423_v58, %v425_v56 }
 0x12a   :  { %4400 = vst [vmem:[#allocation140_spill] sm:$0xff] %v2875_v60  ;;  %v1059_v54 = vsel %vm2056_vm8, %v2011_v16, %v1057_v40  ;;  %v2892_v60 = vmul.f32 %v2774_v1, %v413_v28  ;;  %v2894_v23 = vsub.f32 %v1045_v46, %v1058_v25  ;;  %v1341_v3 = vpop.permute.xlu0 %1340  ;;  %v463_v10 = vmul.f32 %v415_v21, %v2642_v62  ;;  %v1339_v48 = vpop.permute.xlu1 %1338 }
 0x12b   :  { %v2896_v5 = vsub.f32 %v1046_v37, %v1059_v54  ;;  %v475_v15 = vsub.f32 %v471_v29, %v473_v47  ;;  %v461_v57 = vmul.f32 %v2644_v34, %v2856_v7  ;;  %v462_v19 = vmul.f32 %v414_v9, %v2662_v30 }
 0x12c   :  { %4403 = vst [vmem:[#allocation35_spill] sm:$0xff] %v2892_v60  ;;  %v1342_v40 = vsel %vm162_vm6, %v1339_v48, %v1341_v3  ;;  %v1346_v28 = vsel %vm162_vm6, %v1341_v3, %v1339_v48  ;;  %v460_v46 = vmul.f32 %v2664_v14, %v2838_v43  ;;  %v426_v25 = vsub.f32 %v422_v35, %v424_v36 }
 0x12d   :  { %v2907_v37 = vmul.f32 %v2772_v63, %v414_v9  ;;  %v2910_v58 = vmul.f32 %v2774_v1, %v415_v21  ;;  %v2914_v56 = vmul.f32 %v2742_v8, %v2438_v26  ;;  %v2917_v54 = vmul.f32 %v474_v18, %v2722_v0 }
 0x12e   :  { %v500_v16 = vsub.f32 %v472_v51, %v470_v24  ;;  %v501_v60 = vsub.f32 %v473_v47, %v471_v29  ;;  %v2921_v48 = vmul.f32 %v2744_v61, %v2440_v22  ;;  %v1354_v35 = vpop.permute.xlu0 %1353  ;;  %v2924_v9 = vmul.f32 %v475_v15, %v2736_v53  ;;  %v1352_v36 = vpop.permute.xlu1 %1351 }
 0x12f   :  { %4404 = vst [vmem:[#allocation141_spill] sm:$0xff] %v2914_v56  ;;  %v2927_v21 = vmul.f32 %v427_v2, %v2682_v44  ;;  %v2930_v26 = vmul.f32 %v427_v2, %v2674_v39  ;;  %v2932_v3 = vsub.f32 %v461_v57, %v463_v10  ;;  %v1355_v51 = vsel %vm162_vm6, %v1352_v36, %v1354_v35  ;;  %v4498_v56 = vld [vmem:[#allocation131_spill] sm:$0xff] }
 0x130   :  { %4405 = vst [vmem:[#allocation142_spill] sm:$0xff] %v2921_v48  ;;  %v1359_v24 = vsel %vm162_vm6, %v1354_v35, %v1352_v36  ;;  %v2936_v29 = vsub.f32 %v460_v46, %v462_v19  ;;  %v2940_v22 = vmul.f32 %v2774_v1, %v2856_v7  ;;  %v1347_v15 = vsel %vm2052_vm7, %v4327_v49, %v1342_v40 }
 0x131   :  { %v1348_v2 = vsel %vm2056_vm8, %v4328_v11, %v1346_v28  ;;  %v1360_v47 = vsel %vm2052_vm7, %v4284_v41, %v1355_v51  ;;  %v1361_v19 = vsel %vm2056_vm8, %v2077_v13, %v1359_v24  ;;  %v2959_v57 = vmul.f32 %v501_v60, %v2682_v44 }
 0x132   :  { %v2954_v18 = vsub.f32 %v1347_v15, %v1360_v47  ;;  %v2956_v1 = vsub.f32 %v1348_v2, %v1361_v19  ;;  %v338_v10 = vpop.permute.xlu0 %337  ;;  %v2962_v40 = vmul.f32 %v426_v25, %v2680_v4  ;;  %v2966_v46 = vmul.f32 %v2932_v3, %v2682_v44  ;;  %v4414_v2 = vld [vmem:[#allocation99_spill] sm:$0xff] }
 0x133   :  { %4406 = vst [vmem:[#allocation143_spill] sm:$0xff] %v2959_v57  ;;  %v335_v28 = vpop.permute.xlu1 %334  ;;  %v2969_v35 = vmul.f32 %v426_v25, %v2672_v6  ;;  %v2973_v36 = vmul.f32 %v2772_v63, %v2838_v43  ;;  %v2976_v51 = vmul.f32 %v500_v16, %v2680_v4  ;;  %v2980_v60 = vmul.f32 %v2936_v29, %v2680_v4  ;;  %v4419_v43 = vld [vmem:[#allocation101_spill] sm:$0xff] }
 0x134   :  { %v2984_v24 = vmul.f32 %v2496_v32, %v2695_v38  ;;  %v2988_v44 = vmul.f32 %v2498_v20, %v2702_v55  ;;  %v2992_v25 = vmul.f32 %v2496_v32, %v2684_v31  ;;  %v2996_v16 = vmul.f32 %v2498_v20, %v2686_v12  ;;  %v4417_v20 = vld [vmem:[#allocation100_spill] sm:$0xff]  ;;  %v4447_v12 = vld [vmem:[#allocation103_spill] sm:$0xff] }
 0x135   :  { %v4411_v4 = vsub.f32 %v2506_v33, %v2474_v17  ;;  %v3006_v15 = vmul.f32 %v2744_v61, %v2460_v50  ;;  %v4415_v47 = vsub.f32 %v2470_v42, %v4414_v2  ;;  %v3016_v7 = vmul.f32 %v4417_v20, %v2695_v38  ;;  %v4423_v50 = vld [vmem:[#allocation119_spill] sm:$0xff] }
 0x136   :  { %4407 = vst [vmem:[#allocation144_spill] sm:$0xff] %v2984_v24  ;;  %4408 = vst [vmem:[#allocation145_spill] sm:$0xff] %v2988_v44  ;;  %v702_v19 = vpop.permute.xlu0 %701  ;;  %v3020_v13 = vmul.f32 %v4419_v43, %v2702_v55  ;;  %v4421_v61 = vsub.f32 %v2474_v17, %v2506_v33  ;;  %v4428_v44 = vld [vmem:[#allocation95_spill] sm:$0xff]  ;;  %v4431_v24 = vld [vmem:[#allocation125_spill] sm:$0xff] }
 0x137   :  { %4409 = vst [vmem:[#allocation146_spill] sm:$0xff] %v2992_v25  ;;  %4410 = vst [vmem:[#allocation147_spill] sm:$0xff] %v2996_v16  ;;  %v3002_v63 = vmul.f32 %v4411_v4, %v2740_v27  ;;  %v3012_v32 = vmul.f32 %v4415_v47, %v2695_v38  ;;  %v4424_v47 = vsub.f32 %v4414_v2, %v2470_v42  ;;  %v4426_v27 = vld [vmem:[#allocation91_spill] sm:$0xff]  ;;  %v4433_v33 = vld [vmem:[#allocation117_spill] sm:$0xff] }
 0x138   :  { %4413 = vst [vmem:[#allocation149_spill] sm:$0xff] %v3006_v15  ;;  %4418 = vst [vmem:[#allocation150_spill] sm:$0xff] %v3016_v7  ;;  %v3026_v4 = vmul.f32 %v4421_v61, %v2702_v55  ;;  %v3036_v38 = vmul.f32 %v2742_v8, %v4426_v27  ;;  %v4430_v7 = vld [vmem:[#allocation96_spill] sm:$0xff]  ;;  %v4434_v55 = vld [vmem:[#allocation106_spill] sm:$0xff] }
 0x139   :  { %4412 = vst [vmem:[#allocation148_spill] sm:$0xff] %v3002_v63  ;;  %4416 = vst [vmem:[#allocation99_spill] sm:$0xff] %v3012_v32  ;;  %v3032_v41 = vmul.f32 %v4424_v47, %v4423_v50  ;;  %v699_v32 = vpop.permute.xlu1 %698  ;;  %v3044_v17 = vmul.f32 %v4431_v24, %v4430_v7  ;;  %v3048_v61 = vmul.f32 %v4434_v55, %v4433_v33  ;;  %v4436_v42 = vld [vmem:[#allocation118_spill] sm:$0xff]  ;;  %v4437_v2 = vld [vmem:[#allocation107_spill] sm:$0xff] }
 0x13a   :  { %4420 = vst [vmem:[#allocation151_spill] sm:$0xff] %v3020_v13  ;;  %4422 = vst [vmem:[#allocation152_spill] sm:$0xff] %v3026_v4  ;;  %v3040_v13 = vmul.f32 %v2764_v52, %v4428_v44  ;;  %v3052_v47 = vmul.f32 %v4437_v2, %v4436_v42  ;;  %v4439_v4 = vld [vmem:[#allocation115_spill] sm:$0xff]  ;;  %v4441_v27 = vld [vmem:[#allocation116_spill] sm:$0xff] }
 0x13b   :  { %4425 = vst [vmem:[#allocation153_spill] sm:$0xff] %v3032_v41  ;;  %4427 = vst [vmem:[#allocation154_spill] sm:$0xff] %v3036_v38  ;;  %v3056_v8 = vmul.f32 %v4434_v55, %v4439_v4  ;;  %v3060_v44 = vmul.f32 %v4437_v2, %v4441_v27  ;;  %v4446_v50 = vld [vmem:[#allocation68_spill] sm:$0xff]  ;;  %v4457_v27 = vld [vmem:[#allocation58_spill] sm:$0xff] }
 0x13c   :  { %4429 = vst [vmem:[#allocation95_spill] sm:$0xff] %v3040_v13  ;;  %4432 = vst [vmem:[#allocation96_spill] sm:$0xff] %v3044_v17  ;;  %v4443_v13 = vld [vmem:[#allocation57_spill] sm:$0xff]  ;;  %v4445_v17 = vld [vmem:[#allocation122_spill] sm:$0xff] }
 0x13d   :  { %4435 = vst [vmem:[#allocation125_spill] sm:$0xff] %v3048_v61  ;;  %4438 = vst [vmem:[#allocation117_spill] sm:$0xff] %v3052_v47  ;;  %v3064_v7 = vmul.f32 %v2764_v52, %v4443_v13  ;;  %v4448_v61 = vsub.f32 %v4446_v50, %v4447_v12  ;;  %v4450_v63 = vld [vmem:[#allocation124_spill] sm:$0xff]  ;;  %v3084_v52 = vmul.f32 %v4431_v24, %v4457_v27  ;;  %v1066_v13 = vpop.permute.xlu0 %1065  ;;  %v4466_v24 = vld [vmem:[#allocation127_spill] sm:$0xff] }
 0x13e   :  { %4440 = vst [vmem:[#allocation106_spill] sm:$0xff] %v3056_v8  ;;  %4442 = vst [vmem:[#allocation118_spill] sm:$0xff] %v3060_v44  ;;  %v4451_v47 = vld [vmem:[#allocation72_spill] sm:$0xff] }
 0x13f   :  { %4444 = vst [vmem:[#allocation107_spill] sm:$0xff] %v3064_v7  ;;  %v3070_v31 = vmul.f32 %v4448_v61, %v4445_v17  ;;  %v4452_v15 = vld [vmem:[#allocation104_spill] sm:$0xff]  ;;  %v4459_v7 = vld [vmem:[#allocation109_spill] sm:$0xff]  ;;  %v4461_v61 = vsub.f32 %v4447_v12, %v4446_v50  ;;  %v1063_v50 = vpop.permute.xlu1 %1062 }
 0x140   :  { %v4453_v41 = vsub.f32 %v4451_v47, %v4452_v15  ;;  %v4455_v4 = vld [vmem:[#allocation108_spill] sm:$0xff]  ;;  %4458 = vst [vmem:[#allocation104_spill] sm:$0xff] %v3084_v52  ;;  %v3088_v44 = vmul.f32 %v4459_v7, %v4436_v42  ;;  %v4469_v52 = vld [vmem:[#allocation41_spill] sm:$0xff]  ;;  %v4481_v7 = vld [vmem:[#allocation62_spill] sm:$0xff] }
 0x141   :  { %4449 = vst [vmem:[#allocation68_spill] sm:$0xff] %v3070_v31  ;;  %v3080_v2 = vmul.f32 %v4455_v4, %v4433_v33  ;;  %v3094_v17 = vmul.f32 %v4461_v61, %v4433_v33  ;;  %v4468_v31 = vld [vmem:[#allocation76_spill] sm:$0xff]  ;;  %v4470_v33 = vld [vmem:[#allocation66_spill] sm:$0xff]  ;;  %v4483_v4 = vld [vmem:[#allocation45_spill] sm:$0xff] }
 0x142   :  { %v3076_v55 = vmul.f32 %v4453_v41, %v4450_v63  ;;  %4460 = vst [vmem:[#allocation155_spill] sm:$0xff] %v3088_v44  ;;  %v4463_v41 = vsub.f32 %v4452_v15, %v4451_v47  ;;  %v4465_v63 = vld [vmem:[#allocation65_spill] sm:$0xff]  ;;  %v325_v44 = vsel %vm162_vm6, %v4469_v52, %v4468_v31  ;;  %v329_v12 = vsel %vm162_vm6, %v4468_v31, %v4469_v52  ;;  %v4471_v61 = vld [vmem:[#allocation130_spill] sm:$0xff]  ;;  %v4473_v15 = vld [vmem:[#allocation59_spill] sm:$0xff] }
 0x143   :  { %4456 = vst [vmem:[#allocation72_spill] sm:$0xff] %v3080_v2  ;;  %4462 = vst [vmem:[#allocation156_spill] sm:$0xff] %v3094_v17  ;;  %v3104_v27 = vmul.f32 %v4466_v24, %v4465_v63  ;;  %v3114_v17 = vmul.f32 %v4471_v61, %v4470_v33  ;;  %v4475_v63 = vld [vmem:[#allocation121_spill] sm:$0xff]  ;;  %v4476_v47 = vld [vmem:[#allocation110_spill] sm:$0xff]  ;;  %v3130_v31 = vmul.f32 %v4471_v61, %v4481_v7 }
 0x144   :  { %4454 = vst [vmem:[#allocation103_spill] sm:$0xff] %v3076_v55  ;;  %v3100_v2 = vmul.f32 %v4463_v41, %v4436_v42  ;;  %v39_v55 = vld [vmem:[#allocation2] ss:$8 sm:$0x3]  ;;  %v3118_v42 = vmul.f32 %v4466_v24, %v4473_v15  ;;  %v3122_v41 = vmul.f32 %v4476_v47, %v4475_v63  ;;  %v4484_v33 = vld [vmem:[#allocation46_spill] sm:$0xff]  ;;  %v1368_v47 = vpop.permute.xlu0 %1367 }
 0x145   :  { %4467 = vst [vmem:[#allocation65_spill] sm:$0xff] %v3104_v27  ;;  %4472 = vst [vmem:[#allocation127_spill] sm:$0xff] %v3114_v17  ;;  %v4478_v27 = vld [vmem:[#allocation123_spill] sm:$0xff]  ;;  %v52_v52 = vld [vmem:[#allocation2 + $0x1] ss:$8 sm:$0x3]  ;;  %v312_v17 = vsel %vm162_vm6, %v4484_v33, %v4483_v4  ;;  %v316_v24 = vsel %vm162_vm6, %v4483_v4, %v4484_v33 }
 0x146   :  { %4464 = vst [vmem:[#allocation157_spill] sm:$0xff] %v3100_v2  ;;  %4474 = vst [vmem:[#allocation76_spill] sm:$0xff] %v3118_v42  ;;  %v4479_v2 = vld [vmem:[#allocation111_spill] sm:$0xff]  ;;  %v4485_v15 = vld [vmem:[#allocation14_spill] sm:$0xff] }
 0x147   :  { %4477 = vst [vmem:[#allocation41_spill] sm:$0xff] %v3122_v41  ;;  %v3126_v8 = vmul.f32 %v4479_v2, %v4478_v27  ;;  %4482 = vst [vmem:[#allocation130_spill] sm:$0xff] %v3130_v31  ;;  %v3139_v63 = vrot.slane %v39_v55, %v4485_v15  ;;  %v4487_v41 = vld [vmem:[#allocation15_spill] sm:$0xff]  ;;  %v4490_v7 = vld [vmem:[#allocation18_spill] sm:$0xff]  ;;  %v339_v31 = vsel %vm175_vm9, %v338_v10, %v335_v28 }
 0x148   :  { %v3142_v42 = vrot.slane %v39_v55, %v4487_v41  ;;  %v4489_v27 = vld [vmem:[#allocation19_spill] sm:$0xff]  ;;  %v342_v2 = vsel %vm175_vm9, %v335_v28, %v338_v10  ;;  %v4491_v4 = vld [vmem:[#allocation81_spill] sm:$0xff]  ;;  %v4492_v33 = vld [vmem:[#allocation82_spill] sm:$0xff]  ;;  %v3162_v48 = vrot.slane %v52_v52, %v4487_v41 }
 0x149   :  { %4480 = vst [vmem:[#allocation66_spill] sm:$0xff] %v3126_v8  ;;  %4486 = vst [vmem:[#allocation121_spill] sm:$0xff] %v3139_v63  ;;  %v330_v61 = vsel %vm2052_vm7, %v4489_v27, %v325_v44  ;;  %v331_v8 = vsel %vm2056_vm8, %v4490_v7, %v329_v12  ;;  %v676_v63 = vsel %vm162_vm6, %v4492_v33, %v4491_v4  ;;  %v4495_v12 = vld [vmem:[#allocation16_spill] sm:$0xff]  ;;  %v4496_v28 = vld [vmem:[#allocation17_spill] sm:$0xff] }
 0x14a   :  { %4488 = vst [vmem:[#allocation123_spill] sm:$0xff] %v3142_v42  ;;  %v680_v55 = vsel %vm162_vm6, %v4491_v4, %v4492_v33  ;;  %v1365_v42 = vpop.permute.xlu1 %1364  ;;  %v3159_v44 = vrot.slane %v52_v52, %v4485_v15  ;;  %4494 = vst [vmem:[#allocation46_spill] sm:$0xff] %v3162_v48  ;;  %v317_v10 = vsel %vm2052_vm7, %v4495_v12, %v312_v17  ;;  %v4497_v16 = vld [vmem:[#allocation128_spill] sm:$0xff] }
 0x14b   :  { %v318_v38 = vsel %vm2056_vm8, %v4496_v28, %v316_v24  ;;  %v689_v25 = vsel %vm162_vm6, %v4498_v56, %v4497_v16  ;;  %v693_v15 = vsel %vm162_vm6, %v4497_v16, %v4498_v56  ;;  %v332_v4 = vsub.f32 %v317_v10, %v330_v61  ;;  %v4502_v43 = vld [vmem:[#allocation20_spill] sm:$0xff]  ;;  %v4504_v61 = vld [vmem:[#allocation23_spill] sm:$0xff] }
 0x14c   :  { %4493 = vst [vmem:[#allocation45_spill] sm:$0xff] %v3159_v44  ;;  %v333_v33 = vsub.f32 %v318_v38, %v331_v8  ;;  %v343_v52 = vsel %vm2070_vm10, %v4495_v12, %v342_v2  ;;  %v344_v48 = vsel %vm2089_vm11, %v4496_v28, %v339_v31  ;;  %v4501_v44 = vld [vmem:[#allocation21_spill] sm:$0xff]  ;;  %v682_v20 = vsel %vm2056_vm8, %v4502_v43, %v680_v55  ;;  %v351_v38 = vpop.permute.xlu0 %350  ;;  %v4503_v8 = vld [vmem:[#allocation24_spill] sm:$0xff] }
 0x14d   :  { %v681_v24 = vsel %vm2052_vm7, %v4501_v44, %v676_v63  ;;  %v703_v56 = vsel %vm175_vm9, %v702_v19, %v699_v32  ;;  %v706_v16 = vsel %vm175_vm9, %v699_v32, %v702_v19  ;;  %v694_v2 = vsel %vm2052_vm7, %v4503_v8, %v689_v25 }
 0x14e   :  { %v695_v31 = vsel %vm2056_vm8, %v4504_v61, %v693_v15  ;;  %v1067_v12 = vsel %vm175_vm9, %v1066_v13, %v1063_v50  ;;  %v1070_v63 = vsel %vm175_vm9, %v1063_v50, %v1066_v13  ;;  %v348_v10 = vpop.permute.xlu1 %347  ;;  %v345_v28 = vsub.f32 %v332_v4, %v343_v52  ;;  %v4506_v4 = vld [vmem:[#allocation25_spill] sm:$0xff] }
 0x14f   :  { %v346_v55 = vsub.f32 %v333_v33, %v344_v48  ;;  %v352_v57 = vsel %vm175_vm9, %v351_v38, %v348_v10  ;;  %v355_v32 = vsel %vm175_vm9, %v348_v10, %v351_v38  ;;  %v707_v19 = vsel %vm2070_vm10, %v4501_v44, %v706_v16  ;;  %v4505_v48 = vld [vmem:[#allocation26_spill] sm:$0xff] }
 0x150   :  { %v708_v25 = vsel %vm2089_vm11, %v4502_v43, %v703_v56  ;;  %v356_v15 = vsel %vm2070_vm10, %v4489_v27, %v355_v32  ;;  %v357_v13 = vsel %vm2089_vm11, %v4490_v7, %v352_v57  ;;  %v1071_v50 = vsel %vm2070_vm10, %v4505_v48, %v1070_v63  ;;  %v715_v16 = vpop.permute.xlu0 %714 }
 0x151   :  { %v1072_v44 = vsel %vm2089_vm11, %v4506_v4, %v1067_v12  ;;  %v358_v33 = vadd.f32 %v356_v15, %v345_v28  ;;  %v359_v52 = vadd.f32 %v357_v13, %v346_v55  ;;  %v696_v43 = vsub.f32 %v681_v24, %v694_v2 }
 0x152   :  { %v697_v56 = vsub.f32 %v682_v20, %v695_v31  ;;  %v1369_v38 = vsel %vm175_vm9, %v1368_v47, %v1365_v42  ;;  %v1372_v27 = vsel %vm175_vm9, %v1365_v42, %v1368_v47  ;;  %v712_v10 = vpop.permute.xlu1 %711  ;;  %v3223_v12 = vsub.f32 %v2894_v23, %v1071_v50 }
 0x153   :  { %v360_v32 = vmul.f32 0.25, %v358_v33  ;;  %v361_v57 = vmul.f32 0.25, %v359_v52  ;;  %v716_v7 = vsel %vm175_vm9, %v715_v16, %v712_v10  ;;  %v719_v63 = vsel %vm175_vm9, %v712_v10, %v715_v16  ;;  %v4509_v33 = vld [vmem:[#allocation140_spill] sm:$0xff] }
 0x154   :  { %v709_v48 = vsub.f32 %v696_v43, %v707_v19  ;;  %v710_v45 = vsub.f32 %v697_v56, %v708_v25  ;;  %v3226_v28 = vsub.f32 %v2896_v5, %v1072_v44  ;;  %v1373_v20 = vsel %vm2070_vm10, %v4327_v49, %v1372_v27  ;;  %v4507_v19 = vld [vmem:[#allocation136_spill] sm:$0xff]  ;;  %v159_v10 = vpop.permute.xlu0 %158 }
 0x155   :  { %v406_v42 = vadd.f32 6.221088e-08, %v360_v32  ;;  %v407_v47 = vadd.f32 6.221088e-08, %v361_v57  ;;  %v410_v24 = vadd.f32 7.853586e-08, %v360_v32  ;;  %v1374_v2 = vsel %vm2089_vm11, %v4328_v11, %v1369_v38 }
 0x156   :  { %v411_v31 = vadd.f32 7.853586e-08, %v361_v57  ;;  %v720_v23 = vsel %vm2070_vm10, %v4503_v8, %v719_v63  ;;  %v721_v5 = vsel %vm2089_vm11, %v4504_v61, %v716_v7  ;;  %v4508_v11 = vld [vmem:[#allocation137_spill] sm:$0xff]  ;;  %v3252_v16 = vpop.permute.xlu1 %1075  ;;  %v3259_v38 = vsub.f32 %v2954_v18, %v1373_v20 }
 0x157   :  { %v428_v55 = vmul.f32 %v2664_v14, %v410_v24  ;;  %v434_v49 = vmul.f32 %v4507_v19, %v410_v24  ;;  %v466_v25 = vmul.f32 %v2936_v29, %v406_v42  ;;  %v467_v15 = vmul.f32 %v2932_v3, %v407_v47  ;;  %v4510_v29 = vld [vmem:[#allocation35_spill] sm:$0xff] }
 0x158   :  { %v429_v13 = vmul.f32 %v2644_v34, %v411_v31  ;;  %v435_v50 = vmul.f32 %v4508_v11, %v411_v31  ;;  %v488_v4 = vmul.f32 %v410_v24, %v2662_v30  ;;  %v489_v8 = vmul.f32 %v411_v31, %v2642_v62 }
 0x159   :  { %v432_v44 = vsub.f32 %v428_v55, %v2907_v37  ;;  %v438_v61 = vsub.f32 %v434_v49, %v4509_v33  ;;  %v468_v14 = vsub.f32 %v2969_v35, %v466_v25  ;;  %v469_v52 = vsub.f32 %v2930_v26, %v467_v15  ;;  %v4513_v33 = vld [vmem:[#allocation85_spill] sm:$0xff] }
 0x15a   :  { %v433_v3 = vsub.f32 %v429_v13, %v2910_v58  ;;  %v439_v34 = vsub.f32 %v435_v50, %v4510_v29  ;;  %v492_v43 = vsub.f32 %v488_v4, %v2973_v36  ;;  %v493_v56 = vsub.f32 %v489_v8, %v2940_v22  ;;  %v4512_v8 = vld [vmem:[#allocation100_spill] sm:$0xff] }
 0x15b   :  { %v3262_v37 = vsub.f32 %v2956_v1, %v1374_v2  ;;  %v442_v27 = vmul.f32 %v432_v44, %v406_v42  ;;  %v722_v35 = vadd.f32 %v720_v23, %v709_v48  ;;  %v446_v32 = vmul.f32 %v438_v61, %v2722_v0  ;;  %v161_v2 = vpop.permute.xlu1 %160 }
 0x15c   :  { %v443_v26 = vmul.f32 %v433_v3, %v407_v47  ;;  %v3266_v58 = vadd.f32 %v2917_v54, %v468_v14  ;;  %v723_v57 = vadd.f32 %v721_v5, %v710_v45  ;;  %v3270_v22 = vmul.f32 %v432_v44, %v2672_v6  ;;  %v4514_v14 = vld [vmem:[#allocation89_spill] sm:$0xff] }
 0x15d   :  { %v444_v36 = vsub.f32 %v2962_v40, %v442_v27  ;;  %v3273_v18 = vmul.f32 %v433_v3, %v2674_v39  ;;  %v504_v1 = vmul.f32 %v492_v43, %v406_v42  ;;  %v447_v63 = vmul.f32 %v439_v34, %v2736_v53  ;;  %v4515_v3 = vld [vmem:[#allocation101_spill] sm:$0xff]  ;;  %v4517_v27 = vld [vmem:[#allocation84_spill] sm:$0xff] }
 0x15e   :  { %v445_v7 = vsub.f32 %v2927_v21, %v443_v26  ;;  %v3278_v48 = vadd.f32 %v2924_v9, %v469_v52  ;;  %v3280_v20 = vmul.f32 %v493_v56, %v407_v47  ;;  %v3283_v45 = vmul.f32 %v492_v43, %v2722_v0  ;;  %v4518_v26 = vld [vmem:[#allocation90_spill] sm:$0xff]  ;;  %v4538_v9 = vld [vmem:[#allocation99_spill] sm:$0xff] }
 0x15f   :  { %v448_v54 = vadd.f32 %v446_v32, %v444_v36  ;;  %v3286_v40 = vmul.f32 %v493_v56, %v2736_v53  ;;  %v506_v24 = vsub.f32 %v2976_v51, %v504_v1  ;;  %v508_v21 = vmul.f32 %v438_v61, %v2672_v6  ;;  %v171_v53 = vpop.permute.xlu0 %170  ;;  %v4511_v51 = vld [vmem:[#allocation143_spill] sm:$0xff]  ;;  %v174_v56 = vpop.permute.xlu1 %173  ;;  %v4566_v6 = vld [vmem:[#allocation118_spill] sm:$0xff] }
 0x160   :  { %v449_v42 = vadd.f32 %v447_v63, %v445_v7  ;;  %v724_v31 = vmul.f32 0.25, %v722_v35  ;;  %v725_v23 = vmul.f32 0.25, %v723_v57  ;;  %v3295_v0 = vmul.f32 %v439_v34, %v2674_v39  ;;  %v4516_v34 = vld [vmem:[#allocation87_spill] sm:$0xff]  ;;  %v4519_v57 = vld [vmem:[#allocation146_spill] sm:$0xff]  ;;  %v4521_v7 = vld [vmem:[#allocation141_spill] sm:$0xff] }
 0x161   :  { %vm450_vm12 = vcmp.eq.f32.partialorder %v448_v54, 0.0  ;;  %v3299_v55 = vadd.f32 %v508_v21, %v506_v24  ;;  %v163_v15 = vsel %vm162_vm6, %v159_v10, %v161_v2  ;;  %v167_v13 = vsel %vm162_vm6, %v161_v2, %v159_v10  ;;  %v4520_v36 = vld [vmem:[#allocation83_spill] sm:$0xff]  ;;  %v4524_v21 = vld [vmem:[#allocation154_spill] sm:$0xff] }
 0x162   :  { %vm451_vm13 = vcmp.eq.f32.partialorder %v449_v42, 0.0  ;;  %v770_v19 = vadd.f32 6.221088e-08, %v724_v31  ;;  %v771_v49 = vadd.f32 6.221088e-08, %v725_v23  ;;  %v452_v11 = vsel %vm450_vm12, 1.0, %v448_v54 }
 0x163   :  { %v774_v25 = vadd.f32 7.853586e-08, %v724_v31  ;;  %v453_v50 = vsel %vm451_vm13, 1.0, %v449_v42  ;;  %v775_v4 = vadd.f32 7.853586e-08, %v725_v23  ;;  %v4522_v54 = vld [vmem:[#allocation88_spill] sm:$0xff]  ;;  %v3316_v23 = vpop.permute.xlu0 %220  ;;  %1627 = vrcp.f32 %v452_v11 }
 0x164   :  { %v830_v44 = vmul.f32 %v4512_v8, %v770_v19  ;;  %v831_v29 = vmul.f32 %v4515_v3, %v771_v49  ;;  %v4523_v2 = vld [vmem:[#allocation147_spill] sm:$0xff]  ;;  %v4527_v3 = vld [vmem:[#allocation153_spill] sm:$0xff]  ;;  %1629 = vrcp.f32 %v453_v50  ;;  %v4534_v11 = vld [vmem:[#allocation150_spill] sm:$0xff] }
 0x165   :  { %v792_v61 = vmul.f32 %v4513_v33, %v774_v25  ;;  %v798_v52 = vmul.f32 %v4514_v14, %v774_v25  ;;  %v852_v43 = vmul.f32 %v774_v25, %v4516_v34  ;;  %v793_v35 = vmul.f32 %v4517_v27, %v775_v4  ;;  %v4525_v25 = vld [vmem:[#allocation142_spill] sm:$0xff]  ;;  %v4526_v33 = vld [vmem:[#allocation43_spill] sm:$0xff] }
 0x166   :  { %v799_v32 = vmul.f32 %v4518_v26, %v775_v4  ;;  %v832_v10 = vsub.f32 %v4519_v57, %v830_v44  ;;  %v853_v1 = vmul.f32 %v775_v4, %v4520_v36  ;;  %v833_v42 = vsub.f32 %v4523_v2, %v831_v29  ;;  %v4528_v44 = vld [vmem:[#allocation149_spill] sm:$0xff]  ;;  %v4533_v2 = vld [vmem:[#allocation119_spill] sm:$0xff]  ;;  %v4565_v39 = vld [vmem:[#allocation106_spill] sm:$0xff] }
 0x167   :  { %v796_v63 = vsub.f32 %v792_v61, %v4521_v7  ;;  %v802_v24 = vsub.f32 %v798_v52, %v4522_v54  ;;  %v856_v31 = vsub.f32 %v852_v43, %v4524_v21  ;;  %v797_v8 = vsub.f32 %v793_v35, %v4525_v25  ;;  %v4529_v61 = vld [vmem:[#allocation148_spill] sm:$0xff]  ;;  %v4530_v52 = vld [vmem:[#allocation113_spill] sm:$0xff]  ;;  %v4531_v7 = vld [vmem:[#allocation114_spill] sm:$0xff]  ;;  %v1378_v25 = vpop.permute.xlu1 %1377  ;;  %v1079_v5 = vpop.permute.xlu0 %1078 }
 0x168   :  { %v803_v14 = vsub.f32 %v799_v32, %v4526_v33  ;;  %v3321_v27 = vadd.f32 %v4527_v3, %v832_v10  ;;  %v857_v26 = vsub.f32 %v853_v1, %v4528_v44  ;;  %v3325_v57 = vadd.f32 %v4529_v61, %v833_v42  ;;  %v4532_v32 = vld [vmem:[#allocation144_spill] sm:$0xff]  ;;  %v4535_v33 = vld [vmem:[#allocation145_spill] sm:$0xff]  ;;  %v4537_v44 = vld [vmem:[#allocation151_spill] sm:$0xff] }
 0x169   :  { %v806_v4 = vmul.f32 %v796_v63, %v770_v19  ;;  %v3328_v29 = vmul.f32 %v796_v63, %v4530_v52  ;;  %v807_v43 = vmul.f32 %v797_v8, %v771_v49  ;;  %v3331_v54 = vmul.f32 %v797_v8, %v4531_v7  ;;  %v4536_v3 = vld [vmem:[#allocation120_spill] sm:$0xff] }
 0x16a   :  { %v168_v35 = vsel %vm2052_vm7, 0.0, %v163_v15  ;;  %v810_v1 = vmul.f32 %v802_v24, %v4533_v2  ;;  %v868_v42 = vmul.f32 %v856_v31, %v770_v19  ;;  %v811_v50 = vmul.f32 %v803_v14, %v4536_v3  ;;  %v4539_v21 = vld [vmem:[#allocation152_spill] sm:$0xff] }
 0x16b   :  { %v808_v10 = vsub.f32 %v4532_v32, %v806_v4  ;;  %v809_v63 = vsub.f32 %v4535_v33, %v807_v43  ;;  %v869_v61 = vmul.f32 %v857_v26, %v771_v49  ;;  %v872_v4 = vmul.f32 %v802_v24, %v4530_v52  ;;  %v4563_v52 = vld [vmem:[#allocation95_spill] sm:$0xff] }
 0x16c   :  { %v870_v15 = vsub.f32 %v4538_v9, %v868_v42  ;;  %v873_v32 = vmul.f32 %v803_v14, %v4531_v7  ;;  %v176_v34 = vsel %vm175_vm9, %v174_v56, %v171_v53  ;;  %v179_v43 = vsel %vm175_vm9, %v171_v53, %v174_v56 }
 0x16d   :  { %v812_v47 = vadd.f32 %v810_v1, %v808_v10  ;;  %v813_v36 = vadd.f32 %v811_v50, %v809_v63  ;;  %v871_v19 = vsub.f32 %v4539_v21, %v869_v61  ;;  %v180_v49 = vsel %vm2070_vm10, 0.0, %v179_v43  ;;  %v223_v63 = vpop.permute.xlu1 %222 }
 0x16e   :  { %v3349_v33 = vadd.f32 %v872_v4, %v870_v15  ;;  %v181_v9 = vsel %vm2089_vm11, 0.0, %v176_v34  ;;  %v169_v10 = vsel %vm2056_vm8, 0.0, %v167_v13  ;;  %v3359_v1 = vmax.f32 %v168_v35, %v180_v49  ;;  %v4546_v35 = vld [vmem:[#allocation54_spill] sm:$0xff]  ;;  %v4568_v49 = vld [vmem:[#allocation133_spill] sm:$0xff] }
 0x16f   :  { %vm814_vm14 = vcmp.eq.f32.partialorder %v812_v47, 0.0  ;;  %vm815_vm15 = vcmp.eq.f32.partialorder %v813_v36, 0.0  ;;  %v3355_v24 = vadd.f32 %v873_v32, %v871_v19  ;;  %v4543_v53 = vsub.f32 %v4511_v51, %v3280_v20  ;;  %v3379_v51 = vpop.eup %1627  ;;  %v4547_v4 = vld [vmem:[#allocation30_spill] sm:$0xff]  ;;  %v4570_v19 = vld [vmem:[#allocation104_spill] sm:$0xff] }
 0x170   :  { %4542 = vst [vmem:[#allocation15_spill] sm:$0xff] %v3359_v1  ;;  %v816_v21 = vsel %vm814_vm14, 1.0, %v812_v47  ;;  %v3367_v42 = vmax.f32 %v169_v10, %v181_v9  ;;  %v1080_v34 = vsel %vm175_vm9, %v1079_v5, %v3252_v16  ;;  %v817_v50 = vsel %vm815_vm15, 1.0, %v813_v36  ;;  %v4557_v9 = vld [vmem:[#allocation108_spill] sm:$0xff] }
 0x171   :  { %4540 = vst [vmem:[#allocation14_spill] sm:$0xff] %v3355_v24  ;;  %v3365_v56 = vadd.f32 %v3295_v0, %v4543_v53  ;;  %v3372_v61 = vmul.f32 %v856_v31, %v4533_v2  ;;  %v3375_v13 = vmul.f32 %v857_v26, %v4536_v3  ;;  %v1083_v20 = vsel %vm175_vm9, %v3252_v16, %v1079_v5  ;;  %v4545_v0 = vld [vmem:[#allocation49_spill] sm:$0xff]  ;;  %v1381_v2 = vpop.permute.xlu0 %1380  ;;  %v3391_v3 = vpop.eup %1629 }
 0x172   :  { %4544 = vst [vmem:[#allocation19_spill] sm:$0xff] %v3367_v42  ;;  %v186_v47 = vmax.f32 %v3359_v1, %v4545_v0  ;;  %v187_v15 = vmax.f32 %v3367_v42, %v4546_v35  ;;  %v1084_v36 = vsel %vm2070_vm10, %v4547_v4, %v1083_v20  ;;  %v4548_v31 = vld [vmem:[#allocation29_spill] sm:$0xff]  ;;  %1631 = vrcp.f32 %v816_v21  ;;  %v4551_v4 = vld [vmem:[#allocation40_spill] sm:$0xff]  ;;  %v4569_v1 = vld [vmem:[#allocation107_spill] sm:$0xff] }
 0x173   :  { %v1085_v26 = vsel %vm2089_vm11, %v4548_v31, %v1080_v34  ;;  %v1086_v16 = vadd.f32 %v1084_v36, %v3223_v12  ;;  %v3397_v32 = vsel %vm162_vm6, %v3316_v23, %v223_v63  ;;  %1633 = vrcp.f32 %v817_v50  ;;  %v4560_v0 = vld [vmem:[#allocation64_spill] sm:$0xff] }
 0x174   :  { %v1087_v5 = vadd.f32 %v1085_v26, %v3226_v28  ;;  %v3405_v10 = vsel %vm162_vm6, %v223_v63, %v3316_v23  ;;  %v1382_v12 = vsel %vm175_vm9, %v1381_v2, %v1378_v25  ;;  %v1385_v28 = vsel %vm175_vm9, %v1378_v25, %v1381_v2  ;;  %v4555_v2 = vld [vmem:[#allocation93_spill] sm:$0xff]  ;;  %v4567_v42 = vld [vmem:[#allocation96_spill] sm:$0xff] }
 0x175   :  { %v1088_v53 = vmul.f32 0.25, %v1086_v16  ;;  %v3409_v34 = vmax.f32 %v186_v47, 0.0  ;;  %v3411_v20 = vmax.f32 %v187_v15, 0.0  ;;  %v1386_v36 = vsel %vm2070_vm10, %v4551_v4, %v1385_v28  ;;  %v4552_v47 = vld [vmem:[#allocation38_spill] sm:$0xff]  ;;  %v4558_v28 = vld [vmem:[#allocation109_spill] sm:$0xff] }
 0x176   :  { %v1089_v21 = vmul.f32 0.25, %v1087_v5  ;;  %v1387_v15 = vsel %vm2089_vm11, %v4552_v47, %v1382_v12  ;;  %v3427_v31 = vmul.f32 %v3379_v51, %v3266_v58  ;;  %v3431_v26 = vmul.f32 %v3391_v3, %v3278_v48  ;;  %v4556_v5 = vld [vmem:[#allocation63_spill] sm:$0xff]  ;;  %v4559_v4 = vld [vmem:[#allocation94_spill] sm:$0xff]  ;;  %v4562_v58 = vld [vmem:[#allocation48_spill] sm:$0xff] }
 0x177   :  { %v1134_v23 = vadd.f32 6.221088e-08, %v1088_v53  ;;  %v1138_v35 = vadd.f32 7.853586e-08, %v1088_v53  ;;  %v4561_v47 = vld [vmem:[#allocation47_spill] sm:$0xff]  ;;  %v4564_v48 = vld [vmem:[#allocation132_spill] sm:$0xff] }
 0x178   :  { %v1135_v63 = vadd.f32 6.221088e-08, %v1089_v21  ;;  %v1139_v25 = vadd.f32 7.853586e-08, %v1089_v21  ;;  %4553 = vst [vmem:[#allocation18_spill] sm:$0xff] %v3427_v31  ;;  %4554 = vst [vmem:[#allocation81_spill] sm:$0xff] %v3431_v26 }
 0x179   :  { %v1156_v16 = vmul.f32 %v4555_v2, %v1138_v35  ;;  %v1162_v53 = vmul.f32 %v4556_v5, %v1138_v35  ;;  %v1194_v43 = vmul.f32 %v4557_v9, %v1134_v23  ;;  %v1216_v50 = vmul.f32 %v1138_v35, %v4561_v47 }
 0x17a   :  { %v1195_v21 = vmul.f32 %v4558_v28, %v1135_v63  ;;  %v1157_v8 = vmul.f32 %v4559_v4, %v1139_v25  ;;  %v1163_v12 = vmul.f32 %v4560_v0, %v1139_v25  ;;  %v1217_v7 = vmul.f32 %v1139_v25, %v4562_v58  ;;  %v4571_v25 = vld [vmem:[#allocation68_spill] sm:$0xff] }
 0x17b   :  { %v1160_v62 = vsub.f32 %v1156_v16, %v4563_v52  ;;  %v1166_v30 = vsub.f32 %v1162_v53, %v4564_v48  ;;  %v1196_v2 = vsub.f32 %v4565_v39, %v1194_v43  ;;  %v1220_v4 = vsub.f32 %v1216_v50, %v4569_v1  ;;  %v4573_v52 = vld [vmem:[#allocation103_spill] sm:$0xff]  ;;  %v4576_v1 = vld [vmem:[#allocation116_spill] sm:$0xff]  ;;  %v4579_v53 = vld [vmem:[#allocation122_spill] sm:$0xff] }
 0x17c   :  { %v1197_v5 = vsub.f32 %v4566_v6, %v1195_v21  ;;  %v1161_v9 = vsub.f32 %v1157_v8, %v4567_v42  ;;  %v1167_v28 = vsub.f32 %v1163_v12, %v4568_v49  ;;  %v1221_v0 = vsub.f32 %v1217_v7, %v4570_v19  ;;  %v3449_v26 = vpop.eup %1631  ;;  %v4575_v42 = vld [vmem:[#allocation115_spill] sm:$0xff]  ;;  %v4578_v19 = vld [vmem:[#allocation125_spill] sm:$0xff]  ;;  %v4580_v12 = vld [vmem:[#allocation124_spill] sm:$0xff] }
 0x17d   :  { %v1170_v35 = vmul.f32 %v1160_v62, %v1134_v23  ;;  %v3452_v58 = vadd.f32 %v4571_v25, %v1196_v2  ;;  %v1388_v39 = vadd.f32 %v1386_v36, %v3259_v38  ;;  %v3458_v6 = vpop.eup %1633  ;;  %v3461_v43 = vmul.f32 %v1160_v62, %v4575_v42  ;;  %v4582_v36 = vld [vmem:[#allocation72_spill] sm:$0xff] }
 0x17e   :  { %v3455_v16 = vadd.f32 %v4573_v52, %v1197_v5  ;;  %v1171_v8 = vmul.f32 %v1161_v9, %v1135_v63  ;;  %v3464_v49 = vmul.f32 %v1161_v9, %v4576_v1  ;;  %v1389_v7 = vadd.f32 %v1387_v15, %v3262_v37  ;;  %v4581_v5 = vld [vmem:[#allocation117_spill] sm:$0xff]  ;;  %v4602_v52 = vld [vmem:[#allocation135_spill] sm:$0xff]  ;;  %v4603_v25 = vld [vmem:[#allocation76_spill] sm:$0xff] }
 0x17f   :  { %4572 = vst [vmem:[#allocation82_spill] sm:$0xff] %v3452_v58  ;;  %v1172_v50 = vsub.f32 %v4578_v19, %v1170_v35  ;;  %v1174_v21 = vmul.f32 %v1166_v30, %v4579_v53  ;;  %v1175_v48 = vmul.f32 %v1167_v28, %v4580_v12  ;;  %v1232_v2 = vmul.f32 %v1220_v4, %v1134_v23  ;;  %v4585_v19 = vld [vmem:[#allocation157_spill] sm:$0xff] }
 0x180   :  { %4574 = vst [vmem:[#allocation16_spill] sm:$0xff] %v3455_v16  ;;  %4577 = vst [vmem:[#allocation17_spill] sm:$0xff] %v3464_v49  ;;  %v1173_v38 = vsub.f32 %v4581_v5, %v1171_v8  ;;  %v1233_v47 = vmul.f32 %v1221_v0, %v1135_v63  ;;  %v4584_v16 = vld [vmem:[#allocation156_spill] sm:$0xff]  ;;  %v1236_v37 = vmul.f32 %v1166_v30, %v4575_v42  ;;  %v1390_v23 = vmul.f32 0.25, %v1388_v39  ;;  %v4605_v42 = vld [vmem:[#allocation61_spill] sm:$0xff] }
 0x181   :  { %v1176_v9 = vadd.f32 %v1174_v21, %v1172_v50  ;;  %v1234_v58 = vsub.f32 %v4584_v16, %v1232_v2  ;;  %v1237_v15 = vmul.f32 %v1167_v28, %v4576_v1  ;;  %v1391_v24 = vmul.f32 0.25, %v1389_v7  ;;  %v4592_v21 = vld [vmem:[#allocation52_spill] sm:$0xff]  ;;  %v4604_v1 = vld [vmem:[#allocation127_spill] sm:$0xff] }
 0x182   :  { %v1177_v35 = vadd.f32 %v1175_v48, %v1173_v38  ;;  %v1235_v31 = vsub.f32 %v4585_v19, %v1233_v47  ;;  %v4587_v5 = vsub.f32 %v2980_v60, %v3270_v22  ;;  %v4588_v16 = vsub.f32 %v2966_v46, %v3273_v18  ;;  %v4595_v38 = vld [vmem:[#allocation50_spill] sm:$0xff]  ;;  %v4619_v49 = vld [vmem:[#allocation71_spill] sm:$0xff] }
 0x183   :  { %vm1178_vm0 = vcmp.eq.f32.partialorder %v1176_v9, 0.0  ;;  %v3479_v8 = vadd.f32 %v1236_v37, %v1234_v58  ;;  %v3492_v28 = vmul.f32 %v1220_v4, %v4579_v53  ;;  %v1406_v39 = vadd.f32 6.221088e-08, %v1390_v23  ;;  %v4593_v4 = vld [vmem:[#allocation69_spill] sm:$0xff] }
 0x184   :  { %v496_v63 = vadd.f32 %v3283_v45, %v4587_v5  ;;  %v3489_v30 = vadd.f32 %v3286_v40, %v4588_v16  ;;  %vm1179_vm1 = vcmp.eq.f32.partialorder %v1177_v35, 0.0  ;;  %v3494_v47 = vadd.f32 %v1237_v15, %v1235_v31  ;;  %v4591_v40 = vld [vmem:[#allocation110_spill] sm:$0xff]  ;;  %v4594_v31 = vld [vmem:[#allocation111_spill] sm:$0xff]  ;;  %v4601_v16 = vld [vmem:[#allocation60_spill] sm:$0xff] }
 0x185   :  { %4586 = vst [vmem:[#allocation128_spill] sm:$0xff] %v3479_v8  ;;  %v3497_v58 = vmul.f32 %v1221_v0, %v4580_v12  ;;  %v1407_v7 = vadd.f32 6.221088e-08, %v1391_v24  ;;  %v1410_v60 = vadd.f32 7.853586e-08, %v1390_v23  ;;  %v1180_v45 = vsel %vm1178_vm0, 1.0, %v1176_v9 }
 0x186   :  { %4589 = vst [vmem:[#allocation131_spill] sm:$0xff] %v3494_v47  ;;  %v3500_v22 = vmul.f32 %v3379_v51, %v496_v63  ;;  %v1181_v46 = vsel %vm1179_vm1, 1.0, %v1177_v35  ;;  %v1411_v18 = vadd.f32 7.853586e-08, %v1391_v24  ;;  %v1466_v50 = vmul.f32 %v4591_v40, %v1406_v39  ;;  %v4596_v0 = vld [vmem:[#allocation53_spill] sm:$0xff]  ;;  %v4597_v15 = vld [vmem:[#allocation70_spill] sm:$0xff] }
 0x187   :  { %4590 = vst [vmem:[#allocation37_spill] sm:$0xff] %v3497_v58  ;;  %v1428_v48 = vmul.f32 %v4592_v21, %v1410_v60  ;;  %v1434_v53 = vmul.f32 %v4593_v4, %v1410_v60  ;;  %v1467_v2 = vmul.f32 %v4594_v31, %v1407_v7  ;;  %v1488_v37 = vmul.f32 %v1410_v60, %v4595_v38  ;;  %v4598_v23 = vld [vmem:[#allocation134_spill] sm:$0xff]  ;;  %v4599_v63 = vld [vmem:[#allocation51_spill] sm:$0xff]  ;;  %v4600_v35 = vld [vmem:[#allocation65_spill] sm:$0xff] }
 0x188   :  { %v1429_v12 = vmul.f32 %v4596_v0, %v1411_v18  ;;  %v1435_v19 = vmul.f32 %v4597_v15, %v1411_v18  ;;  %v1468_v5 = vsub.f32 %v4598_v23, %v1466_v50  ;;  %v1489_v9 = vmul.f32 %v1411_v18, %v4599_v63  ;;  %v4606_v38 = vld [vmem:[#allocation74_spill] sm:$0xff]  ;;  %v4609_v18 = vld [vmem:[#allocation75_spill] sm:$0xff] }
 0x189   :  { %v1432_v24 = vsub.f32 %v1428_v48, %v4600_v35  ;;  %v1438_v40 = vsub.f32 %v1434_v53, %v4601_v16  ;;  %v1469_v21 = vsub.f32 %v4602_v52, %v1467_v2  ;;  %v1492_v4 = vsub.f32 %v1488_v37, %v4603_v25  ;;  %v4608_v15 = vld [vmem:[#allocation130_spill] sm:$0xff]  ;;  %v4611_v48 = vld [vmem:[#allocation77_spill] sm:$0xff]  ;;  %v235_v35 = vpop.permute.xlu1 %234  ;;  %v232_v52 = vpop.permute.xlu0 %231 }
 0x18a   :  { %v1433_v31 = vsub.f32 %v1429_v12, %v4604_v1  ;;  %v1439_v60 = vsub.f32 %v1435_v19, %v4605_v42  ;;  %v3518_v0 = vadd.f32 %v4606_v38, %v1468_v5  ;;  %v1493_v47 = vsub.f32 %v1489_v9, %v4608_v15  ;;  %v4612_v25 = vld [vmem:[#allocation126_spill] sm:$0xff]  ;;  %v4613_v1 = vld [vmem:[#allocation129_spill] sm:$0xff]  ;;  %v4615_v38 = vld [vmem:[#allocation79_spill] sm:$0xff] }
 0x18b   :  { %1635 = vrcp.f32 %v1180_v45  ;;  %v1442_v50 = vmul.f32 %v1432_v24, %v1406_v39  ;;  %v3522_v23 = vadd.f32 %v4609_v18, %v1469_v21  ;;  %v1484_v53 = vmul.f32 %v1432_v24, %v4611_v48  ;;  %v4614_v42 = vld [vmem:[#allocation42_spill] sm:$0xff]  ;;  %v4616_v16 = vld [vmem:[#allocation41_spill] sm:$0xff]  ;;  %v4617_v21 = vld [vmem:[#allocation80_spill] sm:$0xff] }
 0x18c   :  { %4607 = vst [vmem:[#allocation39_spill] sm:$0xff] %v3518_v0  ;;  %v1443_v2 = vmul.f32 %v1433_v31, %v1407_v7  ;;  %v1446_v37 = vmul.f32 %v1438_v40, %v4612_v25  ;;  %v1447_v12 = vmul.f32 %v1439_v60, %v4613_v1  ;;  %v1485_v19 = vmul.f32 %v1433_v31, %v4614_v42  ;;  %v4618_v63 = vld [vmem:[#allocation66_spill] sm:$0xff] }
 0x18d   :  { %4610 = vst [vmem:[#allocation21_spill] sm:$0xff] %v3522_v23  ;;  %v1444_v5 = vsub.f32 %v4615_v38, %v1442_v50  ;;  %v1486_v9 = vsub.f32 %v4616_v16, %v1484_v53  ;;  %v1494_v45 = vmul.f32 %v1492_v4, %v4612_v25  ;;  %v1504_v15 = vmul.f32 %v1492_v4, %v1406_v39  ;;  %v4620_v53 = vld [vmem:[#allocation139_spill] sm:$0xff] }
 0x18e   :  { %v1445_v18 = vsub.f32 %v4617_v21, %v1443_v2  ;;  %v1487_v24 = vsub.f32 %v4618_v63, %v1485_v19  ;;  %v1495_v23 = vmul.f32 %v1493_v47, %v4613_v1  ;;  %v1505_v0 = vmul.f32 %v1493_v47, %v1407_v7  ;;  %v615_v7 = vpop.permute.xlu1 %614  ;;  %v613_v2 = vpop.permute.xlu0 %612 }
 0x18f   :  { %v1448_v8 = vadd.f32 %v1446_v37, %v1444_v5  ;;  %v3534_v58 = vadd.f32 %v1494_v45, %v1486_v9  ;;  %v1506_v62 = vsub.f32 %v4619_v49, %v1504_v15  ;;  %v1508_v31 = vmul.f32 %v1438_v40, %v4611_v48 }
 0x190   :  { %v1449_v50 = vadd.f32 %v1447_v12, %v1445_v18  ;;  %v3538_v38 = vadd.f32 %v1495_v23, %v1487_v24  ;;  %v1507_v25 = vsub.f32 %v4620_v53, %v1505_v0  ;;  %v1509_v39 = vmul.f32 %v1439_v60, %v4614_v42  ;;  %v4634_v53 = vld [vmem:[#allocation18_spill] sm:$0xff] }
 0x191   :  { %vm1450_vm2 = vcmp.eq.f32.partialorder %v1448_v8, 0.0  ;;  %v3542_v4 = vadd.f32 %v1508_v31, %v1506_v62  ;;  %v236_v63 = vsel %vm175_vm9, %v235_v35, %v232_v52  ;;  %v239_v47 = vsel %vm175_vm9, %v232_v52, %v235_v35  ;;  %v4628_v31 = vld [vmem:[#allocation14_spill] sm:$0xff] }
 0x192   :  { %vm1451_vm3 = vcmp.eq.f32.partialorder %v1449_v50, 0.0  ;;  %v1452_v49 = vsel %vm1450_vm2, 1.0, %v1448_v8  ;;  %v3546_v37 = vadd.f32 %v1509_v39, %v1507_v25  ;;  %v240_v40 = vsel %vm2070_vm10, 0.0, %v239_v47 }
 0x193   :  { %1637 = vrcp.f32 %v1181_v46  ;;  %v499_v60 = vmul.f32 %v3391_v3, %v3489_v30  ;;  %v241_v62 = vsel %vm2089_vm11, 0.0, %v236_v63  ;;  %v4621_v0 = vsel %vm2052_vm7, 0.0, %v3397_v32  ;;  %v4623_v32 = vld [vmem:[#allocation78_spill] sm:$0xff]  ;;  %v4669_v59 = vld [vmem:[#allocation39_spill] sm:$0xff] }
 0x194   :  { %v242_v23 = vmax.f32 %v4621_v0, %v240_v40  ;;  %v512_v8 = vmul.f32 %v3379_v51, %v3299_v55  ;;  %v513_v35 = vmul.f32 %v3391_v3, %v3365_v56  ;;  %v4622_v46 = vsel %vm2056_vm8, 0.0, %v3405_v10  ;;  %v4624_v51 = vld [vmem:[#allocation86_spill] sm:$0xff]  ;;  %v4625_v56 = vld [vmem:[#allocation56_spill] sm:$0xff]  ;;  %v4670_v14 = vld [vmem:[#allocation21_spill] sm:$0xff] }
 0x195   :  { %v243_v52 = vmax.f32 %v4622_v46, %v241_v62  ;;  %v3567_v30 = vsel %vm162_vm6, %v613_v2, %v615_v7  ;;  %v3569_v1 = vpop.eup %1635  ;;  %v1453_v12 = vsel %vm1451_vm3, 1.0, %v1449_v50  ;;  %1639 = vrcp.f32 %v1452_v49  ;;  %v3613_v50 = vld [vmem:[#allocation5] sm:$0xff] }
 0x196   :  { %v3572_v19 = vmax.f32 %v4623_v32, %v242_v23  ;;  %v620_v55 = vsel %vm162_vm6, %v615_v7, %v613_v2  ;;  %v246_v3 = vmax.f32 %v242_v23, %v4625_v56  ;;  %v3581_v10 = vmul.f32 %v3449_v26, %v3321_v27  ;;  %v624_v32 = vpop.permute.xlu0 %623 }
 0x197   :  { %v3576_v5 = vmax.f32 %v4624_v51, %v243_v52  ;;  %v3585_v16 = vmul.f32 %v3458_v6, %v3325_v57  ;;  %v621_v45 = vsel %vm2052_vm7, 0.0, %v3567_v30  ;;  %v4626_v15 = vsub.f32 %v4534_v11, %v3328_v29  ;;  %v4629_v11 = vld [vmem:[#allocation22_spill] sm:$0xff]  ;;  %v627_v30 = vpop.permute.xlu1 %626 }
 0x198   :  { %v250_v9 = vmax.f32 %v3409_v34, %v3572_v19  ;;  %v4627_v27 = vsub.f32 %v4537_v44, %v3331_v54  ;;  %v622_v34 = vsel %vm2056_vm8, 0.0, %v620_v55  ;;  %v3606_v24 = vmul.f32 %v3449_v26, %v3349_v33  ;;  %v3626_v33 = vld [vmem:[#allocation5 + $0x8] sm:$0xff] }
 0x199   :  { %v860_v21 = vadd.f32 %v3372_v61, %v4626_v15  ;;  %v251_v57 = vmax.f32 %v3411_v20, %v3576_v5  ;;  %v3610_v29 = vmul.f32 %v3458_v6, %v4628_v31  ;;  %v247_v61 = vmax.f32 %v243_v52, %v4629_v11  ;;  %v4636_v31 = vld [vmem:[#allocation55_spill] sm:$0xff] }
 0x19a   :  { %v861_v18 = vadd.f32 %v3375_v13, %v4627_v27  ;;  %vm3616_vm4 = vcmp.gt.f32.partialorder %v3613_v50, %v250_v9  ;;  %1641 = vrcp.f32 %v1453_v12  ;;  %v4190_v15 = vmov 0.0   ;;  %v4637_v11 = vld [vmem:[#allocation15_spill] sm:$0xff] }
 0x19b   :  { %v3621_v44 = vmul.f32 %v3449_v26, %v860_v21  ;;  %vm3629_vm5 = vcmp.gt.f32.partialorder %v3626_v33, %v251_v57  ;;  %v514_v25 = vsel %vm3616_vm4, %v4634_v53, 0.0  ;;  %v516_v39 = vsel %vm3616_vm4, %v3500_v22, 0.0 }
 0x19c   :  { %v3624_v13 = vmul.f32 %v3458_v6, %v861_v18  ;;  %v518_v26 = vsel %vm3616_vm4, %v512_v8, 0.0  ;;  %v4635_v6 = vld [vmem:[#allocation81_spill] sm:$0xff]  ;;  %v517_v47 = vsel %vm3629_vm5, %v499_v60, 0.0  ;;  %v519_v7 = vsel %vm3629_vm5, %v513_v35, 0.0 }
 0x19d   :  { %v515_v63 = vsel %vm3629_vm5, %v4635_v6, 0.0  ;;  %v520_v2 = vsub.f32 0.0, %v514_v25  ;;  %v522_v40 = vsub.f32 0.0, %v516_v39  ;;  %v523_v62 = vsub.f32 0.0, %v517_v47  ;;  %v3648_v23 = vpop.eup %1637  ;;  %v4639_v25 = vld [vmem:[#allocation73_spill] sm:$0xff]  ;;  %v4640_v39 = vld [vmem:[#allocation19_spill] sm:$0xff] }
 0x19e   :  { %v521_v49 = vsub.f32 0.0, %v515_v63  ;;  %v524_v0 = vsub.f32 0.0, %v518_v26  ;;  %v525_v22 = vsub.f32 0.0, %v519_v7  ;;  %v640_v8 = vmax.f32 %v246_v3, 0.0 }
 0x19f   :  { %v526_v46 = vand.u32 2147483647, %v520_v2  ;;  %v641_v52 = vmax.f32 %v247_v61, 0.0  ;;  %v528_v51 = vand.u32 2147483647, %v522_v40  ;;  %v3650_v56 = vpop.eup %1639  ;;  %v1610_v21 = vsel %vm3616_vm4, 1.0, %v4190_v15 }
 0x1a0   :  { %v527_v55 = vand.u32 2147483647, %v521_v49  ;;  %v529_v60 = vand.u32 2147483647, %v523_v62  ;;  %v532_v35 = vand.u32 2147483647, %v524_v0  ;;  %v628_v12 = vsel %vm175_vm9, %v627_v30, %v624_v32 }
 0x1a1   :  { %v533_v9 = vand.u32 2147483647, %v525_v22  ;;  %v1611_v3 = vsel %vm3629_vm5, 1.0, %v4190_v15  ;;  %v530_v27 = vmax.f32.f32 %v526_v46, %v528_v51  ;;  %v631_v57 = vsel %vm175_vm9, %v624_v32, %v627_v30  ;;  %v4655_v15 = vld [vmem:[#allocation112_spill] sm:$0xff] }
 0x1a2   :  { %v531_v18 = vmax.f32.f32 %v527_v55, %v529_v60  ;;  %v4638_v61 = vmax.f32 %v4636_v31, %v4637_v11  ;;  %v4641_v26 = vmax.f32 %v4639_v25, %v4640_v39  ;;  %v632_v54 = vsel %vm2070_vm10, 0.0, %v631_v57  ;;  %v4644_v60 = vld [vmem:[#allocation98_spill] sm:$0xff]  ;;  %v4646_v11 = vld [vmem:[#allocation31_spill] sm:$0xff]  ;;  %v4647_v25 = vld [vmem:[#allocation44_spill] sm:$0xff] }
 0x1a3   :  { %v633_v20 = vsel %vm2089_vm11, 0.0, %v628_v12  ;;  %v534_v63 = vmax.f32.f32 %v530_v27, %v532_v35  ;;  %v3670_v7 = vmax.f32 %v621_v45, %v632_v54  ;;  %v3674_v30 = vmul.f32 10.0, %v1610_v21  ;;  %v977_v21 = vpop.permute.xlu0 %976 }
 0x1a4   :  { %v642_v53 = vmax.f32 %v640_v8, %v4638_v61  ;;  %v643_v6 = vmax.f32 %v641_v52, %v4641_v26  ;;  %v535_v47 = vmax.f32.f32 %v531_v18, %v533_v9  ;;  %v3672_v46 = vmax.f32 %v622_v34, %v633_v20  ;;  %v4642_v8 = vld [vmem:[#allocation82_spill] sm:$0xff]  ;;  %v4643_v52 = vld [vmem:[#allocation16_spill] sm:$0xff]  ;;  %v4645_v34 = vld [vmem:[#allocation97_spill] sm:$0xff]  ;;  %v979_v9 = vpop.permute.xlu1 %978 }
 0x1a5   :  { %v3676_v32 = vmul.f32 10.0, %v1611_v3  ;;  %v3680_v55 = vmul.f32 %v3569_v1, %v4642_v8  ;;  %v3684_v51 = vmul.f32 %v3648_v23, %v4643_v52  ;;  %vm536_vm12 = vcmp.gt.f32.partialorder %v534_v63, 0.7  ;;  %v4648_v26 = vld [vmem:[#allocation67_spill] sm:$0xff]  ;;  %v4649_v20 = vld [vmem:[#allocation138_spill] sm:$0xff]  ;;  %v4652_v8 = vld [vmem:[#allocation45_spill] sm:$0xff] }
 0x1a6   :  { %vm537_vm13 = vcmp.gt.f32.partialorder %v535_v47, 0.7  ;;  %v3688_v45 = vmax.f32 %v4644_v60, %v3670_v7  ;;  %v3692_v35 = vmax.f32 %v4645_v34, %v3672_v46  ;;  %v538_v3 = vsel %vm536_vm12, 0.0, %v520_v2  ;;  %v4653_v60 = vld [vmem:[#allocation46_spill] sm:$0xff] }
 0x1a7   :  { %v539_v27 = vsel %vm537_vm13, 0.0, %v521_v49  ;;  %v540_v18 = vsel %vm536_vm12, 0.0, %v522_v40  ;;  %v541_v12 = vsel %vm537_vm13, 0.0, %v523_v62  ;;  %v542_v57 = vsel %vm536_vm12, 0.0, %v524_v0  ;;  %v3704_v49 = vpop.eup %1641  ;;  %v4650_v40 = vld [vmem:[#allocation121_spill] sm:$0xff]  ;;  %v4651_v0 = vld [vmem:[#allocation123_spill] sm:$0xff] }
 0x1a8   :  { %v543_v31 = vsel %vm537_vm13, 0.0, %v525_v22  ;;  %v544_v61 = vmul.f32 %v538_v3, %v4646_v11  ;;  %v545_v39 = vmul.f32 %v539_v27, %v4647_v25  ;;  %v546_v54 = vmul.f32 %v540_v18, %v4648_v26  ;;  %570 = vst [vmem:[#allocation8] sm:$0xff] %v542_v57  ;;  %v4654_v26 = vld [vmem:[#allocation32_spill] sm:$0xff] }
 0x1a9   :  { %v547_v63 = vmul.f32 %v541_v12, %v4649_v20  ;;  %571 = vst [vmem:[#allocation8 + $0x8] sm:$0xff] %v543_v31  ;;  %v3699_v47 = vsel %vm162_vm6, %v977_v21, %v979_v9  ;;  %v3702_v2 = vsel %vm162_vm6, %v979_v9, %v977_v21  ;;  %v572_v62 = vadd.f32 %v540_v18, %v4650_v40 }
 0x1aa   :  { %v573_v22 = vadd.f32 %v541_v12, %v4651_v0  ;;  %v576_v52 = vadd.f32 %v538_v3, %v4652_v8  ;;  %v577_v34 = vadd.f32 %v539_v27, %v4653_v60  ;;  %v548_v11 = vadd.f32 %v546_v54, %v544_v61  ;;  %v4657_v27 = vld [vmem:[#allocation155_spill] sm:$0xff]  ;;  %v4658_v12 = vld [vmem:[#allocation17_spill] sm:$0xff] }
 0x1ab   :  { %v549_v25 = vadd.f32 %v547_v63, %v545_v39  ;;  %v550_v20 = vmul.f32 %v542_v57, %v4654_v26  ;;  %v551_v42 = vmul.f32 %v543_v31, %v4655_v15  ;;  %574 = vst [vmem:[#allocation8 + $0x40] sm:$0xff] %v572_v62  ;;  %v644_v9 = vmax.f32 %v642_v53, %v3688_v45  ;;  %v4660_v39 = vld [vmem:[#allocation37_spill] sm:$0xff]  ;;  %v4661_v31 = vld [vmem:[#allocation27_spill] sm:$0xff]  ;;  %v4662_v62 = vld [vmem:[#allocation28_spill] sm:$0xff] }
 0x1ac   :  { %575 = vst [vmem:[#allocation8 + $0x48] sm:$0xff] %v573_v22  ;;  %578 = vst [vmem:[#allocation8 + $0x80] sm:$0xff] %v576_v52  ;;  %v645_v21 = vmax.f32 %v643_v6, %v3692_v35  ;;  %v4656_v18 = vsub.f32 %v4582_v36, %v3461_v43  ;;  %v4659_v61 = vsub.f32 %v4657_v27, %v4658_v12  ;;  %v3726_v22 = vld [vmem:[#allocation5 + $0x10] sm:$0xff]  ;;  %v3733_v36 = vld [vmem:[#allocation5 + $0x18] sm:$0xff] }
 0x1ad   :  { %579 = vst [vmem:[#allocation8 + $0x88] sm:$0xff] %v577_v34  ;;  %v552_v54 = vadd.f32 %v550_v20, %v548_v11  ;;  %v553_v15 = vadd.f32 %v551_v42, %v549_v25  ;;  %v638_v63 = vmax.f32 %v3670_v7, %v4661_v31  ;;  %v639_v53 = vmax.f32 %v3672_v46, %v4662_v62  ;;  %v991_v62 = vpop.permute.xlu1 %990 }
 0x1ae   :  { %v1224_v3 = vadd.f32 %v3492_v28, %v4656_v18  ;;  %v1225_v57 = vadd.f32 %v4660_v39, %v4659_v61  ;;  %vm3729_vm6 = vcmp.gt.f32.partialorder %v3726_v22, %v644_v9  ;;  %vm3736_vm14 = vcmp.gt.f32.partialorder %v3733_v36, %v645_v21 }
 0x1af   :  { %v554_v7 = vmul.f32 0.5, %v552_v54  ;;  %v555_v46 = vmul.f32 0.5, %v553_v15  ;;  %v878_v52 = vsel %vm3729_vm6, %v3581_v10, 0.0  ;;  %v879_v34 = vsel %vm3736_vm14, %v3585_v16, 0.0 }
 0x1b0   :  { %v3741_v42 = vmul.f32 %v3569_v1, %v1224_v3  ;;  %v3744_v6 = vmul.f32 %v3648_v23, %v1225_v57  ;;  %v880_v11 = vsel %vm3729_vm6, %v3621_v44, 0.0  ;;  %v881_v25 = vsel %vm3736_vm14, %v3624_v13, 0.0 }
 0x1b1   :  { %v882_v26 = vsel %vm3729_vm6, %v3606_v24, 0.0  ;;  %v883_v10 = vsel %vm3736_vm14, %v3610_v29, 0.0  ;;  %v556_v20 = vadd.f32 %v3613_v50, %v554_v7  ;;  %v557_v16 = vadd.f32 %v3626_v33, %v555_v46  ;;  %v988_v7 = vpop.permute.xlu0 %987  ;;  %v4667_v46 = vld [vmem:[#allocation128_spill] sm:$0xff] }
 0x1b2   :  { %v884_v9 = vsub.f32 0.0, %v878_v52  ;;  %v885_v21 = vsub.f32 0.0, %v879_v34  ;;  %v886_v18 = vsub.f32 0.0, %v880_v11  ;;  %v887_v44 = vsub.f32 0.0, %v881_v25 }
 0x1b3   :  { %v888_v3 = vsub.f32 0.0, %v882_v26  ;;  %v889_v27 = vsub.f32 0.0, %v883_v10  ;;  %v564_v13 = vadd.f32 %v3674_v30, %v556_v20  ;;  %v565_v12 = vadd.f32 %v3676_v32, %v557_v16 }
 0x1b4   :  { %v890_v61 = vand.u32 2147483647, %v884_v9  ;;  %v891_v24 = vand.u32 2147483647, %v885_v21  ;;  %v892_v39 = vand.u32 2147483647, %v886_v18  ;;  %v3796_v25 = vmul.f32 %v3650_v56, %v3534_v58 }
 0x1b5   :  { %v893_v57 = vand.u32 2147483647, %v887_v44  ;;  %566 = vst [vmem:[#allocation7] sm:$0xff] %v564_v13  ;;  %567 = vst [vmem:[#allocation7 + $0x8] sm:$0xff] %v565_v12  ;;  %v3768_v29 = vmax.f32 %v638_v63, 0.0  ;;  %v3770_v50 = vmax.f32 %v639_v53, 0.0  ;;  %v3780_v63 = vmul.f32 %v3569_v1, %v4667_v46 }
 0x1b6   :  { %v985_v33 = vsel %vm2052_vm7, 0.0, %v3699_v47  ;;  %v986_v30 = vsel %vm2056_vm8, 0.0, %v3702_v2  ;;  %v894_v54 = vmax.f32.f32 %v890_v61, %v892_v39  ;;  %v896_v15 = vand.u32 2147483647, %v888_v3  ;;  %v4668_v53 = vld [vmem:[#allocation131_spill] sm:$0xff] }
 0x1b7   :  { %v895_v32 = vmax.f32.f32 %v891_v24, %v893_v57  ;;  %v897_v31 = vand.u32 2147483647, %v889_v27  ;;  %v3784_v52 = vmul.f32 %v3648_v23, %v4668_v53  ;;  %v3788_v47 = vmul.f32 %v3650_v56, %v4669_v59  ;;  %v4672_v24 = vld [vmem:[#allocation114_spill] sm:$0xff]  ;;  %v4673_v57 = vld [vmem:[#allocation91_spill] sm:$0xff] }
 0x1b8   :  { %v3792_v2 = vmul.f32 %v3704_v49, %v4670_v14  ;;  %v898_v34 = vmax.f32.f32 %v894_v54, %v896_v15  ;;  %v3800_v1 = vmul.f32 %v3704_v49, %v3538_v38  ;;  %v3804_v23 = vmul.f32 %v3650_v56, %v3542_v4 }
 0x1b9   :  { %v899_v11 = vmax.f32.f32 %v895_v32, %v897_v31  ;;  %v3808_v26 = vmul.f32 %v3704_v49, %v3546_v37  ;;  %v992_v10 = vsel %vm175_vm9, %v991_v62, %v988_v7  ;;  %v995_v20 = vsel %vm175_vm9, %v988_v7, %v991_v62  ;;  %v4671_v37 = vld [vmem:[#allocation113_spill] sm:$0xff]  ;;  %v4674_v32 = vld [vmem:[#allocation92_spill] sm:$0xff]  ;;  %v4675_v31 = vld [vmem:[#allocation87_spill] sm:$0xff] }
 0x1ba   :  { %vm900_vm7 = vcmp.gt.f32.partialorder %v898_v34, 0.7  ;;  %v996_v58 = vsel %vm2070_vm10, 0.0, %v995_v20  ;;  %v997_v38 = vsel %vm2089_vm11, 0.0, %v992_v10  ;;  %v4676_v62 = vld [vmem:[#allocation83_spill] sm:$0xff]  ;;  %v4677_v53 = vmov 0.0  }
 0x1bb   :  { %vm901_vm8 = vcmp.gt.f32.partialorder %v899_v11, 0.7  ;;  %v902_v16 = vsel %vm900_vm7, 0.0, %v884_v9  ;;  %v904_v4 = vsel %vm900_vm7, 0.0, %v886_v18  ;;  %v906_v12 = vsel %vm900_vm7, 0.0, %v888_v3 }
 0x1bc   :  { %v903_v13 = vsel %vm901_vm8, 0.0, %v885_v21  ;;  %v905_v56 = vsel %vm901_vm8, 0.0, %v887_v44  ;;  %v907_v61 = vsel %vm901_vm8, 0.0, %v889_v27  ;;  %v908_v49 = vmul.f32 %v902_v16, %v4671_v37 }
 0x1bd   :  { %v909_v39 = vmul.f32 %v903_v13, %v4672_v24  ;;  %v910_v54 = vmul.f32 %v904_v4, %v4673_v57  ;;  %v911_v15 = vmul.f32 %v905_v56, %v4674_v32  ;;  %v914_v41 = vmul.f32 %v906_v12, %v4675_v31  ;;  %v3846_v57 = vld [vmem:[#allocation5 + $0x20] sm:$0xff] }
 0x1be   :  { %v915_v7 = vmul.f32 %v907_v61, %v4676_v62  ;;  %v932_v17 = vadd.f32 1.0, %v906_v12  ;;  %v933_v46 = vadd.f32 1.0, %v907_v61  ;;  %v936_v9 = vadd.f32 %v904_v4, %v4650_v40  ;;  %v4680_v61 = vld [vmem:[#allocation33_spill] sm:$0xff] }
 0x1bf   :  { %v937_v21 = vadd.f32 %v905_v56, %v4651_v0  ;;  %v912_v18 = vadd.f32 %v910_v54, %v908_v49  ;;  %v913_v44 = vadd.f32 %v911_v15, %v909_v39  ;;  %v940_v3 = vadd.f32 %v902_v16, %v4652_v8  ;;  %v4679_v56 = vld [vmem:[#allocation105_spill] sm:$0xff]  ;;  %v3850_v54 = vld [vmem:[#allocation5 + $0x28] sm:$0xff] }
 0x1c0   :  { %v941_v27 = vadd.f32 %v903_v13, %v4653_v60  ;;  %v1612_v59 = vsel %vm3729_vm6, 1.0, %v4677_v53  ;;  %934 = vst [vmem:[#allocation8 + $0x10] sm:$0xff] %v932_v17  ;;  %935 = vst [vmem:[#allocation8 + $0x18] sm:$0xff] %v933_v46  ;;  %v1006_v14 = vmax.f32 %v3768_v29, %v3572_v19  ;;  %v998_v34 = vmax.f32 %v985_v33, %v996_v58  ;;  %v4678_v13 = vld [vmem:[#allocation102_spill] sm:$0xff] }
 0x1c1   :  { %938 = vst [vmem:[#allocation8 + $0x50] sm:$0xff] %v936_v9  ;;  %939 = vst [vmem:[#allocation8 + $0x58] sm:$0xff] %v937_v21  ;;  %v999_v11 = vmax.f32 %v986_v30, %v997_v38  ;;  %v916_v10 = vadd.f32 %v914_v41, %v912_v18  ;;  %v917_v20 = vadd.f32 %v915_v7, %v913_v44  ;;  %v1613_v16 = vsel %vm3736_vm14, 1.0, %v4677_v53  ;;  %v4681_v19 = vld [vmem:[#allocation34_spill] sm:$0xff] }
 0x1c2   :  { %942 = vst [vmem:[#allocation8 + $0x90] sm:$0xff] %v940_v3  ;;  %943 = vst [vmem:[#allocation8 + $0x98] sm:$0xff] %v941_v27  ;;  %v1007_v43 = vmax.f32 %v3770_v50, %v3576_v5  ;;  %v1000_v4 = vmax.f32 %v4678_v13, %v998_v34  ;;  %v1002_v37 = vmax.f32 %v998_v34, %v4680_v61  ;;  %v926_v50 = vmul.f32 10.0, %v1612_v59  ;;  %v3880_v27 = vld [vmem:[#allocation5 + $0x30] sm:$0xff] }
 0x1c3   :  { %v1001_v12 = vmax.f32 %v4679_v56, %v999_v11  ;;  %v1003_v29 = vmax.f32 %v999_v11, %v4681_v19  ;;  %v918_v33 = vmul.f32 0.5, %v916_v10  ;;  %v919_v30 = vmul.f32 0.5, %v917_v20 }
 0x1c4   :  { %v3840_v58 = vmax.f32 %v1006_v14, %v1000_v4  ;;  %v1308_v28 = vmax.f32 %v1002_v37, 0.0  ;;  %v927_v39 = vmul.f32 10.0, %v1613_v16  ;;  %v3887_v14 = vld [vmem:[#allocation5 + $0x38] sm:$0xff] }
 0x1c5   :  { %v3842_v38 = vmax.f32 %v1007_v43, %v1001_v12  ;;  %v1309_v49 = vmax.f32 %v1003_v29, 0.0  ;;  %v920_v24 = vadd.f32 %v3726_v22, %v918_v33  ;;  %v921_v5 = vadd.f32 %v3733_v36, %v919_v30 }
 0x1c6   :  { %vm1010_vm9 = vcmp.gt.f32.partialorder %v3846_v57, %v3840_v58  ;;  %v1310_v32 = vmax.f32 %v1308_v28, %v3688_v45 }
 0x1c7   :  { %vm1011_vm10 = vcmp.gt.f32.partialorder %v3850_v54, %v3842_v38  ;;  %v1311_v15 = vmax.f32 %v1309_v49, %v3692_v35  ;;  %v928_v31 = vadd.f32 %v926_v50, %v920_v24  ;;  %v929_v22 = vadd.f32 %v927_v39, %v921_v5  ;;  %v4686_v24 = vld [vmem:[#allocation115_spill] sm:$0xff]  ;;  %v4687_v50 = vld [vmem:[#allocation116_spill] sm:$0xff]  ;;  %v4688_v39 = vld [vmem:[#allocation57_spill] sm:$0xff] }
 0x1c8   :  { %v1242_v36 = vsel %vm1010_vm9, %v3680_v55, 0.0  ;;  %v1243_v41 = vsel %vm1011_vm10, %v3684_v51, 0.0  ;;  %v1244_v62 = vsel %vm1010_vm9, %v3741_v42, 0.0  ;;  %v1245_v45 = vsel %vm1011_vm10, %v3744_v6, 0.0 }
 0x1c9   :  { %v1246_v55 = vsel %vm1010_vm9, %v3780_v63, 0.0  ;;  %v1247_v51 = vsel %vm1011_vm10, %v3784_v52, 0.0  ;;  %930 = vst [vmem:[#allocation7 + $0x10] sm:$0xff] %v928_v31  ;;  %931 = vst [vmem:[#allocation7 + $0x18] sm:$0xff] %v929_v22  ;;  %v1248_v35 = vsub.f32 0.0, %v1242_v36  ;;  %v1249_v7 = vsub.f32 0.0, %v1243_v41 }
 0x1ca   :  { %v1250_v42 = vsub.f32 0.0, %v1244_v62  ;;  %v1251_v17 = vsub.f32 0.0, %v1245_v45  ;;  %v1252_v46 = vsub.f32 0.0, %v1246_v55  ;;  %v1253_v9 = vsub.f32 0.0, %v1247_v51  ;;  %v4690_v22 = vld [vmem:[#allocation47_spill] sm:$0xff]  ;;  %v4691_v41 = vld [vmem:[#allocation48_spill] sm:$0xff] }
 0x1cb   :  { %v1254_v21 = vand.u32 2147483647, %v1248_v35  ;;  %v1255_v6 = vand.u32 2147483647, %v1249_v7  ;;  %vm3883_vm11 = vcmp.gt.f32.partialorder %v3880_v27, %v1310_v32  ;;  %vm3890_vm15 = vcmp.gt.f32.partialorder %v3887_v14, %v1311_v15  ;;  %v4689_v15 = vld [vmem:[#allocation58_spill] sm:$0xff] }
 0x1cc   :  { %v1256_v18 = vand.u32 2147483647, %v1250_v42  ;;  %v1257_v44 = vand.u32 2147483647, %v1251_v17  ;;  %v1260_v3 = vand.u32 2147483647, %v1252_v46 }
 0x1cd   :  { %v1261_v59 = vand.u32 2147483647, %v1253_v9  ;;  %v1514_v11 = vsel %vm3883_vm11, %v3788_v47, 0.0  ;;  %v1515_v20 = vsel %vm3890_vm15, %v3792_v2, 0.0  ;;  %v1516_v16 = vsel %vm3883_vm11, %v3796_v25, 0.0 }
 0x1ce   :  { %v1258_v52 = vmax.f32.f32 %v1254_v21, %v1256_v18  ;;  %v1259_v10 = vmax.f32.f32 %v1255_v6, %v1257_v44  ;;  %v1517_v43 = vsel %vm3890_vm15, %v3800_v1, 0.0  ;;  %v1518_v4 = vsel %vm3883_vm11, %v3804_v23, 0.0 }
 0x1cf   :  { %v1519_v47 = vsel %vm3890_vm15, %v3808_v26, 0.0  ;;  %v1520_v56 = vsub.f32 0.0, %v1514_v11  ;;  %v1521_v2 = vsub.f32 0.0, %v1515_v20  ;;  %v1522_v61 = vsub.f32 0.0, %v1516_v16 }
 0x1d0   :  { %v1262_v13 = vmax.f32.f32 %v1258_v52, %v1260_v3  ;;  %v1263_v12 = vmax.f32.f32 %v1259_v10, %v1261_v59  ;;  %v1523_v37 = vsub.f32 0.0, %v1517_v43  ;;  %v1524_v25 = vsub.f32 0.0, %v1518_v4 }
 0x1d1   :  { %v1525_v19 = vsub.f32 0.0, %v1519_v47  ;;  %v1526_v29 = vand.u32 2147483647, %v1520_v56  ;;  %v1528_v21 = vand.u32 2147483647, %v1522_v61  ;;  %v1614_v3 = vsel %vm1010_vm9, 1.0, %v4677_v53 }
 0x1d2   :  { %vm1264_vm0 = vcmp.gt.f32.partialorder %v1262_v13, 0.7  ;;  %vm1265_vm1 = vcmp.gt.f32.partialorder %v1263_v12, 0.7  ;;  %v1529_v6 = vand.u32 2147483647, %v1523_v37 }
 0x1d3   :  { %v1266_v1 = vsel %vm1264_vm0, 0.0, %v1248_v35  ;;  %v1268_v33 = vsel %vm1264_vm0, 0.0, %v1250_v42  ;;  %v1270_v30 = vsel %vm1264_vm0, 0.0, %v1252_v46  ;;  %v1267_v28 = vsel %vm1265_vm1, 0.0, %v1249_v7 }
 0x1d4   :  { %v1269_v49 = vsel %vm1265_vm1, 0.0, %v1251_v17  ;;  %v1271_v23 = vsel %vm1265_vm1, 0.0, %v1253_v9  ;;  %v1272_v5 = vmul.f32 %v1266_v1, %v4686_v24  ;;  %v1273_v26 = vmul.f32 %v1267_v28, %v4687_v50  ;;  %v4692_v50 = vld [vmem:[#allocation42_spill] sm:$0xff] }
 0x1d5   :  { %v1274_v32 = vmul.f32 %v1268_v33, %v4688_v39  ;;  %v1275_v31 = vmul.f32 %v1269_v49, %v4689_v15  ;;  %v1278_v36 = vmul.f32 %v1270_v30, %v4690_v22  ;;  %v1279_v62 = vmul.f32 %v1271_v23, %v4691_v41  ;;  %v4694_v39 = vld [vmem:[#allocation62_spill] sm:$0xff] }
 0x1d6   :  { %v1296_v45 = vadd.f32 2.0, %v1270_v30  ;;  %v1297_v55 = vadd.f32 2.0, %v1271_v23  ;;  %v1300_v51 = vadd.f32 %v1268_v33, %v4650_v40  ;;  %v1301_v42 = vadd.f32 %v1269_v49, %v4651_v0  ;;  %v4695_v15 = vld [vmem:[#allocation50_spill] sm:$0xff] }
 0x1d7   :  { %v1276_v35 = vadd.f32 %v1274_v32, %v1272_v5  ;;  %v1277_v7 = vadd.f32 %v1275_v31, %v1273_v26  ;;  %v1304_v17 = vadd.f32 %v1266_v1, %v4652_v8  ;;  %v1305_v46 = vadd.f32 %v1267_v28, %v4653_v60  ;;  %v4693_v26 = vld [vmem:[#allocation59_spill] sm:$0xff] }
 0x1d8   :  { %1298 = vst [vmem:[#allocation8 + $0x20] sm:$0xff] %v1296_v45  ;;  %1299 = vst [vmem:[#allocation8 + $0x28] sm:$0xff] %v1297_v55  ;;  %v1527_v9 = vand.u32 2147483647, %v1521_v2  ;;  %v1615_v52 = vsel %vm1011_vm10, 1.0, %v4677_v53  ;;  %v1530_v59 = vmax.f32.f32 %v1526_v29, %v1528_v21  ;;  %v1290_v12 = vmul.f32 10.0, %v1614_v3 }
 0x1d9   :  { %1302 = vst [vmem:[#allocation8 + $0x60] sm:$0xff] %v1300_v51  ;;  %v1280_v18 = vadd.f32 %v1278_v36, %v1276_v35  ;;  %v1281_v44 = vadd.f32 %v1279_v62, %v1277_v7  ;;  %1303 = vst [vmem:[#allocation8 + $0x68] sm:$0xff] %v1301_v42  ;;  %v1532_v10 = vand.u32 2147483647, %v1524_v25  ;;  %v1533_v20 = vand.u32 2147483647, %v1525_v19 }
 0x1da   :  { %1306 = vst [vmem:[#allocation8 + $0xa0] sm:$0xff] %v1304_v17  ;;  %1307 = vst [vmem:[#allocation8 + $0xa8] sm:$0xff] %v1305_v46  ;;  %v1531_v11 = vmax.f32.f32 %v1527_v9, %v1529_v6  ;;  %v1291_v1 = vmul.f32 10.0, %v1615_v52  ;;  %v1616_v55 = vsel %vm3883_vm11, 1.0, %v4677_v53 }
 0x1db   :  { %v1282_v16 = vmul.f32 0.5, %v1280_v18  ;;  %v1283_v43 = vmul.f32 0.5, %v1281_v44  ;;  %v1534_v13 = vmax.f32.f32 %v1530_v59, %v1532_v10 }
 0x1dc   :  { %v1535_v4 = vmax.f32.f32 %v1531_v11, %v1533_v20 }
 0x1dd   :  { %v1284_v47 = vadd.f32 %v3846_v57, %v1282_v16  ;;  %v1285_v58 = vadd.f32 %v3850_v54, %v1283_v43  ;;  %vm1536_vm2 = vcmp.gt.f32.partialorder %v1534_v13, 0.7 }
 0x1de   :  { %vm1537_vm3 = vcmp.gt.f32.partialorder %v1535_v4, 0.7  ;;  %v1538_v30 = vsel %vm1536_vm2, 0.0, %v1520_v56  ;;  %v1540_v29 = vsel %vm1536_vm2, 0.0, %v1522_v61  ;;  %v1542_v23 = vsel %vm1536_vm2, 0.0, %v1524_v25  ;;  %v4696_v56 = vld [vmem:[#allocation51_spill] sm:$0xff] }
 0x1df   :  { %v1292_v38 = vadd.f32 %v1290_v12, %v1284_v47  ;;  %v1293_v33 = vadd.f32 %v1291_v1, %v1285_v58  ;;  %v1539_v28 = vsel %vm1537_vm3, 0.0, %v1521_v2  ;;  %v1541_v49 = vsel %vm1537_vm3, 0.0, %v1523_v37 }
 0x1e0   :  { %v1543_v24 = vsel %vm1537_vm3, 0.0, %v1525_v19  ;;  %v1544_v5 = vmul.f32 %v1538_v30, %v4611_v48  ;;  %v1545_v57 = vmul.f32 %v1539_v28, %v4692_v50  ;;  %v1546_v54 = vmul.f32 %v1540_v29, %v4693_v26 }
 0x1e1   :  { %1294 = vst [vmem:[#allocation7 + $0x20] sm:$0xff] %v1292_v38  ;;  %1295 = vst [vmem:[#allocation7 + $0x28] sm:$0xff] %v1293_v33  ;;  %v1547_v32 = vmul.f32 %v1541_v49, %v4694_v39  ;;  %v1550_v31 = vmul.f32 %v1542_v23, %v4695_v15  ;;  %v1551_v2 = vmul.f32 %v1543_v24, %v4696_v56  ;;  %v1568_v61 = vadd.f32 3.0, %v1542_v23 }
 0x1e2   :  { %v1569_v37 = vadd.f32 3.0, %v1543_v24  ;;  %v1548_v25 = vadd.f32 %v1546_v54, %v1544_v5  ;;  %v1572_v22 = vadd.f32 %v1540_v29, %v4650_v40  ;;  %v1573_v48 = vadd.f32 %v1541_v49, %v4651_v0 }
 0x1e3   :  { %v1549_v19 = vadd.f32 %v1547_v32, %v1545_v57  ;;  %1570 = vst [vmem:[#allocation8 + $0x30] sm:$0xff] %v1568_v61  ;;  %v1576_v36 = vadd.f32 %v1538_v30, %v4652_v8  ;;  %v1577_v41 = vadd.f32 %v1539_v28, %v4653_v60  ;;  %v1617_v40 = vsel %vm3890_vm15, 1.0, %v4677_v53 }
 0x1e4   :  { %1571 = vst [vmem:[#allocation8 + $0x38] sm:$0xff] %v1569_v37  ;;  %v1552_v62 = vadd.f32 %v1550_v31, %v1548_v25  ;;  %1574 = vst [vmem:[#allocation8 + $0x70] sm:$0xff] %v1572_v22 }
 0x1e5   :  { %v1553_v45 = vadd.f32 %v1551_v2, %v1549_v19  ;;  %1575 = vst [vmem:[#allocation8 + $0x78] sm:$0xff] %v1573_v48  ;;  %1578 = vst [vmem:[#allocation8 + $0xb0] sm:$0xff] %v1576_v36 }
 0x1e6   :  { %1579 = vst [vmem:[#allocation8 + $0xb8] sm:$0xff] %v1577_v41  ;;  %v1554_v0 = vmul.f32 0.5, %v1552_v62 }
 0x1e7   :  { %v1555_v51 = vmul.f32 0.5, %v1553_v45 }
 0x1e8   :  { %1706 = shalt.err (!%p1703_p6)
}
 0x1e9   :  { %s1707_s16 = scalar_lea.hbm %s3977_s3, 3072 }
 0x1ea   :  { %p1708_p7 = scmp.ne.s32.totalorder %s3977_s3, %s1707_s16  ;;  %p1711_p8 = scmp.lt.u32.totalorder %s1707_s16, %s3977_s3 }
 0x1ec   :  { %p1713_p9 = pnand %p1711_p8, %p1708_p7 }
 0x1ee   :  { %1716 = shalt.err (!%p1713_p9)
}
 0x1ef   :  { %1599 = dma.vmem_to_hbm [thread:$0]  %s1597_s12, 3072, %s3977_s3, [#allocation9]   ;;  %v1556_v8 = vadd.f32 %v3880_v27, %v1554_v0  ;;  %v1557_v60 = vadd.f32 %v3887_v14, %v1555_v51  ;;  %v1562_v53 = vmul.f32 10.0, %v1616_v55  ;;  %v1563_v63 = vmul.f32 10.0, %v1617_v40 }
 0x1f0   :  { %s1755_s23 = smov [#allocation7]  }
 0x1f1   :  { %s1586_s24 = sshll.u32 %s1755_s23, 4  ;;  %v1564_v34 = vadd.f32 %v1562_v53, %v1556_v8  ;;  %v1565_v35 = vadd.f32 %v1563_v63, %v1557_v60  ;;  %s1587_s24 = int_to_ptr.vmem [resolvable:$true] %s1586_s24 }
 0x1f2   :  { %s1717_s25 = scalar_lea.vmem %s1587_s24, 1024  ;;  %p1722_p11 = scmp.lt.s32.totalorder %s1587_s24, %s1587_s24 }
 0x1f3   :  { %1566 = vst [vmem:[#allocation7 + $0x30] sm:$0xff] %v1564_v34  ;;  %1567 = vst [vmem:[#allocation7 + $0x38] sm:$0xff] %v1565_v35  ;;  %p1718_p10 = scmp.ne.s32.totalorder %s1587_s24, %s1717_s25  ;;  %p1723_p12 = scmp.lt.s32.totalorder %s1717_s25, %s1717_s25 }
 0x1f5   :  { %p1724_p13 = por %p1723_p12, %p1722_p11 }
 0x1f7   :  { %p1725_p0 = pnand %p1724_p13, %p1718_p10 }
 0x1f9   :  { %1728 = shalt.err (!%p1725_p0)
}
 0x1fa   :  { %s1729_s27 = scalar_lea.hbm %s3976_s2, 1024 }
 0x1fb   :  { %p1730_p1 = scmp.ne.s32.totalorder %s3976_s2, %s1729_s27  ;;  %p1733_p2 = scmp.lt.u32.totalorder %s1729_s27, %s3976_s2 }
 0x1fd   :  { %p1735_p3 = pnand %p1733_p2, %p1730_p1 }
 0x1ff   :  { %1738 = shalt.err (!%p1735_p3)
}
 0x200   :  { %1589 = dma.vmem_to_hbm [thread:$0]  %s1587_s24, 1024, %s3976_s2, [#allocation4]  }
 0x201   :  { %1743 = dma.done.wait [#allocation4], 1024  }
 0x202   :  { %1744 = vsyncadd [#allocation4], 4294966272 }
 0x203   :  { %1745 = dma.done.wait [#allocation9], 3072  }
 0x204   :  { %1746 = vsyncadd [#allocation9], 4294964224 }
 0x205   :  { %1606 = vsyncpa [#allocation3], 1 }
 0x206   :  { %1607 = vsyncpa [#allocation6], 1 }
 0x207   :  { %1608 = vsyncpa [#allocation4], 1 }
 0x208   :  { %1609 = vsyncpa [#allocation9], 1 }

</bundles_post_ra>
